<compile_context>
chip_gen: v5e
topology: v5e:2x2
jax: 0.10.0
libtpu: 0.0.40
codegen_flags: <defaults>
</compile_context>

<pallas_src>
import functools

import jax
import jax.numpy as jnp
from jax.experimental import pallas as pl
from jax.experimental.pallas import tpu as pltpu


# ---------------------------------------------------------------------------
# Fused SeparableConv2d (+ folded BatchNorm2d, + optional ReLU pre/post)
# ---------------------------------------------------------------------------
def _fused_sepconv_kernel(x_ref, coord_ref, dw_ref, wbig_ref, shift_ref,
                          o_ref, *, H, W, K, padding, dilation,
                          relu_in, relu_out):
    """Whole batch, one grid step, sublane-packed lane-dense slab layout.

    x_ref     : (Ci*N, Lp)   input slab; row = c*N + n, lane = oh*W + ow,
                             Lp = H*W rounded up to a multiple of 128
                             (pad lanes hold don't-care data).
    coord_ref : (2, Lp)      int32 rows [oh, ow] per lane (precomputed).
    dw_ref    : (Ci*N, K*K)  depthwise weights (per channel, repeated per img).
    wbig_ref  : (Co*N, Ci*N) block-diagonal pointwise weights, BN scale folded.
    shift_ref : (Co*N, 1)    folded BN shift (zeros when no BN).
    o_ref     : (Co*N, Lp)   output slab (unmasked full-vreg stores).
    """
    Lp = x_ref.shape[-1]
    x = x_ref[...].astype(jnp.float32)
    if relu_in:
        x = jnp.maximum(x, 0.0)                      # nn.ReLU before the conv
    dw = dw_ref[...].astype(jnp.float32)

    oh = coord_ref[0:1, :]                           # (1, Lp) int32
    ow = coord_ref[1:2, :]

    # Hoisted boundary masks: one (1, Lp) compare per distinct tap offset
    # (4 compares total for K=3), combined with a single AND per tap and
    # broadcast inside the select.
    row_mask, col_mask = {}, {}
    for k in range(K):
        d = k * dilation - padding
        if d not in row_mask:
            row_mask[d] = None if d == 0 else (oh >= -d if d < 0 else oh < H - d)
        if d not in col_mask:
            col_mask[d] = None if d == 0 else (ow >= -d if d < 0 else ow < W - d)

    # Depthwise conv: K*K statically-unrolled taps.  Each tap = lane roll
    # (XLU slot) + one broadcast select + per-row FMA (VPU), on (8,128)-aligned
    # full vregs.  Rolls never mix rows (images); any wrapped / pad-lane source
    # maps to an out-of-range (oh+dh, ow+dw) and is masked.
    acc = jnp.zeros(x.shape, jnp.float32)
    for kh in range(K):
        dh = kh * dilation - padding
        rm = row_mask[dh]
        for kw in range(K):
            dc = kw * dilation - padding
            cm = col_mask[dc]
            s = dh * W + dc                          # flat lane offset of tap
            shifted = x if s == 0 else pltpu.roll(x, shift=(-s) % Lp, axis=1)
            valid = rm if cm is None else (cm if rm is None else rm & cm)
            if valid is not None:
                shifted = jnp.where(valid, shifted, 0.0)
            t = kh * K + kw
            acc = acc + shifted * dw[:, t:t + 1]

    # Pointwise 1x1 conv for the whole batch: ONE MXU matmul against the
    # block-diagonal weight (BN scale already folded into its rows), then the
    # folded BN shift + optional ReLU epilogue (VPU ops riding under slack).
    out = jnp.dot(wbig_ref[...].astype(jnp.float32), acc,
                  preferred_element_type=jnp.float32)
    out = out + shift_ref[...].astype(jnp.float32)
    if relu_out:
        out = jnp.maximum(out, 0.0)
    o_ref[...] = out.astype(o_ref.dtype)


def _round_up(n, m):
    return (n + m - 1) // m * m


def fused_sepconv_bn_relu(x_slab, dw_w, pw_w, bn_scale, bn_shift, *,
                          N, H, W, padding=1, dilation=1,
                          relu_in=False, relu_out=False):
    """One fused SeparableConv2d + BN + (ReLU) block on the slab layout.

    x_slab: (Ci*N, Lp) slab (row = c*N + n, lane = oh*W + ow, Lp = H*W padded
    up to a multiple of 128).  Returns the (Co*N, Lp) output slab.
    dw_w: (Ci, 1, K, K); pw_w: (Co, Ci, 1, 1); bn_scale/bn_shift: (Co,).
    """
    Ci, Co, K = dw_w.shape[0], pw_w.shape[0], dw_w.shape[-1]
    L = H * W
    Lp = x_slab.shape[-1]
    assert x_slab.shape[0] == Ci * N and Lp >= L and Lp % 128 == 0
    # ExitModule's SeparableConv2d blocks are all stride=1, 'same'-sized
    # (K=3, padding=1, dilation=1); enforce that configuration.
    assert 2 * padding == dilation * (K - 1), "only same-size stride-1 sepconv"

    dtype = x_slab.dtype
    # Per-row depthwise weights (row = c*N + n -> channel c's filter).
    dw2 = jnp.repeat(dw_w.reshape(Ci, K * K).astype(dtype), N, axis=0)
    # Block-diagonal pointwise weights with BN scale folded in:
    #   wbig[o*N + n, c*N + m] = scale[o] * pw[o, c] * (n == m)
    pw2 = pw_w.reshape(Co, Ci).astype(jnp.float32) * bn_scale[:, None]
    wbig = jnp.kron(pw2, jnp.eye(N, dtype=jnp.float32)).astype(dtype)
    shift = jnp.repeat(bn_shift.astype(dtype), N)[:, None]          # (Co*N, 1)
    # Per-lane (oh, ow) coordinates, precomputed so the kernel does no
    # iota / integer div-mod work.
    lane = jnp.arange(Lp, dtype=jnp.int32)
    coords = jnp.stack([lane // W, lane % W])                       # (2, Lp)

    kernel = functools.partial(
        _fused_sepconv_kernel, H=H, W=W, K=K, padding=padding,
        dilation=dilation, relu_in=relu_in, relu_out=relu_out)

    flops = 2 * L * N * Ci * K * K + 2 * Lp * (Co * N) * (Ci * N)
    bytes_accessed = 4 * (Ci * N * Lp + Co * N * Lp + Ci * N * K * K
                          + Co * N * Ci * N + Co * N + 2 * Lp)

    # Single grid step: at these shapes the per-step fixed overhead (~0.35us)
    # dominates, so the whole batch is one invocation.
    # TODO(synk): for production ExitModule widths (728..2048 channels), add a
    # "parallel" grid axis over images / O-tiles (engages v7x's 2nd TC) and
    # tile L with halo-aware index maps sized per generation
    # (pltpu.get_tpu_info().vmem_capacity_bytes); set vmem_limit_bytes then.
    return pl.pallas_call(
        kernel,
        out_shape=jax.ShapeDtypeStruct((Co * N, Lp), dtype),
        grid=(1,),
        in_specs=[
            pl.BlockSpec((Ci * N, Lp), lambda i: (0, 0)),
            pl.BlockSpec((2, Lp), lambda i: (0, 0)),
            pl.BlockSpec((Ci * N, K * K), lambda i: (0, 0)),
            pl.BlockSpec((Co * N, Ci * N), lambda i: (0, 0)),
            pl.BlockSpec((Co * N, 1), lambda i: (0, 0)),
        ],
        out_specs=pl.BlockSpec((Co * N, Lp), lambda i: (0, 0)),
        compiler_params=pltpu.CompilerParams(
            dimension_semantics=("arbitrary",)),
        cost_estimate=pl.CostEstimate(
            flops=flops, transcendentals=0, bytes_accessed=bytes_accessed),
    )(x_slab, coords, dw2, wbig, shift)


# ---------------------------------------------------------------------------
# Slab-layout helpers (pure XLA plumbing; no relayout between chained blocks)
# ---------------------------------------------------------------------------
def nchw_to_slab(x):
    """(N, C, H, W) -> (C*N, H*W); row = c*N + n, lane = h*W + w."""
    N, C, H, W = x.shape
    return jnp.transpose(x, (1, 0, 2, 3)).reshape(C * N, H * W)


def pad_lanes(slab, L):
    """Pad the lane dim of a (R, L) slab up to a multiple of 128."""
    Lp = _round_up(L, 128)
    return slab if Lp == slab.shape[-1] else jnp.pad(
        slab, ((0, 0), (0, Lp - slab.shape[-1])))


def slab_maxpool(slab, H, W, k, stride):
    """MaxPool2d(k, stride) on a (R, >=H*W) slab -> ((R, Ho*Wo), Ho, Wo).
    TODO(synk): pooling is an XLA reduce_window on the slab, not a Pallas
    kernel (needs a strided lane gather to fuse)."""
    R = slab.shape[0]
    y = jax.lax.reduce_window(slab[:, :H * W].reshape(R, H, W), -jnp.inf,
                              jax.lax.max, (1, k, k), (1, stride, stride),
                              'VALID')
    Ho, Wo = y.shape[1], y.shape[2]
    return y.reshape(R, Ho * Wo), Ho, Wo


def slab_avgpool(slab, H, W, k):
    """AvgPool2d(k) on a (R, >=H*W) slab -> ((R, Ho*Wo), Ho, Wo)."""
    R = slab.shape[0]
    y = jax.lax.reduce_window(slab[:, :H * W].reshape(R, H, W), 0.0,
                              jax.lax.add, (1, k, k), (1, k, k), 'VALID')
    y = y / float(k * k)
    Ho, Wo = y.shape[1], y.shape[2]
    return y.reshape(R, Ho * Wo), Ho, Wo


def fold_bn(gamma, beta, mean, var, eps=1e-5):
    """BatchNorm2d (eval) folded to per-channel scale/shift."""
    scale = gamma * jax.lax.rsqrt(var + eps)
    return scale, beta - mean * scale


# ---------------------------------------------------------------------------
# ExitModule forward
# ---------------------------------------------------------------------------
def exit_module_forward(x, p):
    """x: (N, Cin, H, W) -> (N, features); four fused Pallas kernels."""
    N, Cin, H, W = x.shape
    dn = ('NCHW', 'OIHW', 'NCHW')

    # Skip path: Conv2d(Cin -> c1, 3, stride=2, bias=True) on the raw input.
    # TODO(synk): dense stride-2 3x3 conv not kernelized (strided lane gather).
    skip = jax.lax.conv_general_dilated(x, p['skip_w'], (2, 2),
                                        [(0, 0), (0, 0)],
                                        dimension_numbers=dn)
    skip = skip + p['skip_b'][None, :, None, None]

    # ---- block1: ReLU, SepConv, BN, ReLU, SepConv, BN, MaxPool(3,2) ----
    s = pad_lanes(nchw_to_slab(x), H * W)
    sc1, sh1 = fold_bn(*p['bn1'])
    s = fused_sepconv_bn_relu(s, p['dw1'], p['pw1'], sc1, sh1, N=N, H=H, W=W,
                              relu_in=True, relu_out=True)
    sc2, sh2 = fold_bn(*p['bn2'])
    s = fused_sepconv_bn_relu(s, p['dw2'], p['pw2'], sc2, sh2, N=N, H=H, W=W,
                              relu_in=False, relu_out=False)
    s, Hp, Wp = slab_maxpool(s, H, W, 3, 2)

    # Residual add (slab layout).
    s = s + nchw_to_slab(skip)

    # ---- block2: SepConv, BN, ReLU, SepConv, BN, ReLU, AvgPool(6) ----
    s = pad_lanes(s, Hp * Wp)
    sc3, sh3 = fold_bn(*p['bn3'])
    s = fused_sepconv_bn_relu(s, p['dw3'], p['pw3'], sc3, sh3, N=N, H=Hp, W=Wp,
                              relu_in=False, relu_out=True)
    sc4, sh4 = fold_bn(*p['bn4'])
    s = fused_sepconv_bn_relu(s, p['dw4'], p['pw4'], sc4, sh4, N=N, H=Hp, W=Wp,
                              relu_in=False, relu_out=True)
    s, Hf, Wf = slab_avgpool(s, Hp, Wp, 6)

    # Flatten like x.view(B, -1) on (N, C, Hf, Wf): channel-major per sample.
    Cf = s.shape[0] // N
    out = jnp.transpose(s.reshape(Cf, N, Hf * Wf), (1, 0, 2))
    return out.reshape(N, Cf * Hf * Wf)


# ---------------------------------------------------------------------------
# Pure-JAX reference of the PyTorch ExitModule forward (eval-mode BN)
# ---------------------------------------------------------------------------
def _reference(x, p, eps=1e-5):
    dn = ('NCHW', 'OIHW', 'NCHW')

    def sepconv(y, dw, pw):
        C = y.shape[1]
        y = jax.lax.conv_general_dilated(y, dw, (1, 1), [(1, 1), (1, 1)],
                                         feature_group_count=C,
                                         dimension_numbers=dn)
        return jax.lax.conv_general_dilated(y, pw, (1, 1), [(0, 0), (0, 0)],
                                            dimension_numbers=dn)

    def bn(y, prm):
        g, b, m, v = prm
        s = g * jax.lax.rsqrt(v + eps)
        return (y - m[None, :, None, None]) * s[None, :, None, None] \
            + b[None, :, None, None]

    relu = lambda y: jnp.maximum(y, 0.0)

    # block1
    y = relu(x)
    y = relu(bn(sepconv(y, p['dw1'], p['pw1']), p['bn1']))
    y = bn(sepconv(y, p['dw2'], p['pw2']), p['bn2'])
    y = jax.lax.reduce_window(y, -jnp.inf, jax.lax.max,
                              (1, 1, 3, 3), (1, 1, 2, 2), 'VALID')
    # skip
    skip = jax.lax.conv_general_dilated(x, p['skip_w'], (2, 2),
                                        [(0, 0), (0, 0)], dimension_numbers=dn)
    y = y + skip + p['skip_b'][None, :, None, None]
    # block2
    y = relu(bn(sepconv(y, p['dw3'], p['pw3']), p['bn3']))
    y = relu(bn(sepconv(y, p['dw4'], p['pw4']), p['bn4']))
    y = jax.lax.reduce_window(y, 0.0, jax.lax.add, (1, 1, 6, 6),
                              (1, 1, 6, 6), 'VALID') / 36.0
    return y.reshape(y.shape[0], -1)


if __name__ == "__main__":
    # Small stand-in for ExitModule's (728, 1024, 1536, 2048) channel widths;
    # all C*N are multiples of 8 so the f32 slabs fill sublanes exactly.
    N, Cin, H, W = 2, 8, 16, 16
    c_mid, c1, c2, c3 = 8, 16, 24, 32     # 728->728->1024 ; 1024->1536->2048
    K = 3

    key = jax.random.PRNGKey(0)
    ks = jax.random.split(key, 16)
    f32 = jnp.float32

    def conv_w(k, shape):
        return jax.random.normal(k, shape, dtype=f32) * 0.1

    def bn_params(k, c):
        k1, k2, k3, k4 = jax.random.split(k, 4)
        return (0.5 + jax.random.uniform(k1, (c,), dtype=f32),   # gamma
                jax.random.normal(k2, (c,), dtype=f32) * 0.1,    # beta
                jax.random.normal(k3, (c,), dtype=f32) * 0.1,    # running mean
                0.5 + jax.random.uniform(k4, (c,), dtype=f32))   # running var

    params = {
        'dw1': conv_w(ks[0], (Cin, 1, K, K)),
        'pw1': conv_w(ks[1], (c_mid, Cin, 1, 1)),
        'bn1': bn_params(ks[2], c_mid),
        'dw2': conv_w(ks[3], (c_mid, 1, K, K)),
        'pw2': conv_w(ks[4], (c1, c_mid, 1, 1)),
        'bn2': bn_params(ks[5], c1),
        'skip_w': conv_w(ks[6], (c1, Cin, K, K)),
        'skip_b': jax.random.normal(ks[7], (c1,), dtype=f32) * 0.1,
        'dw3': conv_w(ks[8], (c1, 1, K, K)),
        'pw3': conv_w(ks[9], (c2, c1, 1, 1)),
        'bn3': bn_params(ks[10], c2),
        'dw4': conv_w(ks[11], (c2, 1, K, K)),
        'pw4': conv_w(ks[12], (c3, c2, 1, 1)),
        'bn4': bn_params(ks[13], c3),
    }
    x = jax.random.normal(ks[14], (N, Cin, H, W), dtype=f32)

    fwd = jax.jit(exit_module_forward)
    out = jax.block_until_ready(fwd(x, params))
    ref = _reference(x, params)

    assert out.shape == ref.shape == (N, c3), (out.shape, ref.shape)
    assert jnp.allclose(out, ref, atol=5e-4, rtol=5e-4), (
        "mismatch vs reference, max abs err = %g"
        % float(jnp.max(jnp.abs(out - ref))))

    print("KERNEL_OK")
</pallas_src>

<mosaic_0001>
module attributes {stable_mosaic.version = 11 : i64} {
  func.func @_fused_sepconv_kernel(%arg0: i32, %arg1: memref<16x256xf32, #tpu.memory_space<vmem>>, %arg2: memref<2x256xi32, #tpu.memory_space<vmem>>, %arg3: memref<16x9xf32, #tpu.memory_space<vmem>>, %arg4: memref<16x16xf32, #tpu.memory_space<vmem>>, %arg5: memref<16x1xf32, #tpu.memory_space<vmem>>, %arg6: memref<16x256xf32, #tpu.memory_space<vmem>>) attributes {dimension_semantics = [#tpu.dimension_semantics<arbitrary>], iteration_bounds = array<i64: 1>, scalar_prefetch = 0 : i64, scratch_operands = 0 : i64, tpu.core_type = #tpu.core_type<tc>, window_params = [{pipeline_mode = #tpu.pipeline_mode<synchronous>, transform_indices = @transform_0, window_bounds = array<i64: 16, 256>}, {pipeline_mode = #tpu.pipeline_mode<synchronous>, transform_indices = @transform_1, window_bounds = array<i64: 2, 256>}, {pipeline_mode = #tpu.pipeline_mode<synchronous>, transform_indices = @transform_2, window_bounds = array<i64: 16, 9>}, {pipeline_mode = #tpu.pipeline_mode<synchronous>, transform_indices = @transform_3, window_bounds = array<i64: 16, 16>}, {pipeline_mode = #tpu.pipeline_mode<synchronous>, transform_indices = @transform_4, window_bounds = array<i64: 16, 1>}, {pipeline_mode = #tpu.pipeline_mode<synchronous>, transform_indices = @transform_5, window_bounds = array<i64: 16, 256>}]} {
    %c0 = arith.constant 0 : index
    %c0_0 = arith.constant 0 : index
    %0 = vector.load %arg1[%c0, %c0_0] : memref<16x256xf32, #tpu.memory_space<vmem>>, vector<16x256xf32>
    %cst = arith.constant 0.000000e+00 : f32
    %1 = vector.broadcast %cst : f32 to vector<16x256xf32>
    %2 = arith.maximumf %0, %1 : vector<16x256xf32>
    %c0_1 = arith.constant 0 : index
    %c0_2 = arith.constant 0 : index
    %3 = vector.load %arg3[%c0_1, %c0_2] : memref<16x9xf32, #tpu.memory_space<vmem>>, vector<16x9xf32>
    %c0_3 = arith.constant 0 : index
    %c0_4 = arith.constant 0 : index
    %4 = vector.load %arg2[%c0_3, %c0_4] : memref<2x256xi32, #tpu.memory_space<vmem>>, vector<1x256xi32>
    %c1 = arith.constant 1 : index
    %c0_5 = arith.constant 0 : index
    %5 = vector.load %arg2[%c1, %c0_5] : memref<2x256xi32, #tpu.memory_space<vmem>>, vector<1x256xi32>
    %c1_i32 = arith.constant 1 : i32
    %6 = vector.broadcast %c1_i32 : i32 to vector<1x256xi32>
    %7 = arith.cmpi sge, %4, %6 : vector<1x256xi32>
    %c1_i32_6 = arith.constant 1 : i32
    %8 = vector.broadcast %c1_i32_6 : i32 to vector<1x256xi32>
    %9 = arith.cmpi sge, %5, %8 : vector<1x256xi32>
    %c15_i32 = arith.constant 15 : i32
    %10 = vector.broadcast %c15_i32 : i32 to vector<1x256xi32>
    %11 = arith.cmpi slt, %4, %10 : vector<1x256xi32>
    %c15_i32_7 = arith.constant 15 : i32
    %12 = vector.broadcast %c15_i32_7 : i32 to vector<1x256xi32>
    %13 = arith.cmpi slt, %5, %12 : vector<1x256xi32>
    %cst_8 = arith.constant 0.000000e+00 : f32
    %14 = vector.broadcast %cst_8 : f32 to vector<16x256xf32>
    %c17_i32 = arith.constant 17 : i32
    %15 = tpu.dynamic_rotate %2 by %c17_i32 dim 1 : vector<16x256xf32>, i32 -> vector<16x256xf32>
    %16 = arith.andi %7, %9 : vector<1x256xi1>
    %cst_9 = arith.constant 0.000000e+00 : f32
    %17 = vector.shape_cast %16 : vector<1x256xi1> to vector<1x256xi1>
    %18 = vector.broadcast %17 : vector<1x256xi1> to vector<16x256xi1>
    %19 = vector.broadcast %cst_9 : f32 to vector<16x256xf32>
    %20 = arith.select %18, %15, %19 : vector<16x256xi1>, vector<16x256xf32>
    %21 = vector.extract_strided_slice %3 {offsets = [0, 0], sizes = [16, 1], strides = [1, 1]} : vector<16x9xf32> to vector<16x1xf32>
    %22 = vector.broadcast %21 : vector<16x1xf32> to vector<16x256xf32>
    %23 = arith.mulf %20, %22 : vector<16x256xf32>
    %24 = arith.addf %14, %23 : vector<16x256xf32>
    %c16_i32 = arith.constant 16 : i32
    %25 = tpu.dynamic_rotate %2 by %c16_i32 dim 1 : vector<16x256xf32>, i32 -> vector<16x256xf32>
    %cst_10 = arith.constant 0.000000e+00 : f32
    %26 = vector.shape_cast %7 : vector<1x256xi1> to vector<1x256xi1>
    %27 = vector.broadcast %26 : vector<1x256xi1> to vector<16x256xi1>
    %28 = vector.broadcast %cst_10 : f32 to vector<16x256xf32>
    %29 = arith.select %27, %25, %28 : vector<16x256xi1>, vector<16x256xf32>
    %30 = vector.extract_strided_slice %3 {offsets = [0, 1], sizes = [16, 1], strides = [1, 1]} : vector<16x9xf32> to vector<16x1xf32>
    %31 = vector.broadcast %30 : vector<16x1xf32> to vector<16x256xf32>
    %32 = arith.mulf %29, %31 : vector<16x256xf32>
    %33 = arith.addf %24, %32 : vector<16x256xf32>
    %c15_i32_11 = arith.constant 15 : i32
    %34 = tpu.dynamic_rotate %2 by %c15_i32_11 dim 1 : vector<16x256xf32>, i32 -> vector<16x256xf32>
    %35 = arith.andi %7, %13 : vector<1x256xi1>
    %cst_12 = arith.constant 0.000000e+00 : f32
    %36 = vector.shape_cast %35 : vector<1x256xi1> to vector<1x256xi1>
    %37 = vector.broadcast %36 : vector<1x256xi1> to vector<16x256xi1>
    %38 = vector.broadcast %cst_12 : f32 to vector<16x256xf32>
    %39 = arith.select %37, %34, %38 : vector<16x256xi1>, vector<16x256xf32>
    %40 = vector.extract_strided_slice %3 {offsets = [0, 2], sizes = [16, 1], strides = [1, 1]} : vector<16x9xf32> to vector<16x1xf32>
    %41 = vector.broadcast %40 : vector<16x1xf32> to vector<16x256xf32>
    %42 = arith.mulf %39, %41 : vector<16x256xf32>
    %43 = arith.addf %33, %42 : vector<16x256xf32>
    %c1_i32_13 = arith.constant 1 : i32
    %44 = tpu.dynamic_rotate %2 by %c1_i32_13 dim 1 : vector<16x256xf32>, i32 -> vector<16x256xf32>
    %cst_14 = arith.constant 0.000000e+00 : f32
    %45 = vector.shape_cast %9 : vector<1x256xi1> to vector<1x256xi1>
    %46 = vector.broadcast %45 : vector<1x256xi1> to vector<16x256xi1>
    %47 = vector.broadcast %cst_14 : f32 to vector<16x256xf32>
    %48 = arith.select %46, %44, %47 : vector<16x256xi1>, vector<16x256xf32>
    %49 = vector.extract_strided_slice %3 {offsets = [0, 3], sizes = [16, 1], strides = [1, 1]} : vector<16x9xf32> to vector<16x1xf32>
    %50 = vector.broadcast %49 : vector<16x1xf32> to vector<16x256xf32>
    %51 = arith.mulf %48, %50 : vector<16x256xf32>
    %52 = arith.addf %43, %51 : vector<16x256xf32>
    %53 = vector.extract_strided_slice %3 {offsets = [0, 4], sizes = [16, 1], strides = [1, 1]} : vector<16x9xf32> to vector<16x1xf32>
    %54 = vector.broadcast %53 : vector<16x1xf32> to vector<16x256xf32>
    %55 = arith.mulf %2, %54 : vector<16x256xf32>
    %56 = arith.addf %52, %55 : vector<16x256xf32>
    %c255_i32 = arith.constant 255 : i32
    %57 = tpu.dynamic_rotate %2 by %c255_i32 dim 1 : vector<16x256xf32>, i32 -> vector<16x256xf32>
    %cst_15 = arith.constant 0.000000e+00 : f32
    %58 = vector.shape_cast %13 : vector<1x256xi1> to vector<1x256xi1>
    %59 = vector.broadcast %58 : vector<1x256xi1> to vector<16x256xi1>
    %60 = vector.broadcast %cst_15 : f32 to vector<16x256xf32>
    %61 = arith.select %59, %57, %60 : vector<16x256xi1>, vector<16x256xf32>
    %62 = vector.extract_strided_slice %3 {offsets = [0, 5], sizes = [16, 1], strides = [1, 1]} : vector<16x9xf32> to vector<16x1xf32>
    %63 = vector.broadcast %62 : vector<16x1xf32> to vector<16x256xf32>
    %64 = arith.mulf %61, %63 : vector<16x256xf32>
    %65 = arith.addf %56, %64 : vector<16x256xf32>
    %c241_i32 = arith.constant 241 : i32
    %66 = tpu.dynamic_rotate %2 by %c241_i32 dim 1 : vector<16x256xf32>, i32 -> vector<16x256xf32>
    %67 = arith.andi %11, %9 : vector<1x256xi1>
    %cst_16 = arith.constant 0.000000e+00 : f32
    %68 = vector.shape_cast %67 : vector<1x256xi1> to vector<1x256xi1>
    %69 = vector.broadcast %68 : vector<1x256xi1> to vector<16x256xi1>
    %70 = vector.broadcast %cst_16 : f32 to vector<16x256xf32>
    %71 = arith.select %69, %66, %70 : vector<16x256xi1>, vector<16x256xf32>
    %72 = vector.extract_strided_slice %3 {offsets = [0, 6], sizes = [16, 1], strides = [1, 1]} : vector<16x9xf32> to vector<16x1xf32>
    %73 = vector.broadcast %72 : vector<16x1xf32> to vector<16x256xf32>
    %74 = arith.mulf %71, %73 : vector<16x256xf32>
    %75 = arith.addf %65, %74 : vector<16x256xf32>
    %c240_i32 = arith.constant 240 : i32
    %76 = tpu.dynamic_rotate %2 by %c240_i32 dim 1 : vector<16x256xf32>, i32 -> vector<16x256xf32>
    %cst_17 = arith.constant 0.000000e+00 : f32
    %77 = vector.shape_cast %11 : vector<1x256xi1> to vector<1x256xi1>
    %78 = vector.broadcast %77 : vector<1x256xi1> to vector<16x256xi1>
    %79 = vector.broadcast %cst_17 : f32 to vector<16x256xf32>
    %80 = arith.select %78, %76, %79 : vector<16x256xi1>, vector<16x256xf32>
    %81 = vector.extract_strided_slice %3 {offsets = [0, 7], sizes = [16, 1], strides = [1, 1]} : vector<16x9xf32> to vector<16x1xf32>
    %82 = vector.broadcast %81 : vector<16x1xf32> to vector<16x256xf32>
    %83 = arith.mulf %80, %82 : vector<16x256xf32>
    %84 = arith.addf %75, %83 : vector<16x256xf32>
    %c239_i32 = arith.constant 239 : i32
    %85 = tpu.dynamic_rotate %2 by %c239_i32 dim 1 : vector<16x256xf32>, i32 -> vector<16x256xf32>
    %86 = arith.andi %11, %13 : vector<1x256xi1>
    %cst_18 = arith.constant 0.000000e+00 : f32
    %87 = vector.shape_cast %86 : vector<1x256xi1> to vector<1x256xi1>
    %88 = vector.broadcast %87 : vector<1x256xi1> to vector<16x256xi1>
    %89 = vector.broadcast %cst_18 : f32 to vector<16x256xf32>
    %90 = arith.select %88, %85, %89 : vector<16x256xi1>, vector<16x256xf32>
    %91 = vector.extract_strided_slice %3 {offsets = [0, 8], sizes = [16, 1], strides = [1, 1]} : vector<16x9xf32> to vector<16x1xf32>
    %92 = vector.broadcast %91 : vector<16x1xf32> to vector<16x256xf32>
    %93 = arith.mulf %90, %92 : vector<16x256xf32>
    %94 = arith.addf %84, %93 : vector<16x256xf32>
    %c0_19 = arith.constant 0 : index
    %c0_20 = arith.constant 0 : index
    %95 = vector.load %arg4[%c0_19, %c0_20] : memref<16x16xf32, #tpu.memory_space<vmem>>, vector<16x16xf32>
    %cst_21 = arith.constant dense<0.000000e+00> : vector<16x256xf32>
    %96 = tpu.matmul %95, %94, %cst_21 {dimension_numbers = #tpu.dot_dimension_numbers<[1], [0], [0], [1], [0, 0, 1, 1], [], []>} : vector<16x16xf32>, vector<16x256xf32>, vector<16x256xf32> -> vector<16x256xf32>
    %c0_22 = arith.constant 0 : index
    %c0_23 = arith.constant 0 : index
    %97 = vector.load %arg5[%c0_22, %c0_23] : memref<16x1xf32, #tpu.memory_space<vmem>>, vector<16x1xf32>
    %98 = vector.broadcast %97 : vector<16x1xf32> to vector<16x256xf32>
    %99 = arith.addf %96, %98 : vector<16x256xf32>
    %cst_24 = arith.constant 0.000000e+00 : f32
    %100 = vector.broadcast %cst_24 : f32 to vector<16x256xf32>
    %101 = arith.maximumf %99, %100 : vector<16x256xf32>
    %c0_25 = arith.constant 0 : index
    %c0_26 = arith.constant 0 : index
    %102 = vector.load %arg6[%c0_25, %c0_26] : memref<16x256xf32, #tpu.memory_space<vmem>>, vector<16x256xf32>
    tpu.vector_store %arg6[%c0_25, %c0_26], %101 {strides = array<i32>} : memref<16x256xf32, #tpu.memory_space<vmem>>, vector<16x256xf32>,
    return
  }
  func.func @transform_0(%arg0: i32) -> (i32, i32) {
    %c0_i32 = arith.constant 0 : i32
    %c0_i32_0 = arith.constant 0 : i32
    %c0_i32_1 = arith.constant 0 : i32
    return %c0_i32, %c0_i32_0 : i32, i32
  }
  func.func @transform_1(%arg0: i32) -> (i32, i32) {
    %c0_i32 = arith.constant 0 : i32
    %c0_i32_0 = arith.constant 0 : i32
    %c0_i32_1 = arith.constant 0 : i32
    return %c0_i32, %c0_i32_0 : i32, i32
  }
  func.func @transform_2(%arg0: i32) -> (i32, i32) {
    %c0_i32 = arith.constant 0 : i32
    %c0_i32_0 = arith.constant 0 : i32
    %c0_i32_1 = arith.constant 0 : i32
    return %c0_i32, %c0_i32_0 : i32, i32
  }
  func.func @transform_3(%arg0: i32) -> (i32, i32) {
    %c0_i32 = arith.constant 0 : i32
    %c0_i32_0 = arith.constant 0 : i32
    %c0_i32_1 = arith.constant 0 : i32
    return %c0_i32, %c0_i32_0 : i32, i32
  }
  func.func @transform_4(%arg0: i32) -> (i32, i32) {
    %c0_i32 = arith.constant 0 : i32
    %c0_i32_0 = arith.constant 0 : i32
    %c0_i32_1 = arith.constant 0 : i32
    return %c0_i32, %c0_i32_0 : i32, i32
  }
  func.func @transform_5(%arg0: i32) -> (i32, i32) {
    %c0_i32 = arith.constant 0 : i32
    %c0_i32_0 = arith.constant 0 : i32
    %c0_i32_1 = arith.constant 0 : i32
    return %c0_i32, %c0_i32_0 : i32, i32
  }
}

module attributes {stable_mosaic.version = 11 : i64} {
  func.func @_fused_sepconv_kernel(%arg0: i32, %arg1: memref<16x256xf32, #tpu.memory_space<vmem>>, %arg2: memref<2x256xi32, #tpu.memory_space<vmem>>, %arg3: memref<16x9xf32, #tpu.memory_space<vmem>>, %arg4: memref<32x16xf32, #tpu.memory_space<vmem>>, %arg5: memref<32x1xf32, #tpu.memory_space<vmem>>, %arg6: memref<32x256xf32, #tpu.memory_space<vmem>>) attributes {dimension_semantics = [#tpu.dimension_semantics<arbitrary>], iteration_bounds = array<i64: 1>, scalar_prefetch = 0 : i64, scratch_operands = 0 : i64, tpu.core_type = #tpu.core_type<tc>, window_params = [{pipeline_mode = #tpu.pipeline_mode<synchronous>, transform_indices = @transform_0, window_bounds = array<i64: 16, 256>}, {pipeline_mode = #tpu.pipeline_mode<synchronous>, transform_indices = @transform_1, window_bounds = array<i64: 2, 256>}, {pipeline_mode = #tpu.pipeline_mode<synchronous>, transform_indices = @transform_2, window_bounds = array<i64: 16, 9>}, {pipeline_mode = #tpu.pipeline_mode<synchronous>, transform_indices = @transform_3, window_bounds = array<i64: 32, 16>}, {pipeline_mode = #tpu.pipeline_mode<synchronous>, transform_indices = @transform_4, window_bounds = array<i64: 32, 1>}, {pipeline_mode = #tpu.pipeline_mode<synchronous>, transform_indices = @transform_5, window_bounds = array<i64: 32, 256>}]} {
    %c0 = arith.constant 0 : index
    %c0_0 = arith.constant 0 : index
    %0 = vector.load %arg1[%c0, %c0_0] : memref<16x256xf32, #tpu.memory_space<vmem>>, vector<16x256xf32>
    %c0_1 = arith.constant 0 : index
    %c0_2 = arith.constant 0 : index
    %1 = vector.load %arg3[%c0_1, %c0_2] : memref<16x9xf32, #tpu.memory_space<vmem>>, vector<16x9xf32>
    %c0_3 = arith.constant 0 : index
    %c0_4 = arith.constant 0 : index
    %2 = vector.load %arg2[%c0_3, %c0_4] : memref<2x256xi32, #tpu.memory_space<vmem>>, vector<1x256xi32>
    %c1 = arith.constant 1 : index
    %c0_5 = arith.constant 0 : index
    %3 = vector.load %arg2[%c1, %c0_5] : memref<2x256xi32, #tpu.memory_space<vmem>>, vector<1x256xi32>
    %c1_i32 = arith.constant 1 : i32
    %4 = vector.broadcast %c1_i32 : i32 to vector<1x256xi32>
    %5 = arith.cmpi sge, %2, %4 : vector<1x256xi32>
    %c1_i32_6 = arith.constant 1 : i32
    %6 = vector.broadcast %c1_i32_6 : i32 to vector<1x256xi32>
    %7 = arith.cmpi sge, %3, %6 : vector<1x256xi32>
    %c15_i32 = arith.constant 15 : i32
    %8 = vector.broadcast %c15_i32 : i32 to vector<1x256xi32>
    %9 = arith.cmpi slt, %2, %8 : vector<1x256xi32>
    %c15_i32_7 = arith.constant 15 : i32
    %10 = vector.broadcast %c15_i32_7 : i32 to vector<1x256xi32>
    %11 = arith.cmpi slt, %3, %10 : vector<1x256xi32>
    %cst = arith.constant 0.000000e+00 : f32
    %12 = vector.broadcast %cst : f32 to vector<16x256xf32>
    %c17_i32 = arith.constant 17 : i32
    %13 = tpu.dynamic_rotate %0 by %c17_i32 dim 1 : vector<16x256xf32>, i32 -> vector<16x256xf32>
    %14 = arith.andi %5, %7 : vector<1x256xi1>
    %cst_8 = arith.constant 0.000000e+00 : f32
    %15 = vector.shape_cast %14 : vector<1x256xi1> to vector<1x256xi1>
    %16 = vector.broadcast %15 : vector<1x256xi1> to vector<16x256xi1>
    %17 = vector.broadcast %cst_8 : f32 to vector<16x256xf32>
    %18 = arith.select %16, %13, %17 : vector<16x256xi1>, vector<16x256xf32>
    %19 = vector.extract_strided_slice %1 {offsets = [0, 0], sizes = [16, 1], strides = [1, 1]} : vector<16x9xf32> to vector<16x1xf32>
    %20 = vector.broadcast %19 : vector<16x1xf32> to vector<16x256xf32>
    %21 = arith.mulf %18, %20 : vector<16x256xf32>
    %22 = arith.addf %12, %21 : vector<16x256xf32>
    %c16_i32 = arith.constant 16 : i32
    %23 = tpu.dynamic_rotate %0 by %c16_i32 dim 1 : vector<16x256xf32>, i32 -> vector<16x256xf32>
    %cst_9 = arith.constant 0.000000e+00 : f32
    %24 = vector.shape_cast %5 : vector<1x256xi1> to vector<1x256xi1>
    %25 = vector.broadcast %24 : vector<1x256xi1> to vector<16x256xi1>
    %26 = vector.broadcast %cst_9 : f32 to vector<16x256xf32>
    %27 = arith.select %25, %23, %26 : vector<16x256xi1>, vector<16x256xf32>
    %28 = vector.extract_strided_slice %1 {offsets = [0, 1], sizes = [16, 1], strides = [1, 1]} : vector<16x9xf32> to vector<16x1xf32>
    %29 = vector.broadcast %28 : vector<16x1xf32> to vector<16x256xf32>
    %30 = arith.mulf %27, %29 : vector<16x256xf32>
    %31 = arith.addf %22, %30 : vector<16x256xf32>
    %c15_i32_10 = arith.constant 15 : i32
    %32 = tpu.dynamic_rotate %0 by %c15_i32_10 dim 1 : vector<16x256xf32>, i32 -> vector<16x256xf32>
    %33 = arith.andi %5, %11 : vector<1x256xi1>
    %cst_11 = arith.constant 0.000000e+00 : f32
    %34 = vector.shape_cast %33 : vector<1x256xi1> to vector<1x256xi1>
    %35 = vector.broadcast %34 : vector<1x256xi1> to vector<16x256xi1>
    %36 = vector.broadcast %cst_11 : f32 to vector<16x256xf32>
    %37 = arith.select %35, %32, %36 : vector<16x256xi1>, vector<16x256xf32>
    %38 = vector.extract_strided_slice %1 {offsets = [0, 2], sizes = [16, 1], strides = [1, 1]} : vector<16x9xf32> to vector<16x1xf32>
    %39 = vector.broadcast %38 : vector<16x1xf32> to vector<16x256xf32>
    %40 = arith.mulf %37, %39 : vector<16x256xf32>
    %41 = arith.addf %31, %40 : vector<16x256xf32>
    %c1_i32_12 = arith.constant 1 : i32
    %42 = tpu.dynamic_rotate %0 by %c1_i32_12 dim 1 : vector<16x256xf32>, i32 -> vector<16x256xf32>
    %cst_13 = arith.constant 0.000000e+00 : f32
    %43 = vector.shape_cast %7 : vector<1x256xi1> to vector<1x256xi1>
    %44 = vector.broadcast %43 : vector<1x256xi1> to vector<16x256xi1>
    %45 = vector.broadcast %cst_13 : f32 to vector<16x256xf32>
    %46 = arith.select %44, %42, %45 : vector<16x256xi1>, vector<16x256xf32>
    %47 = vector.extract_strided_slice %1 {offsets = [0, 3], sizes = [16, 1], strides = [1, 1]} : vector<16x9xf32> to vector<16x1xf32>
    %48 = vector.broadcast %47 : vector<16x1xf32> to vector<16x256xf32>
    %49 = arith.mulf %46, %48 : vector<16x256xf32>
    %50 = arith.addf %41, %49 : vector<16x256xf32>
    %51 = vector.extract_strided_slice %1 {offsets = [0, 4], sizes = [16, 1], strides = [1, 1]} : vector<16x9xf32> to vector<16x1xf32>
    %52 = vector.broadcast %51 : vector<16x1xf32> to vector<16x256xf32>
    %53 = arith.mulf %0, %52 : vector<16x256xf32>
    %54 = arith.addf %50, %53 : vector<16x256xf32>
    %c255_i32 = arith.constant 255 : i32
    %55 = tpu.dynamic_rotate %0 by %c255_i32 dim 1 : vector<16x256xf32>, i32 -> vector<16x256xf32>
    %cst_14 = arith.constant 0.000000e+00 : f32
    %56 = vector.shape_cast %11 : vector<1x256xi1> to vector<1x256xi1>
    %57 = vector.broadcast %56 : vector<1x256xi1> to vector<16x256xi1>
    %58 = vector.broadcast %cst_14 : f32 to vector<16x256xf32>
    %59 = arith.select %57, %55, %58 : vector<16x256xi1>, vector<16x256xf32>
    %60 = vector.extract_strided_slice %1 {offsets = [0, 5], sizes = [16, 1], strides = [1, 1]} : vector<16x9xf32> to vector<16x1xf32>
    %61 = vector.broadcast %60 : vector<16x1xf32> to vector<16x256xf32>
    %62 = arith.mulf %59, %61 : vector<16x256xf32>
    %63 = arith.addf %54, %62 : vector<16x256xf32>
    %c241_i32 = arith.constant 241 : i32
    %64 = tpu.dynamic_rotate %0 by %c241_i32 dim 1 : vector<16x256xf32>, i32 -> vector<16x256xf32>
    %65 = arith.andi %9, %7 : vector<1x256xi1>
    %cst_15 = arith.constant 0.000000e+00 : f32
    %66 = vector.shape_cast %65 : vector<1x256xi1> to vector<1x256xi1>
    %67 = vector.broadcast %66 : vector<1x256xi1> to vector<16x256xi1>
    %68 = vector.broadcast %cst_15 : f32 to vector<16x256xf32>
    %69 = arith.select %67, %64, %68 : vector<16x256xi1>, vector<16x256xf32>
    %70 = vector.extract_strided_slice %1 {offsets = [0, 6], sizes = [16, 1], strides = [1, 1]} : vector<16x9xf32> to vector<16x1xf32>
    %71 = vector.broadcast %70 : vector<16x1xf32> to vector<16x256xf32>
    %72 = arith.mulf %69, %71 : vector<16x256xf32>
    %73 = arith.addf %63, %72 : vector<16x256xf32>
    %c240_i32 = arith.constant 240 : i32
    %74 = tpu.dynamic_rotate %0 by %c240_i32 dim 1 : vector<16x256xf32>, i32 -> vector<16x256xf32>
    %cst_16 = arith.constant 0.000000e+00 : f32
    %75 = vector.shape_cast %9 : vector<1x256xi1> to vector<1x256xi1>
    %76 = vector.broadcast %75 : vector<1x256xi1> to vector<16x256xi1>
    %77 = vector.broadcast %cst_16 : f32 to vector<16x256xf32>
    %78 = arith.select %76, %74, %77 : vector<16x256xi1>, vector<16x256xf32>
    %79 = vector.extract_strided_slice %1 {offsets = [0, 7], sizes = [16, 1], strides = [1, 1]} : vector<16x9xf32> to vector<16x1xf32>
    %80 = vector.broadcast %79 : vector<16x1xf32> to vector<16x256xf32>
    %81 = arith.mulf %78, %80 : vector<16x256xf32>
    %82 = arith.addf %73, %81 : vector<16x256xf32>
    %c239_i32 = arith.constant 239 : i32
    %83 = tpu.dynamic_rotate %0 by %c239_i32 dim 1 : vector<16x256xf32>, i32 -> vector<16x256xf32>
    %84 = arith.andi %9, %11 : vector<1x256xi1>
    %cst_17 = arith.constant 0.000000e+00 : f32
    %85 = vector.shape_cast %84 : vector<1x256xi1> to vector<1x256xi1>
    %86 = vector.broadcast %85 : vector<1x256xi1> to vector<16x256xi1>
    %87 = vector.broadcast %cst_17 : f32 to vector<16x256xf32>
    %88 = arith.select %86, %83, %87 : vector<16x256xi1>, vector<16x256xf32>
    %89 = vector.extract_strided_slice %1 {offsets = [0, 8], sizes = [16, 1], strides = [1, 1]} : vector<16x9xf32> to vector<16x1xf32>
    %90 = vector.broadcast %89 : vector<16x1xf32> to vector<16x256xf32>
    %91 = arith.mulf %88, %90 : vector<16x256xf32>
    %92 = arith.addf %82, %91 : vector<16x256xf32>
    %c0_18 = arith.constant 0 : index
    %c0_19 = arith.constant 0 : index
    %93 = vector.load %arg4[%c0_18, %c0_19] : memref<32x16xf32, #tpu.memory_space<vmem>>, vector<32x16xf32>
    %cst_20 = arith.constant dense<0.000000e+00> : vector<32x256xf32>
    %94 = tpu.matmul %93, %92, %cst_20 {dimension_numbers = #tpu.dot_dimension_numbers<[1], [0], [0], [1], [0, 0, 1, 1], [], []>} : vector<32x16xf32>, vector<16x256xf32>, vector<32x256xf32> -> vector<32x256xf32>
    %c0_21 = arith.constant 0 : index
    %c0_22 = arith.constant 0 : index
    %95 = vector.load %arg5[%c0_21, %c0_22] : memref<32x1xf32, #tpu.memory_space<vmem>>, vector<32x1xf32>
    %96 = vector.broadcast %95 : vector<32x1xf32> to vector<32x256xf32>
    %97 = arith.addf %94, %96 : vector<32x256xf32>
    %c0_23 = arith.constant 0 : index
    %c0_24 = arith.constant 0 : index
    %98 = vector.load %arg6[%c0_23, %c0_24] : memref<32x256xf32, #tpu.memory_space<vmem>>, vector<32x256xf32>
    tpu.vector_store %arg6[%c0_23, %c0_24], %97 {strides = array<i32>} : memref<32x256xf32, #tpu.memory_space<vmem>>, vector<32x256xf32>,
    return
  }
  func.func @transform_0(%arg0: i32) -> (i32, i32) {
    %c0_i32 = arith.constant 0 : i32
    %c0_i32_0 = arith.constant 0 : i32
    %c0_i32_1 = arith.constant 0 : i32
    return %c0_i32, %c0_i32_0 : i32, i32
  }
  func.func @transform_1(%arg0: i32) -> (i32, i32) {
    %c0_i32 = arith.constant 0 : i32
    %c0_i32_0 = arith.constant 0 : i32
    %c0_i32_1 = arith.constant 0 : i32
    return %c0_i32, %c0_i32_0 : i32, i32
  }
  func.func @transform_2(%arg0: i32) -> (i32, i32) {
    %c0_i32 = arith.constant 0 : i32
    %c0_i32_0 = arith.constant 0 : i32
    %c0_i32_1 = arith.constant 0 : i32
    return %c0_i32, %c0_i32_0 : i32, i32
  }
  func.func @transform_3(%arg0: i32) -> (i32, i32) {
    %c0_i32 = arith.constant 0 : i32
    %c0_i32_0 = arith.constant 0 : i32
    %c0_i32_1 = arith.constant 0 : i32
    return %c0_i32, %c0_i32_0 : i32, i32
  }
  func.func @transform_4(%arg0: i32) -> (i32, i32) {
    %c0_i32 = arith.constant 0 : i32
    %c0_i32_0 = arith.constant 0 : i32
    %c0_i32_1 = arith.constant 0 : i32
    return %c0_i32, %c0_i32_0 : i32, i32
  }
  func.func @transform_5(%arg0: i32) -> (i32, i32) {
    %c0_i32 = arith.constant 0 : i32
    %c0_i32_0 = arith.constant 0 : i32
    %c0_i32_1 = arith.constant 0 : i32
    return %c0_i32, %c0_i32_0 : i32, i32
  }
}

module attributes {stable_mosaic.version = 11 : i64} {
  func.func @_fused_sepconv_kernel(%arg0: i32, %arg1: memref<32x128xf32, #tpu.memory_space<vmem>>, %arg2: memref<2x128xi32, #tpu.memory_space<vmem>>, %arg3: memref<32x9xf32, #tpu.memory_space<vmem>>, %arg4: memref<48x32xf32, #tpu.memory_space<vmem>>, %arg5: memref<48x1xf32, #tpu.memory_space<vmem>>, %arg6: memref<48x128xf32, #tpu.memory_space<vmem>>) attributes {dimension_semantics = [#tpu.dimension_semantics<arbitrary>], iteration_bounds = array<i64: 1>, scalar_prefetch = 0 : i64, scratch_operands = 0 : i64, tpu.core_type = #tpu.core_type<tc>, window_params = [{pipeline_mode = #tpu.pipeline_mode<synchronous>, transform_indices = @transform_0, window_bounds = array<i64: 32, 128>}, {pipeline_mode = #tpu.pipeline_mode<synchronous>, transform_indices = @transform_1, window_bounds = array<i64: 2, 128>}, {pipeline_mode = #tpu.pipeline_mode<synchronous>, transform_indices = @transform_2, window_bounds = array<i64: 32, 9>}, {pipeline_mode = #tpu.pipeline_mode<synchronous>, transform_indices = @transform_3, window_bounds = array<i64: 48, 32>}, {pipeline_mode = #tpu.pipeline_mode<synchronous>, transform_indices = @transform_4, window_bounds = array<i64: 48, 1>}, {pipeline_mode = #tpu.pipeline_mode<synchronous>, transform_indices = @transform_5, window_bounds = array<i64: 48, 128>}]} {
    %c0 = arith.constant 0 : index
    %c0_0 = arith.constant 0 : index
    %0 = vector.load %arg1[%c0, %c0_0] : memref<32x128xf32, #tpu.memory_space<vmem>>, vector<32x128xf32>
    %c0_1 = arith.constant 0 : index
    %c0_2 = arith.constant 0 : index
    %1 = vector.load %arg3[%c0_1, %c0_2] : memref<32x9xf32, #tpu.memory_space<vmem>>, vector<32x9xf32>
    %c0_3 = arith.constant 0 : index
    %c0_4 = arith.constant 0 : index
    %2 = vector.load %arg2[%c0_3, %c0_4] : memref<2x128xi32, #tpu.memory_space<vmem>>, vector<1x128xi32>
    %c1 = arith.constant 1 : index
    %c0_5 = arith.constant 0 : index
    %3 = vector.load %arg2[%c1, %c0_5] : memref<2x128xi32, #tpu.memory_space<vmem>>, vector<1x128xi32>
    %c1_i32 = arith.constant 1 : i32
    %4 = vector.broadcast %c1_i32 : i32 to vector<1x128xi32>
    %5 = arith.cmpi sge, %2, %4 : vector<1x128xi32>
    %c1_i32_6 = arith.constant 1 : i32
    %6 = vector.broadcast %c1_i32_6 : i32 to vector<1x128xi32>
    %7 = arith.cmpi sge, %3, %6 : vector<1x128xi32>
    %c6_i32 = arith.constant 6 : i32
    %8 = vector.broadcast %c6_i32 : i32 to vector<1x128xi32>
    %9 = arith.cmpi slt, %2, %8 : vector<1x128xi32>
    %c6_i32_7 = arith.constant 6 : i32
    %10 = vector.broadcast %c6_i32_7 : i32 to vector<1x128xi32>
    %11 = arith.cmpi slt, %3, %10 : vector<1x128xi32>
    %cst = arith.constant 0.000000e+00 : f32
    %12 = vector.broadcast %cst : f32 to vector<32x128xf32>
    %c8_i32 = arith.constant 8 : i32
    %13 = tpu.dynamic_rotate %0 by %c8_i32 dim 1 : vector<32x128xf32>, i32 -> vector<32x128xf32>
    %14 = arith.andi %5, %7 : vector<1x128xi1>
    %cst_8 = arith.constant 0.000000e+00 : f32
    %15 = vector.shape_cast %14 : vector<1x128xi1> to vector<1x128xi1>
    %16 = vector.broadcast %15 : vector<1x128xi1> to vector<32x128xi1>
    %17 = vector.broadcast %cst_8 : f32 to vector<32x128xf32>
    %18 = arith.select %16, %13, %17 : vector<32x128xi1>, vector<32x128xf32>
    %19 = vector.extract_strided_slice %1 {offsets = [0, 0], sizes = [32, 1], strides = [1, 1]} : vector<32x9xf32> to vector<32x1xf32>
    %20 = vector.broadcast %19 : vector<32x1xf32> to vector<32x128xf32>
    %21 = arith.mulf %18, %20 : vector<32x128xf32>
    %22 = arith.addf %12, %21 : vector<32x128xf32>
    %c7_i32 = arith.constant 7 : i32
    %23 = tpu.dynamic_rotate %0 by %c7_i32 dim 1 : vector<32x128xf32>, i32 -> vector<32x128xf32>
    %cst_9 = arith.constant 0.000000e+00 : f32
    %24 = vector.shape_cast %5 : vector<1x128xi1> to vector<1x128xi1>
    %25 = vector.broadcast %24 : vector<1x128xi1> to vector<32x128xi1>
    %26 = vector.broadcast %cst_9 : f32 to vector<32x128xf32>
    %27 = arith.select %25, %23, %26 : vector<32x128xi1>, vector<32x128xf32>
    %28 = vector.extract_strided_slice %1 {offsets = [0, 1], sizes = [32, 1], strides = [1, 1]} : vector<32x9xf32> to vector<32x1xf32>
    %29 = vector.broadcast %28 : vector<32x1xf32> to vector<32x128xf32>
    %30 = arith.mulf %27, %29 : vector<32x128xf32>
    %31 = arith.addf %22, %30 : vector<32x128xf32>
    %c6_i32_10 = arith.constant 6 : i32
    %32 = tpu.dynamic_rotate %0 by %c6_i32_10 dim 1 : vector<32x128xf32>, i32 -> vector<32x128xf32>
    %33 = arith.andi %5, %11 : vector<1x128xi1>
    %cst_11 = arith.constant 0.000000e+00 : f32
    %34 = vector.shape_cast %33 : vector<1x128xi1> to vector<1x128xi1>
    %35 = vector.broadcast %34 : vector<1x128xi1> to vector<32x128xi1>
    %36 = vector.broadcast %cst_11 : f32 to vector<32x128xf32>
    %37 = arith.select %35, %32, %36 : vector<32x128xi1>, vector<32x128xf32>
    %38 = vector.extract_strided_slice %1 {offsets = [0, 2], sizes = [32, 1], strides = [1, 1]} : vector<32x9xf32> to vector<32x1xf32>
    %39 = vector.broadcast %38 : vector<32x1xf32> to vector<32x128xf32>
    %40 = arith.mulf %37, %39 : vector<32x128xf32>
    %41 = arith.addf %31, %40 : vector<32x128xf32>
    %c1_i32_12 = arith.constant 1 : i32
    %42 = tpu.dynamic_rotate %0 by %c1_i32_12 dim 1 : vector<32x128xf32>, i32 -> vector<32x128xf32>
    %cst_13 = arith.constant 0.000000e+00 : f32
    %43 = vector.shape_cast %7 : vector<1x128xi1> to vector<1x128xi1>
    %44 = vector.broadcast %43 : vector<1x128xi1> to vector<32x128xi1>
    %45 = vector.broadcast %cst_13 : f32 to vector<32x128xf32>
    %46 = arith.select %44, %42, %45 : vector<32x128xi1>, vector<32x128xf32>
    %47 = vector.extract_strided_slice %1 {offsets = [0, 3], sizes = [32, 1], strides = [1, 1]} : vector<32x9xf32> to vector<32x1xf32>
    %48 = vector.broadcast %47 : vector<32x1xf32> to vector<32x128xf32>
    %49 = arith.mulf %46, %48 : vector<32x128xf32>
    %50 = arith.addf %41, %49 : vector<32x128xf32>
    %51 = vector.extract_strided_slice %1 {offsets = [0, 4], sizes = [32, 1], strides = [1, 1]} : vector<32x9xf32> to vector<32x1xf32>
    %52 = vector.broadcast %51 : vector<32x1xf32> to vector<32x128xf32>
    %53 = arith.mulf %0, %52 : vector<32x128xf32>
    %54 = arith.addf %50, %53 : vector<32x128xf32>
    %c127_i32 = arith.constant 127 : i32
    %55 = tpu.dynamic_rotate %0 by %c127_i32 dim 1 : vector<32x128xf32>, i32 -> vector<32x128xf32>
    %cst_14 = arith.constant 0.000000e+00 : f32
    %56 = vector.shape_cast %11 : vector<1x128xi1> to vector<1x128xi1>
    %57 = vector.broadcast %56 : vector<1x128xi1> to vector<32x128xi1>
    %58 = vector.broadcast %cst_14 : f32 to vector<32x128xf32>
    %59 = arith.select %57, %55, %58 : vector<32x128xi1>, vector<32x128xf32>
    %60 = vector.extract_strided_slice %1 {offsets = [0, 5], sizes = [32, 1], strides = [1, 1]} : vector<32x9xf32> to vector<32x1xf32>
    %61 = vector.broadcast %60 : vector<32x1xf32> to vector<32x128xf32>
    %62 = arith.mulf %59, %61 : vector<32x128xf32>
    %63 = arith.addf %54, %62 : vector<32x128xf32>
    %c122_i32 = arith.constant 122 : i32
    %64 = tpu.dynamic_rotate %0 by %c122_i32 dim 1 : vector<32x128xf32>, i32 -> vector<32x128xf32>
    %65 = arith.andi %9, %7 : vector<1x128xi1>
    %cst_15 = arith.constant 0.000000e+00 : f32
    %66 = vector.shape_cast %65 : vector<1x128xi1> to vector<1x128xi1>
    %67 = vector.broadcast %66 : vector<1x128xi1> to vector<32x128xi1>
    %68 = vector.broadcast %cst_15 : f32 to vector<32x128xf32>
    %69 = arith.select %67, %64, %68 : vector<32x128xi1>, vector<32x128xf32>
    %70 = vector.extract_strided_slice %1 {offsets = [0, 6], sizes = [32, 1], strides = [1, 1]} : vector<32x9xf32> to vector<32x1xf32>
    %71 = vector.broadcast %70 : vector<32x1xf32> to vector<32x128xf32>
    %72 = arith.mulf %69, %71 : vector<32x128xf32>
    %73 = arith.addf %63, %72 : vector<32x128xf32>
    %c121_i32 = arith.constant 121 : i32
    %74 = tpu.dynamic_rotate %0 by %c121_i32 dim 1 : vector<32x128xf32>, i32 -> vector<32x128xf32>
    %cst_16 = arith.constant 0.000000e+00 : f32
    %75 = vector.shape_cast %9 : vector<1x128xi1> to vector<1x128xi1>
    %76 = vector.broadcast %75 : vector<1x128xi1> to vector<32x128xi1>
    %77 = vector.broadcast %cst_16 : f32 to vector<32x128xf32>
    %78 = arith.select %76, %74, %77 : vector<32x128xi1>, vector<32x128xf32>
    %79 = vector.extract_strided_slice %1 {offsets = [0, 7], sizes = [32, 1], strides = [1, 1]} : vector<32x9xf32> to vector<32x1xf32>
    %80 = vector.broadcast %79 : vector<32x1xf32> to vector<32x128xf32>
    %81 = arith.mulf %78, %80 : vector<32x128xf32>
    %82 = arith.addf %73, %81 : vector<32x128xf32>
    %c120_i32 = arith.constant 120 : i32
    %83 = tpu.dynamic_rotate %0 by %c120_i32 dim 1 : vector<32x128xf32>, i32 -> vector<32x128xf32>
    %84 = arith.andi %9, %11 : vector<1x128xi1>
    %cst_17 = arith.constant 0.000000e+00 : f32
    %85 = vector.shape_cast %84 : vector<1x128xi1> to vector<1x128xi1>
    %86 = vector.broadcast %85 : vector<1x128xi1> to vector<32x128xi1>
    %87 = vector.broadcast %cst_17 : f32 to vector<32x128xf32>
    %88 = arith.select %86, %83, %87 : vector<32x128xi1>, vector<32x128xf32>
    %89 = vector.extract_strided_slice %1 {offsets = [0, 8], sizes = [32, 1], strides = [1, 1]} : vector<32x9xf32> to vector<32x1xf32>
    %90 = vector.broadcast %89 : vector<32x1xf32> to vector<32x128xf32>
    %91 = arith.mulf %88, %90 : vector<32x128xf32>
    %92 = arith.addf %82, %91 : vector<32x128xf32>
    %c0_18 = arith.constant 0 : index
    %c0_19 = arith.constant 0 : index
    %93 = vector.load %arg4[%c0_18, %c0_19] : memref<48x32xf32, #tpu.memory_space<vmem>>, vector<48x32xf32>
    %cst_20 = arith.constant dense<0.000000e+00> : vector<48x128xf32>
    %94 = tpu.matmul %93, %92, %cst_20 {dimension_numbers = #tpu.dot_dimension_numbers<[1], [0], [0], [1], [0, 0, 1, 1], [], []>} : vector<48x32xf32>, vector<32x128xf32>, vector<48x128xf32> -> vector<48x128xf32>
    %c0_21 = arith.constant 0 : index
    %c0_22 = arith.constant 0 : index
    %95 = vector.load %arg5[%c0_21, %c0_22] : memref<48x1xf32, #tpu.memory_space<vmem>>, vector<48x1xf32>
    %96 = vector.broadcast %95 : vector<48x1xf32> to vector<48x128xf32>
    %97 = arith.addf %94, %96 : vector<48x128xf32>
    %cst_23 = arith.constant 0.000000e+00 : f32
    %98 = vector.broadcast %cst_23 : f32 to vector<48x128xf32>
    %99 = arith.maximumf %97, %98 : vector<48x128xf32>
    %c0_24 = arith.constant 0 : index
    %c0_25 = arith.constant 0 : index
    %100 = vector.load %arg6[%c0_24, %c0_25] : memref<48x128xf32, #tpu.memory_space<vmem>>, vector<48x128xf32>
    tpu.vector_store %arg6[%c0_24, %c0_25], %99 {strides = array<i32>} : memref<48x128xf32, #tpu.memory_space<vmem>>, vector<48x128xf32>,
    return
  }
  func.func @transform_0(%arg0: i32) -> (i32, i32) {
    %c0_i32 = arith.constant 0 : i32
    %c0_i32_0 = arith.constant 0 : i32
    %c0_i32_1 = arith.constant 0 : i32
    return %c0_i32, %c0_i32_0 : i32, i32
  }
  func.func @transform_1(%arg0: i32) -> (i32, i32) {
    %c0_i32 = arith.constant 0 : i32
    %c0_i32_0 = arith.constant 0 : i32
    %c0_i32_1 = arith.constant 0 : i32
    return %c0_i32, %c0_i32_0 : i32, i32
  }
  func.func @transform_2(%arg0: i32) -> (i32, i32) {
    %c0_i32 = arith.constant 0 : i32
    %c0_i32_0 = arith.constant 0 : i32
    %c0_i32_1 = arith.constant 0 : i32
    return %c0_i32, %c0_i32_0 : i32, i32
  }
  func.func @transform_3(%arg0: i32) -> (i32, i32) {
    %c0_i32 = arith.constant 0 : i32
    %c0_i32_0 = arith.constant 0 : i32
    %c0_i32_1 = arith.constant 0 : i32
    return %c0_i32, %c0_i32_0 : i32, i32
  }
  func.func @transform_4(%arg0: i32) -> (i32, i32) {
    %c0_i32 = arith.constant 0 : i32
    %c0_i32_0 = arith.constant 0 : i32
    %c0_i32_1 = arith.constant 0 : i32
    return %c0_i32, %c0_i32_0 : i32, i32
  }
  func.func @transform_5(%arg0: i32) -> (i32, i32) {
    %c0_i32 = arith.constant 0 : i32
    %c0_i32_0 = arith.constant 0 : i32
    %c0_i32_1 = arith.constant 0 : i32
    return %c0_i32, %c0_i32_0 : i32, i32
  }
}

module attributes {stable_mosaic.version = 11 : i64} {
  func.func @_fused_sepconv_kernel(%arg0: i32, %arg1: memref<48x128xf32, #tpu.memory_space<vmem>>, %arg2: memref<2x128xi32, #tpu.memory_space<vmem>>, %arg3: memref<48x9xf32, #tpu.memory_space<vmem>>, %arg4: memref<64x48xf32, #tpu.memory_space<vmem>>, %arg5: memref<64x1xf32, #tpu.memory_space<vmem>>, %arg6: memref<64x128xf32, #tpu.memory_space<vmem>>) attributes {dimension_semantics = [#tpu.dimension_semantics<arbitrary>], iteration_bounds = array<i64: 1>, scalar_prefetch = 0 : i64, scratch_operands = 0 : i64, tpu.core_type = #tpu.core_type<tc>, window_params = [{pipeline_mode = #tpu.pipeline_mode<synchronous>, transform_indices = @transform_0, window_bounds = array<i64: 48, 128>}, {pipeline_mode = #tpu.pipeline_mode<synchronous>, transform_indices = @transform_1, window_bounds = array<i64: 2, 128>}, {pipeline_mode = #tpu.pipeline_mode<synchronous>, transform_indices = @transform_2, window_bounds = array<i64: 48, 9>}, {pipeline_mode = #tpu.pipeline_mode<synchronous>, transform_indices = @transform_3, window_bounds = array<i64: 64, 48>}, {pipeline_mode = #tpu.pipeline_mode<synchronous>, transform_indices = @transform_4, window_bounds = array<i64: 64, 1>}, {pipeline_mode = #tpu.pipeline_mode<synchronous>, transform_indices = @transform_5, window_bounds = array<i64: 64, 128>}]} {
    %c0 = arith.constant 0 : index
    %c0_0 = arith.constant 0 : index
    %0 = vector.load %arg1[%c0, %c0_0] : memref<48x128xf32, #tpu.memory_space<vmem>>, vector<48x128xf32>
    %c0_1 = arith.constant 0 : index
    %c0_2 = arith.constant 0 : index
    %1 = vector.load %arg3[%c0_1, %c0_2] : memref<48x9xf32, #tpu.memory_space<vmem>>, vector<48x9xf32>
    %c0_3 = arith.constant 0 : index
    %c0_4 = arith.constant 0 : index
    %2 = vector.load %arg2[%c0_3, %c0_4] : memref<2x128xi32, #tpu.memory_space<vmem>>, vector<1x128xi32>
    %c1 = arith.constant 1 : index
    %c0_5 = arith.constant 0 : index
    %3 = vector.load %arg2[%c1, %c0_5] : memref<2x128xi32, #tpu.memory_space<vmem>>, vector<1x128xi32>
    %c1_i32 = arith.constant 1 : i32
    %4 = vector.broadcast %c1_i32 : i32 to vector<1x128xi32>
    %5 = arith.cmpi sge, %2, %4 : vector<1x128xi32>
    %c1_i32_6 = arith.constant 1 : i32
    %6 = vector.broadcast %c1_i32_6 : i32 to vector<1x128xi32>
    %7 = arith.cmpi sge, %3, %6 : vector<1x128xi32>
    %c6_i32 = arith.constant 6 : i32
    %8 = vector.broadcast %c6_i32 : i32 to vector<1x128xi32>
    %9 = arith.cmpi slt, %2, %8 : vector<1x128xi32>
    %c6_i32_7 = arith.constant 6 : i32
    %10 = vector.broadcast %c6_i32_7 : i32 to vector<1x128xi32>
    %11 = arith.cmpi slt, %3, %10 : vector<1x128xi32>
    %cst = arith.constant 0.000000e+00 : f32
    %12 = vector.broadcast %cst : f32 to vector<48x128xf32>
    %c8_i32 = arith.constant 8 : i32
    %13 = tpu.dynamic_rotate %0 by %c8_i32 dim 1 : vector<48x128xf32>, i32 -> vector<48x128xf32>
    %14 = arith.andi %5, %7 : vector<1x128xi1>
    %cst_8 = arith.constant 0.000000e+00 : f32
    %15 = vector.shape_cast %14 : vector<1x128xi1> to vector<1x128xi1>
    %16 = vector.broadcast %15 : vector<1x128xi1> to vector<48x128xi1>
    %17 = vector.broadcast %cst_8 : f32 to vector<48x128xf32>
    %18 = arith.select %16, %13, %17 : vector<48x128xi1>, vector<48x128xf32>
    %19 = vector.extract_strided_slice %1 {offsets = [0, 0], sizes = [48, 1], strides = [1, 1]} : vector<48x9xf32> to vector<48x1xf32>
    %20 = vector.broadcast %19 : vector<48x1xf32> to vector<48x128xf32>
    %21 = arith.mulf %18, %20 : vector<48x128xf32>
    %22 = arith.addf %12, %21 : vector<48x128xf32>
    %c7_i32 = arith.constant 7 : i32
    %23 = tpu.dynamic_rotate %0 by %c7_i32 dim 1 : vector<48x128xf32>, i32 -> vector<48x128xf32>
    %cst_9 = arith.constant 0.000000e+00 : f32
    %24 = vector.shape_cast %5 : vector<1x128xi1> to vector<1x128xi1>
    %25 = vector.broadcast %24 : vector<1x128xi1> to vector<48x128xi1>
    %26 = vector.broadcast %cst_9 : f32 to vector<48x128xf32>
    %27 = arith.select %25, %23, %26 : vector<48x128xi1>, vector<48x128xf32>
    %28 = vector.extract_strided_slice %1 {offsets = [0, 1], sizes = [48, 1], strides = [1, 1]} : vector<48x9xf32> to vector<48x1xf32>
    %29 = vector.broadcast %28 : vector<48x1xf32> to vector<48x128xf32>
    %30 = arith.mulf %27, %29 : vector<48x128xf32>
    %31 = arith.addf %22, %30 : vector<48x128xf32>
    %c6_i32_10 = arith.constant 6 : i32
    %32 = tpu.dynamic_rotate %0 by %c6_i32_10 dim 1 : vector<48x128xf32>, i32 -> vector<48x128xf32>
    %33 = arith.andi %5, %11 : vector<1x128xi1>
    %cst_11 = arith.constant 0.000000e+00 : f32
    %34 = vector.shape_cast %33 : vector<1x128xi1> to vector<1x128xi1>
    %35 = vector.broadcast %34 : vector<1x128xi1> to vector<48x128xi1>
    %36 = vector.broadcast %cst_11 : f32 to vector<48x128xf32>
    %37 = arith.select %35, %32, %36 : vector<48x128xi1>, vector<48x128xf32>
    %38 = vector.extract_strided_slice %1 {offsets = [0, 2], sizes = [48, 1], strides = [1, 1]} : vector<48x9xf32> to vector<48x1xf32>
    %39 = vector.broadcast %38 : vector<48x1xf32> to vector<48x128xf32>
    %40 = arith.mulf %37, %39 : vector<48x128xf32>
    %41 = arith.addf %31, %40 : vector<48x128xf32>
    %c1_i32_12 = arith.constant 1 : i32
    %42 = tpu.dynamic_rotate %0 by %c1_i32_12 dim 1 : vector<48x128xf32>, i32 -> vector<48x128xf32>
    %cst_13 = arith.constant 0.000000e+00 : f32
    %43 = vector.shape_cast %7 : vector<1x128xi1> to vector<1x128xi1>
    %44 = vector.broadcast %43 : vector<1x128xi1> to vector<48x128xi1>
    %45 = vector.broadcast %cst_13 : f32 to vector<48x128xf32>
    %46 = arith.select %44, %42, %45 : vector<48x128xi1>, vector<48x128xf32>
    %47 = vector.extract_strided_slice %1 {offsets = [0, 3], sizes = [48, 1], strides = [1, 1]} : vector<48x9xf32> to vector<48x1xf32>
    %48 = vector.broadcast %47 : vector<48x1xf32> to vector<48x128xf32>
    %49 = arith.mulf %46, %48 : vector<48x128xf32>
    %50 = arith.addf %41, %49 : vector<48x128xf32>
    %51 = vector.extract_strided_slice %1 {offsets = [0, 4], sizes = [48, 1], strides = [1, 1]} : vector<48x9xf32> to vector<48x1xf32>
    %52 = vector.broadcast %51 : vector<48x1xf32> to vector<48x128xf32>
    %53 = arith.mulf %0, %52 : vector<48x128xf32>
    %54 = arith.addf %50, %53 : vector<48x128xf32>
    %c127_i32 = arith.constant 127 : i32
    %55 = tpu.dynamic_rotate %0 by %c127_i32 dim 1 : vector<48x128xf32>, i32 -> vector<48x128xf32>
    %cst_14 = arith.constant 0.000000e+00 : f32
    %56 = vector.shape_cast %11 : vector<1x128xi1> to vector<1x128xi1>
    %57 = vector.broadcast %56 : vector<1x128xi1> to vector<48x128xi1>
    %58 = vector.broadcast %cst_14 : f32 to vector<48x128xf32>
    %59 = arith.select %57, %55, %58 : vector<48x128xi1>, vector<48x128xf32>
    %60 = vector.extract_strided_slice %1 {offsets = [0, 5], sizes = [48, 1], strides = [1, 1]} : vector<48x9xf32> to vector<48x1xf32>
    %61 = vector.broadcast %60 : vector<48x1xf32> to vector<48x128xf32>
    %62 = arith.mulf %59, %61 : vector<48x128xf32>
    %63 = arith.addf %54, %62 : vector<48x128xf32>
    %c122_i32 = arith.constant 122 : i32
    %64 = tpu.dynamic_rotate %0 by %c122_i32 dim 1 : vector<48x128xf32>, i32 -> vector<48x128xf32>
    %65 = arith.andi %9, %7 : vector<1x128xi1>
    %cst_15 = arith.constant 0.000000e+00 : f32
    %66 = vector.shape_cast %65 : vector<1x128xi1> to vector<1x128xi1>
    %67 = vector.broadcast %66 : vector<1x128xi1> to vector<48x128xi1>
    %68 = vector.broadcast %cst_15 : f32 to vector<48x128xf32>
    %69 = arith.select %67, %64, %68 : vector<48x128xi1>, vector<48x128xf32>
    %70 = vector.extract_strided_slice %1 {offsets = [0, 6], sizes = [48, 1], strides = [1, 1]} : vector<48x9xf32> to vector<48x1xf32>
    %71 = vector.broadcast %70 : vector<48x1xf32> to vector<48x128xf32>
    %72 = arith.mulf %69, %71 : vector<48x128xf32>
    %73 = arith.addf %63, %72 : vector<48x128xf32>
    %c121_i32 = arith.constant 121 : i32
    %74 = tpu.dynamic_rotate %0 by %c121_i32 dim 1 : vector<48x128xf32>, i32 -> vector<48x128xf32>
    %cst_16 = arith.constant 0.000000e+00 : f32
    %75 = vector.shape_cast %9 : vector<1x128xi1> to vector<1x128xi1>
    %76 = vector.broadcast %75 : vector<1x128xi1> to vector<48x128xi1>
    %77 = vector.broadcast %cst_16 : f32 to vector<48x128xf32>
    %78 = arith.select %76, %74, %77 : vector<48x128xi1>, vector<48x128xf32>
    %79 = vector.extract_strided_slice %1 {offsets = [0, 7], sizes = [48, 1], strides = [1, 1]} : vector<48x9xf32> to vector<48x1xf32>
    %80 = vector.broadcast %79 : vector<48x1xf32> to vector<48x128xf32>
    %81 = arith.mulf %78, %80 : vector<48x128xf32>
    %82 = arith.addf %73, %81 : vector<48x128xf32>
    %c120_i32 = arith.constant 120 : i32
    %83 = tpu.dynamic_rotate %0 by %c120_i32 dim 1 : vector<48x128xf32>, i32 -> vector<48x128xf32>
    %84 = arith.andi %9, %11 : vector<1x128xi1>
    %cst_17 = arith.constant 0.000000e+00 : f32
    %85 = vector.shape_cast %84 : vector<1x128xi1> to vector<1x128xi1>
    %86 = vector.broadcast %85 : vector<1x128xi1> to vector<48x128xi1>
    %87 = vector.broadcast %cst_17 : f32 to vector<48x128xf32>
    %88 = arith.select %86, %83, %87 : vector<48x128xi1>, vector<48x128xf32>
    %89 = vector.extract_strided_slice %1 {offsets = [0, 8], sizes = [48, 1], strides = [1, 1]} : vector<48x9xf32> to vector<48x1xf32>
    %90 = vector.broadcast %89 : vector<48x1xf32> to vector<48x128xf32>
    %91 = arith.mulf %88, %90 : vector<48x128xf32>
    %92 = arith.addf %82, %91 : vector<48x128xf32>
    %c0_18 = arith.constant 0 : index
    %c0_19 = arith.constant 0 : index
    %93 = vector.load %arg4[%c0_18, %c0_19] : memref<64x48xf32, #tpu.memory_space<vmem>>, vector<64x48xf32>
    %cst_20 = arith.constant dense<0.000000e+00> : vector<64x128xf32>
    %94 = tpu.matmul %93, %92, %cst_20 {dimension_numbers = #tpu.dot_dimension_numbers<[1], [0], [0], [1], [0, 0, 1, 1], [], []>} : vector<64x48xf32>, vector<48x128xf32>, vector<64x128xf32> -> vector<64x128xf32>
    %c0_21 = arith.constant 0 : index
    %c0_22 = arith.constant 0 : index
    %95 = vector.load %arg5[%c0_21, %c0_22] : memref<64x1xf32, #tpu.memory_space<vmem>>, vector<64x1xf32>
    %96 = vector.broadcast %95 : vector<64x1xf32> to vector<64x128xf32>
    %97 = arith.addf %94, %96 : vector<64x128xf32>
    %cst_23 = arith.constant 0.000000e+00 : f32
    %98 = vector.broadcast %cst_23 : f32 to vector<64x128xf32>
    %99 = arith.maximumf %97, %98 : vector<64x128xf32>
    %c0_24 = arith.constant 0 : index
    %c0_25 = arith.constant 0 : index
    %100 = vector.load %arg6[%c0_24, %c0_25] : memref<64x128xf32, #tpu.memory_space<vmem>>, vector<64x128xf32>
    tpu.vector_store %arg6[%c0_24, %c0_25], %99 {strides = array<i32>} : memref<64x128xf32, #tpu.memory_space<vmem>>, vector<64x128xf32>,
    return
  }
  func.func @transform_0(%arg0: i32) -> (i32, i32) {
    %c0_i32 = arith.constant 0 : i32
    %c0_i32_0 = arith.constant 0 : i32
    %c0_i32_1 = arith.constant 0 : i32
    return %c0_i32, %c0_i32_0 : i32, i32
  }
  func.func @transform_1(%arg0: i32) -> (i32, i32) {
    %c0_i32 = arith.constant 0 : i32
    %c0_i32_0 = arith.constant 0 : i32
    %c0_i32_1 = arith.constant 0 : i32
    return %c0_i32, %c0_i32_0 : i32, i32
  }
  func.func @transform_2(%arg0: i32) -> (i32, i32) {
    %c0_i32 = arith.constant 0 : i32
    %c0_i32_0 = arith.constant 0 : i32
    %c0_i32_1 = arith.constant 0 : i32
    return %c0_i32, %c0_i32_0 : i32, i32
  }
  func.func @transform_3(%arg0: i32) -> (i32, i32) {
    %c0_i32 = arith.constant 0 : i32
    %c0_i32_0 = arith.constant 0 : i32
    %c0_i32_1 = arith.constant 0 : i32
    return %c0_i32, %c0_i32_0 : i32, i32
  }
  func.func @transform_4(%arg0: i32) -> (i32, i32) {
    %c0_i32 = arith.constant 0 : i32
    %c0_i32_0 = arith.constant 0 : i32
    %c0_i32_1 = arith.constant 0 : i32
    return %c0_i32, %c0_i32_0 : i32, i32
  }
  func.func @transform_5(%arg0: i32) -> (i32, i32) {
    %c0_i32 = arith.constant 0 : i32
    %c0_i32_0 = arith.constant 0 : i32
    %c0_i32_1 = arith.constant 0 : i32
    return %c0_i32, %c0_i32_0 : i32, i32
  }
}

</mosaic_0001>

<bundles_post_ra>
// kernel: exit_module_forward.5
= control target key start
LH: loop header
LB: loop body
LE: loop exit
PB: predicated region body
PF: predicated region fallthrough
CT: control target
= control target key end

     0   :  { %v517_v2 = vmov 0   ;;  %v518_v3 = vmov 1   ;;  %s519_s22 = smov 17   ;;  %s520_s6 = smov 16   ;;  %v522_v8 = vmov 3   ;;  %v523_v9 = vmov 4   ;;  %s970_s0 = inlined_call_operand.vmem [shape: f32[16,256], index: 0, kind: input, shape index: {}]   ;;  %s971_s2 = inlined_call_operand.vmem [shape: f32[16,9], index: 2, kind: input, shape index: {}]   ;;  %s972_s1 = inlined_call_operand.vmem [shape: s32[2,256], index: 1, kind: input, shape index: {}]   ;;  %s973_s4 = inlined_call_operand.vmem [shape: f32[32,1], index: 4, kind: input, shape index: {}]   ;;  %s974_s3 = inlined_call_operand.vmem [shape: f32[32,16], index: 3, kind: input, shape index: {}]   ;;  %s975_s5 = inlined_call_operand.vmem [shape: f32[32,256], index: 5, kind: output, shape index: {}]  }
   0x1   :  { %v567_v0 = vld [vmem:[%s970_s0 + $0x8] sm:$0xff]  ;;  %v572_v1 = vld [vmem:[%s970_s0] sm:$0xff]  ;;  %502 = vset.pattern.permute.xlu2 %v517_v2  ;;  %503 = vset.pattern.permute.xlu1 %v518_v3  ;;  %v586_v5 = vld [vmem:[%s970_s0 + $0x18] sm:$0xff]  ;;  %v524_v10 = vmov 2   ;;  %s526_s7 = smov 127   ;;  %s527_s8 = smov 113   ;;  %v41_v18 = vlaneseq }
   0x2   :  { %37 = vrot.lane.b32.xlu1 %v567_v0, %s519_s22  ;;  %33 = vrot.lane.b32.xlu0 %v572_v1, %s519_s22  ;;  %v580_v4 = vld [vmem:[%s971_s2] sm:$0xff]  ;;  %v591_v6 = vld [vmem:[%s970_s0 + $0x10] sm:$0xff]  ;;  %s521_s0 = smov 15   ;;  %v528_v11 = vmov 5   ;;  %s529_s9 = smov 112   ;;  %v530_v15 = vmov 6  }
   0x3   :  { %60 = vperm.xlu2 %502, %v580_v4   ;;  %v598_v7 = vld [vmem:[%s971_s2 + $0x8] sm:$0xff]  ;;  %507 = vset.pattern.permute.xlu0 %v523_v9  ;;  %s525_s2 = smov 1   ;;  %v636_v13 = vld [vmem:[%s972_s1] ss:$2 sm:$0x3]  ;;  %v531_v17 = vmov 8  }
   0x4   :  { %v641_v14 = vld [vmem:[%s972_s1 + $0x1] ss:$2 sm:$0x3]  ;;  %vm29_vm0 = vcmp.ge.s32.totalorder %v636_v13, 1  ;;  %v655_v21 = vand.u32 127, %v41_v18  ;;  %s532_s1 = smov 111  }
   0x5   :  { %vm30_vm1 = vcmp.ge.s32.totalorder %v641_v14, 1  ;;  %v533_v33 = vmov 7   ;;  %v89_v45 = vsel %vm29_vm0, 1, %v517_v2  ;;  %vm32_vm9 = vcmp.lt.s32.totalorder %v641_v14, 15 }
   0x6   :  { %vm48_vm2 = vmand %vm29_vm0, %vm30_vm1  ;;  %vm43_vm3 = vcmp.lt.s32.totalorder %v655_v21, 17  ;;  %vm84_vm6 = vcmp.lt.s32.totalorder %v655_v21, 16  ;;  %v90_v50 = vperm.slane %v89_v45, 0  ;;  %v91_v51 = vperm.slane %v89_v45, 1 }
   0x7   :  { %v49_v19 = vsel %vm48_vm2, 1, %v517_v2  ;;  %vm127_vm10 = vmand %vm29_vm0, %vm32_vm9  ;;  %vm122_vm11 = vcmp.lt.s32.totalorder %v655_v21, 15  ;;  %vm161_vm14 = vcmp.lt.s32.totalorder %v655_v21, 1  ;;  %vm31_vm2 = vcmp.lt.s32.totalorder %v636_v13, 15 }
   0x8   :  { %v50_v22 = vperm.slane %v49_v19, 0  ;;  %v51_v23 = vperm.slane %v49_v19, 1  ;;  %vm698_vm7 = vcmp.eq.s32.totalorder %v90_v50, 1  ;;  %vm702_vm8 = vcmp.eq.s32.totalorder %v91_v51, 1 }
   0xa   :  { %39 = vrot.lane.b32.xlu1 %v586_v5, %s519_s22  ;;  %35 = vrot.lane.b32.xlu0 %v591_v6, %s519_s22  ;;  %vm659_vm4 = vcmp.eq.s32.totalorder %v50_v22, 1  ;;  %vm663_vm5 = vcmp.eq.s32.totalorder %v51_v23, 1 }
   0xb   :  { %65 = vperm.xlu2 %502, %v598_v7  }
  0x12   :  { %82 = vrot.lane.b32.xlu1 %v586_v5, %s520_s6  ;;  %78 = vrot.lane.b32.xlu0 %v591_v6, %s520_s6 }
  0x13   :  { %76 = vrot.lane.b32.xlu2 %v572_v1, %s520_s6 }
  0x14   :  { %506 = vset.pattern.permute.xlu2 %v522_v8 }
  0x1a   :  { %103 = vperm.xlu1 %503, %v598_v7   ;;  %80 = vrot.lane.b32.xlu0 %v567_v0, %s520_s6 }
  0x1b   :  { %116 = vrot.lane.b32.xlu2 %v591_v6, %s521_s0 }
  0x22   :  { %99 = vperm.xlu1 %503, %v580_v4   ;;  %120 = vrot.lane.b32.xlu0 %v586_v5, %s521_s0 }
  0x23   :  { %114 = vrot.lane.b32.xlu2 %v572_v1, %s521_s0 }
  0x2a   :  { %504 = vset.pattern.permute.xlu1 %v524_v10  ;;  %118 = vrot.lane.b32.xlu0 %v567_v0, %s521_s0 }
  0x2b   :  { %142 = vperm.xlu1 %504, %v598_v7   ;;  %155 = vrot.lane.b32.xlu2 %v591_v6, %s525_s2 }
  0x32   :  { %159 = vrot.lane.b32.xlu0 %v586_v5, %s525_s2 }
  0x33   :  { %138 = vperm.xlu1 %504, %v580_v4   ;;  %153 = vrot.lane.b32.xlu2 %v572_v1, %s525_s2 }
  0x3a   :  { %157 = vrot.lane.b32.xlu0 %v567_v0, %s525_s2 }
  0x3b   :  { %505 = vset.pattern.permute.xlu1 %v522_v8  ;;  %176 = vperm.xlu2 %506, %v580_v4  }
  0x3c   :  { %180 = vperm.xlu1 %505, %v598_v7  }
  0x42   :  { %196 = vperm.xlu0 %507, %v598_v7  }
  0x43   :  { %213 = vrot.lane.b32.xlu2 %v586_v5, %s526_s7 }
  0x44   :  { %209 = vrot.lane.b32.xlu1 %v591_v6, %s526_s7  ;;  %513 = vset.pattern.permute.xlu2 %v531_v17 }
  0x45   :  { %508 = vset.pattern.permute.xlu1 %v523_v9 }
  0x4a   :  { %211 = vrot.lane.b32.xlu0 %v567_v0, %s526_s7 }
  0x4b   :  { %207 = vrot.lane.b32.xlu2 %v572_v1, %s526_s7  ;;  %514 = vset.pattern.permute.xlu0 %v517_v2 }
  0x4c   :  { %192 = vperm.xlu1 %508, %v580_v4  }
  0x52   :  { %251 = vrot.lane.b32.xlu0 %v586_v5, %s527_s8 }
  0x53   :  { %247 = vrot.lane.b32.xlu2 %v591_v6, %s527_s8 }
  0x54   :  { %509 = vset.pattern.permute.xlu1 %v528_v11 }
  0x55   :  { %234 = vperm.xlu1 %509, %v598_v7  }
  0x5a   :  { %249 = vrot.lane.b32.xlu0 %v567_v0, %s527_s8 }
  0x5b   :  { %245 = vrot.lane.b32.xlu2 %v572_v1, %s527_s8 }
  0x5d   :  { %230 = vperm.xlu1 %509, %v580_v4   ;;  %v61_v12 = vpop.permute.xlu2 %60 }
  0x62   :  { %290 = vrot.lane.b32.xlu0 %v586_v5, %s529_s9 }
  0x63   :  { %286 = vrot.lane.b32.xlu2 %v591_v6, %s529_s9 }
  0x65   :  { %510 = vset.pattern.permute.xlu1 %v530_v15  ;;  %v66_v16 = vpop.permute.xlu2 %65 }
  0x66   :  { %273 = vperm.xlu1 %510, %v598_v7  }
  0x6a   :  { %288 = vrot.lane.b32.xlu0 %v567_v0, %s529_s9 }
  0x6b   :  { %284 = vrot.lane.b32.xlu2 %v572_v1, %s529_s9 }
  0x6d   :  { %v77_v20 = vpop.permute.xlu2 %76 }
  0x6e   :  { %269 = vperm.xlu1 %510, %v580_v4  }
  0x72   :  { %328 = vrot.lane.b32.xlu0 %v586_v5, %s532_s1 }
  0x73   :  { %324 = vrot.lane.b32.xlu2 %v591_v6, %s532_s1 }
  0x74   :  { %v38_v26 = vpop.permute.xlu1 %37  ;;  %v34_v27 = vpop.permute.xlu0 %33 }
  0x75   :  { %v44_v28 = vsel %vm43_vm3, %v34_v27, %v38_v26  ;;  %v46_v29 = vsel %vm43_vm3, %v38_v26, %v34_v27  ;;  %v117_v30 = vpop.permute.xlu2 %116 }
  0x76   :  { %v54_v31 = vsel %vm659_vm4, %v46_v29, 0.0  ;;  %v55_v32 = vsel %vm663_vm5, %v44_v28, 0.0  ;;  %511 = vset.pattern.permute.xlu1 %v533_v33 }
  0x77   :  { %v68_v34 = vmul.f32 %v61_v12, %v54_v31  ;;  %v69_v35 = vmul.f32 %v61_v12, %v55_v32  ;;  %311 = vperm.xlu1 %511, %v598_v7  }
  0x7a   :  { %326 = vrot.lane.b32.xlu0 %v567_v0, %s532_s1 }
  0x7b   :  { %322 = vrot.lane.b32.xlu2 %v572_v1, %s532_s1 }
  0x7c   :  { %v40_v36 = vpop.permute.xlu1 %39  ;;  %v36_v37 = vpop.permute.xlu0 %35 }
  0x7d   :  { %v45_v38 = vsel %vm43_vm3, %v36_v37, %v40_v36  ;;  %v47_v39 = vsel %vm43_vm3, %v40_v36, %v36_v37  ;;  %v115_v44 = vpop.permute.xlu2 %114  ;;  %v166_v37 = vsel %vm30_vm1, 1, %v517_v2  ;;  %vm258_vm3 = vmand %vm31_vm2, %vm30_vm1 }
  0x7e   :  { %v56_v40 = vsel %vm659_vm4, %v47_v39, 0.0  ;;  %v57_v41 = vsel %vm663_vm5, %v45_v38, 0.0  ;;  %vm215_vm4 = vcmp.lt.s32.totalorder %v655_v21, 127 }
  0x7f   :  { %v70_v42 = vmul.f32 %v66_v16, %v56_v40  ;;  %v71_v43 = vmul.f32 %v66_v16, %v57_v41  ;;  %307 = vperm.xlu1 %511, %v580_v4  }
  0x83   :  { %346 = vperm.xlu2 %513, %v580_v4   ;;  %v128_v4 = vsel %vm127_vm10, 1, %v517_v2 }
  0x84   :  { %v83_v46 = vpop.permute.xlu1 %82  ;;  %v79_v47 = vpop.permute.xlu0 %78  ;;  %v129_v18 = vperm.slane %v128_v4, 0  ;;  %v130_v19 = vperm.slane %v128_v4, 1 }
  0x85   :  { %v86_v48 = vsel %vm84_vm6, %v79_v47, %v83_v46  ;;  %v88_v49 = vsel %vm84_vm6, %v83_v46, %v79_v47  ;;  %v156_v54 = vpop.permute.xlu2 %155 }
  0x86   :  { %v96_v56 = vsel %vm698_vm7, %v88_v49, 0.0  ;;  %v97_v57 = vsel %vm702_vm8, %v86_v48, 0.0  ;;  %vm731_vm12 = vcmp.eq.s32.totalorder %v129_v18, 1  ;;  %vm735_vm13 = vcmp.eq.s32.totalorder %v130_v19, 1 }
  0x87   :  { %512 = vset.pattern.permute.xlu1 %v531_v17 }
  0x88   :  { %350 = vperm.xlu1 %512, %v598_v7  }
  0x8b   :  { %516 = vset.pattern.permute.xlu2 %v517_v2 }
  0x8c   :  { %v104_v55 = vpop.permute.xlu1 %103  ;;  %v81_v58 = vpop.permute.xlu0 %80 }
  0x8d   :  { %v108_v59 = vmul.f32 %v104_v55, %v96_v56  ;;  %v109_v60 = vmul.f32 %v104_v55, %v97_v57  ;;  %v85_v61 = vsel %vm84_vm6, %v77_v20, %v81_v58  ;;  %v87_v62 = vsel %vm84_vm6, %v81_v58, %v77_v20  ;;  %v154_v7 = vpop.permute.xlu2 %153  ;;  %vm335_vm6 = vmand %vm31_vm2, %vm32_vm9 }
  0x8e   :  { %v94_v9 = vsel %vm698_vm7, %v87_v62, 0.0  ;;  %v95_v10 = vsel %vm702_vm8, %v85_v61, 0.0  ;;  %vm253_vm7 = vcmp.lt.s32.totalorder %v655_v21, 113 }
  0x8f   :  { %v112_v63 = vadd.f32 %v108_v59, %v70_v42  ;;  %v113_v3 = vadd.f32 %v109_v60, %v71_v43  ;;  %v167_v43 = vperm.slane %v166_v37, 0 }
  0x90   :  { %515 = vset.pattern.permute.xlu1 %v517_v2 }
  0x91   :  { %vm169_vm15 = vcmp.eq.s32.totalorder %v167_v43, 1 }
  0x94   :  { %v100_v8 = vpop.permute.xlu1 %99  ;;  %v121_v11 = vpop.permute.xlu0 %120 }
  0x95   :  { %v106_v12 = vmul.f32 %v100_v8, %v94_v9  ;;  %v107_v15 = vmul.f32 %v100_v8, %v95_v10  ;;  %v124_v16 = vsel %vm122_vm11, %v117_v30, %v121_v11  ;;  %v126_v17 = vsel %vm122_vm11, %v121_v11, %v117_v30  ;;  %v177_v33 = vpop.permute.xlu2 %176 }
  0x96   :  { %v135_v29 = vsel %vm731_vm12, %v126_v17, 0.0  ;;  %v136_v30 = vsel %vm735_vm13, %v124_v16, 0.0 }
  0x97   :  { %v110_v20 = vadd.f32 %v106_v12, %v68_v34  ;;  %v111_v22 = vadd.f32 %v107_v15, %v69_v35 }
  0x9c   :  { %v119_v25 = vpop.permute.xlu0 %118 }
  0x9d   :  { %v123_v26 = vsel %vm122_vm11, %v115_v44, %v119_v25  ;;  %v125_v27 = vsel %vm122_vm11, %v119_v25, %v115_v44  ;;  %v143_v28 = vpop.permute.xlu1 %142  ;;  %v168_v44 = vperm.slane %v166_v37, 1  ;;  %v214_v47 = vpop.permute.xlu2 %213 }
  0x9e   :  { %v147_v31 = vmul.f32 %v143_v28, %v135_v29  ;;  %v148_v32 = vmul.f32 %v143_v28, %v136_v30  ;;  %v133_v39 = vsel %vm731_vm12, %v125_v27, 0.0  ;;  %v134_v40 = vsel %vm735_vm13, %v123_v26, 0.0 }
  0x9f   :  { %vm170_vm0 = vcmp.eq.s32.totalorder %v168_v44, 1  ;;  %v220_v26 = vsel %vm32_vm9, 1, %v517_v2  ;;  %v259_v28 = vsel %vm258_vm3, 1, %v517_v2  ;;  %vm292_vm9 = vcmp.lt.s32.totalorder %v655_v21, 112 }
  0xa0   :  { %v151_v34 = vadd.f32 %v147_v31, %v112_v63  ;;  %v152_v35 = vadd.f32 %v148_v32, %v113_v3  ;;  %v221_v29 = vperm.slane %v220_v26, 0  ;;  %v222_v30 = vperm.slane %v220_v26, 1 }
  0xa1   :  { %v260_v32 = vperm.slane %v259_v28, 0  ;;  %vm330_vm13 = vcmp.lt.s32.totalorder %v655_v21, 111 }
  0xa2   :  { %vm796_vm1 = vcmp.eq.s32.totalorder %v221_v29, 1  ;;  %vm800_vm5 = vcmp.eq.s32.totalorder %v222_v30, 1  ;;  %v368_v30 = vld [vmem:[%s973_s4 + $0x18] sm:$0xff] }
  0xa3   :  { %vm811_vm8 = vcmp.eq.s32.totalorder %v260_v32, 1 }
  0xa4   :  { %v160_v36 = vpop.permute.xlu0 %159 }
  0xa5   :  { %v139_v38 = vpop.permute.xlu1 %138  ;;  %v163_v48 = vsel %vm161_vm14, %v156_v54, %v160_v36  ;;  %v165_v49 = vsel %vm161_vm14, %v160_v36, %v156_v54  ;;  %v208_v54 = vpop.permute.xlu2 %207 }
  0xa6   :  { %v145_v41 = vmul.f32 %v139_v38, %v133_v39  ;;  %v146_v42 = vmul.f32 %v139_v38, %v134_v40  ;;  %v173_v57 = vsel %vm169_vm15, %v165_v49, 0.0  ;;  %v174_v58 = vsel %vm170_vm0, %v163_v48, 0.0 }
  0xa8   :  { %v149_v45 = vadd.f32 %v145_v41, %v110_v20  ;;  %v150_v46 = vadd.f32 %v146_v42, %v111_v22 }
  0xac   :  { %v158_v50 = vpop.permute.xlu0 %157 }
  0xad   :  { %v162_v51 = vsel %vm161_vm14, %v154_v7, %v158_v50  ;;  %v164_v52 = vsel %vm161_vm14, %v158_v50, %v154_v7  ;;  %v248_v7 = vpop.permute.xlu2 %247  ;;  %v336_v50 = vsel %vm335_vm6, 1, %v517_v2 }
  0xae   :  { %v171_v53 = vsel %vm169_vm15, %v164_v52, 0.0  ;;  %v172_v55 = vsel %vm170_vm0, %v162_v51, 0.0  ;;  %v181_v56 = vpop.permute.xlu1 %180  ;;  %vm389_vm0 = vcmask 130048  }
  0xaf   :  { %v183_v59 = vmul.f32 %v177_v33, %v171_v53  ;;  %v184_v60 = vmul.f32 %v177_v33, %v172_v55  ;;  %v185_v61 = vmul.f32 %v181_v56, %v173_v57  ;;  %v186_v62 = vmul.f32 %v181_v56, %v174_v58  ;;  %v365_v55 = vld [vmem:[%s973_s4] sm:$0xff]  ;;  %v367_v58 = vld [vmem:[%s973_s4 + $0x10] sm:$0xff] }
  0xb0   :  { %v261_v33 = vperm.slane %v259_v28, 1  ;;  %371 = vperm.xlu0 %514, %v365_v55   ;;  %381 = vperm.xlu2 %516, %v367_v58  }
  0xb1   :  { %v189_v63 = vadd.f32 %v185_v61, %v151_v34  ;;  %v190_v3 = vadd.f32 %v186_v62, %v152_v35  ;;  %v755_v4 = vadd.f32 %v183_v59, %v149_v45  ;;  %v757_v8 = vadd.f32 %v184_v60, %v150_v46 }
  0xb2   :  { %v297_v34 = vsel %vm31_vm2, 1, %v517_v2  ;;  %vm815_vm10 = vcmp.eq.s32.totalorder %v261_v33, 1  ;;  %v337_v62 = vperm.slane %v336_v50, 0 }
  0xb3   :  { %v298_v41 = vperm.slane %v297_v34, 0  ;;  %v299_v43 = vperm.slane %v297_v34, 1 }
  0xb4   :  { %v197_v9 = vpop.permute.xlu0 %196  ;;  %vm881_vm14 = vcmp.eq.s32.totalorder %v337_v62, 1  ;;  %v363_v62 = vld [vmem:[%s974_s3 + $0x10] sm:$0xff] }
  0xb5   :  { %v759_v16 = vpop.permute.xlu2 %245  ;;  %v201_v35 = vmul.f32 %v197_v9, %v591_v6  ;;  %v202_v36 = vmul.f32 %v197_v9, %v586_v5  ;;  %vm833_vm11 = vcmp.eq.s32.totalorder %v298_v41, 1  ;;  %vm845_vm12 = vcmp.eq.s32.totalorder %v299_v43, 1 }
  0xb6   :  { %v210_v10 = vpop.permute.xlu1 %209 }
  0xb7   :  { %v217_v37 = vsel %vm215_vm4, %v210_v10, %v214_v47  ;;  %v219_v38 = vsel %vm215_vm4, %v214_v47, %v210_v10  ;;  %v205_v45 = vadd.f32 %v201_v35, %v189_v63  ;;  %v206_v46 = vadd.f32 %v202_v36, %v190_v3 }
  0xb8   :  { %v227_v14 = vsel %vm796_vm1, %v217_v37, 0.0  ;;  %v228_v13 = vsel %vm800_vm5, %v219_v38, 0.0  ;;  %v338_v63 = vperm.slane %v336_v50, 1 }
  0xba   :  { %vm885_vm15 = vcmp.eq.s32.totalorder %v338_v63, 1  ;;  %v362_v63 = vld [vmem:[%s974_s3 + $0x8] sm:$0xff] }
  0xbc   :  { %v212_v11 = vpop.permute.xlu0 %211 }
  0xbd   :  { %v763_v20 = vpop.permute.xlu2 %286  ;;  %v216_v48 = vsel %vm215_vm4, %v208_v54, %v212_v11  ;;  %v218_v49 = vsel %vm215_vm4, %v212_v11, %v208_v54 }
  0xbe   :  { %v193_v12 = vpop.permute.xlu1 %192  ;;  %v225_v59 = vsel %vm796_vm1, %v216_v48, 0.0  ;;  %v226_v60 = vsel %vm800_vm5, %v218_v49, 0.0 }
  0xbf   :  { %v199_v47 = vmul.f32 %v193_v12, %v572_v1  ;;  %v200_v51 = vmul.f32 %v193_v12, %v567_v0  ;;  %v366_v1 = vld [vmem:[%s973_s4 + $0x8] sm:$0xff] }
  0xc0   :  { %376 = vperm.xlu1 %515, %v366_v1  }
  0xc1   :  { %v203_v3 = vadd.f32 %v199_v47, %v755_v4  ;;  %v204_v11 = vadd.f32 %v200_v51, %v757_v8 }
  0xc4   :  { %v252_v15 = vpop.permute.xlu0 %251 }
  0xc5   :  { %v769_v24 = vpop.permute.xlu2 %284  ;;  %v255_v52 = vsel %vm253_vm7, %v248_v7, %v252_v15  ;;  %v257_v0 = vsel %vm253_vm7, %v252_v15, %v248_v7 }
  0xc6   :  { %v266_v12 = vsel %vm811_vm8, %v255_v52, 0.0  ;;  %v267_v4 = vsel %vm815_vm10, %v257_v0, 0.0 }
  0xc7   :  { %v235_v17 = vpop.permute.xlu1 %234 }
  0xc8   :  { %v239_v2 = vmul.f32 %v235_v17, %v227_v14  ;;  %v240_v56 = vmul.f32 %v235_v17, %v228_v13  ;;  %386 = vperm.xlu1 %515, %v368_v30  }
  0xca   :  { %v243_v15 = vadd.f32 %v239_v2, %v205_v45  ;;  %v244_v17 = vadd.f32 %v240_v56, %v206_v46 }
  0xcc   :  { %v761_v18 = vpop.permute.xlu0 %249 }
  0xcd   :  { %v785_v31 = vpop.permute.xlu2 %324  ;;  %v254_v10 = vsel %vm253_vm7, %v759_v16, %v761_v18  ;;  %v256_v7 = vsel %vm253_vm7, %v761_v18, %v759_v16 }
  0xce   :  { %v264_v18 = vsel %vm811_vm8, %v254_v10, 0.0 }
  0xcf   :  { %v231_v19 = vpop.permute.xlu1 %230 }
  0xd0   :  { %v237_v54 = vmul.f32 %v231_v19, %v225_v59  ;;  %v238_v9 = vmul.f32 %v231_v19, %v226_v60 }
  0xd2   :  { %v241_v32 = vadd.f32 %v237_v54, %v203_v3  ;;  %v242_v33 = vadd.f32 %v238_v9, %v204_v11  ;;  %v364_v3 = vld [vmem:[%s974_s3 + $0x18] sm:$0xff] }
  0xd4   :  { %v765_v22 = vpop.permute.xlu0 %290 }
  0xd5   :  { %v323_v61 = vpop.permute.xlu2 %322  ;;  %v294_v19 = vsel %vm292_vm9, %v763_v20, %v765_v22  ;;  %v296_v16 = vsel %vm292_vm9, %v765_v22, %v763_v20  ;;  %v265_v20 = vsel %vm815_vm10, %v256_v7, 0.0 }
  0xd6   :  { %v304_v37 = vsel %vm833_vm11, %v294_v19, 0.0  ;;  %v305_v40 = vsel %vm845_vm12, %v296_v16, 0.0 }
  0xd8   :  { %v767_v23 = vpop.permute.xlu1 %273 }
  0xd9   :  { %v278_v34 = vmul.f32 %v767_v23, %v266_v12  ;;  %v279_v35 = vmul.f32 %v767_v23, %v267_v4 }
  0xdb   :  { %v282_v45 = vadd.f32 %v278_v34, %v243_v15  ;;  %v283_v46 = vadd.f32 %v279_v35, %v244_v17 }
  0xdc   :  { %v772_v25 = vpop.permute.xlu0 %288 }
  0xdd   :  { %v293_v22 = vsel %vm292_vm9, %v769_v24, %v772_v25  ;;  %v295_v36 = vsel %vm292_vm9, %v772_v25, %v769_v24  ;;  %v347_v13 = vpop.permute.xlu2 %346 }
  0xde   :  { %v302_v6 = vsel %vm833_vm11, %v293_v22, 0.0  ;;  %v303_v43 = vsel %vm845_vm12, %v295_v36, 0.0 }
  0xe0   :  { %v781_v27 = vpop.permute.xlu1 %269 }
  0xe1   :  { %v276_v38 = vmul.f32 %v781_v27, %v264_v18  ;;  %v277_v39 = vmul.f32 %v781_v27, %v265_v20 }
  0xe3   :  { %v280_v48 = vadd.f32 %v276_v38, %v241_v32  ;;  %v281_v49 = vadd.f32 %v277_v39, %v242_v33 }
  0xe4   :  { %v804_v42 = vpop.permute.xlu0 %328 }
  0xe5   :  { %v332_v25 = vsel %vm330_vm13, %v785_v31, %v804_v42  ;;  %v334_v27 = vsel %vm330_vm13, %v804_v42, %v785_v31 }
  0xe6   :  { %v343_v21 = vsel %vm881_vm14, %v332_v25, 0.0  ;;  %v344_v31 = vsel %vm885_vm15, %v334_v27, 0.0 }
  0xe9   :  { %v312_v44 = vpop.permute.xlu1 %311 }
  0xea   :  { %v316_v23 = vmul.f32 %v312_v44, %v304_v37  ;;  %v317_v5 = vmul.f32 %v312_v44, %v305_v40 }
  0xec   :  { %v327_v26 = vpop.permute.xlu0 %326  ;;  %v320_v42 = vadd.f32 %v316_v23, %v282_v45  ;;  %v321_v52 = vadd.f32 %v317_v5, %v283_v46 }
  0xed   :  { %v331_v41 = vsel %vm330_vm13, %v323_v61, %v327_v26  ;;  %v333_v24 = vsel %vm330_vm13, %v327_v26, %v323_v61  ;;  %v361_v61 = vld [vmem:[%s974_s3] sm:$0xff] }
  0xee   :  { %v341_v47 = vsel %vm881_vm14, %v331_v41, 0.0  ;;  %v342_v50 = vsel %vm885_vm15, %v333_v24, 0.0 }
  0xef   :  { %v353_v53 = vmul.f32 %v347_v13, %v341_v47  ;;  %v354_v56 = vmul.f32 %v347_v13, %v342_v50 }
  0xf1   :  { %v308_v8 = vpop.permute.xlu1 %307 }
  0xf2   :  { %v314_v44 = vmul.f32 %v308_v8, %v302_v6  ;;  %v315_v14 = vmul.f32 %v308_v8, %v303_v43 }
  0xf4   :  { %v318_v2 = vadd.f32 %v314_v44, %v280_v48  ;;  %v319_v0 = vadd.f32 %v315_v14, %v281_v49 }
  0xf6   :  { %v357_v59 = vadd.f32 %v353_v53, %v318_v2  ;;  %v358_v60 = vadd.f32 %v354_v56, %v319_v0 }
  0xfa   :  { %v351_v51 = vpop.permute.xlu1 %350 }
  0xfb   :  { %v355_v1 = vmul.f32 %v351_v51, %v343_v21  ;;  %v356_v55 = vmul.f32 %v351_v51, %v344_v31 }
  0xfd   :  { %v359_v57 = vadd.f32 %v355_v1, %v320_v42  ;;  %v360_v58 = vadd.f32 %v356_v55, %v321_v52 }
  0xff   :  { %416 = vmatpush.msra.mxu0 %v359_v57  ;;  %481 = vmatpush.msra.mxu2 %v359_v57 }
 0x100   :  { %445 = vmatpush.msra.mxu1 %v360_v58  ;;  %483 = vmatpush.msra.mxu3 %v360_v58 }
 0x101   :  { %417 = vmatpush.msra.mxu0 %v357_v59  ;;  %482 = vmatpush.msra.mxu2 %v357_v59 }
 0x102   :  { %446 = vmatpush.msra.mxu1 %v358_v60  ;;  %484 = vmatpush.msra.mxu3 %v358_v60 }
 0x103   :  { %473 = vmatmul.msk.f32.vlgmr.msra.gmra.mxu0 %vm389_vm0, %v361_v61  ;;  %475 = vmatmul.msk.f32.vlgmr.msra.gmra.mxu2 %vm389_vm0, %v363_v62 }
 0x104   :  { %477 = vmatmul.msk.f32.vlgmr.msra.gmra.mxu1 %vm389_vm0, %v361_v61  ;;  %479 = vmatmul.msk.f32.vlgmr.msra.gmra.mxu3 %vm389_vm0, %v363_v62 }
 0x10a   :  { %v382_v4 = vpop.permute.xlu2 %381 }
 0x10b   :  { %474 = vmatmul.msk.f32.gmra.mxu0 %vm389_vm0, %v362_v63  ;;  %476 = vmatmul.msk.f32.gmra.mxu2 %vm389_vm0, %v364_v3 }
 0x10c   :  { %478 = vmatmul.msk.f32.gmra.mxu1 %vm389_vm0, %v362_v63  ;;  %480 = vmatmul.msk.f32.gmra.mxu3 %vm389_vm0, %v364_v3 }
 0x122   :  { %v372_v54 = vpop.permute.xlu0 %371 }
 0x132   :  { %v377_v12 = vpop.permute.xlu1 %376 }
 0x13a   :  { %v387_v29 = vpop.permute.xlu1 %386 }
 0x180   :  { %v419_v9 = vpop.f32.mrf.mxu0 }
 0x181   :  { %v448_v10 = vpop.f32.mrf.mxu1  ;;  %v420_v11 = vadd.f32 %v419_v9, %v372_v54 }
 0x182   :  { %v449_v7 = vadd.f32 %v448_v10, %v372_v54 }
 0x183   :  { %460 = vst [vmem:[%s975_s5] sm:$0xff] %v420_v11 }
 0x184   :  { %461 = vst [vmem:[%s975_s5 + $0x8] sm:$0xff] %v449_v7 }
 0x186   :  { %v425_v15 = vpop.f32.mrf.mxu2 }
 0x187   :  { %v454_v17 = vpop.f32.mrf.mxu3  ;;  %v426_v19 = vadd.f32 %v425_v15, %v382_v4 }
 0x188   :  { %v455_v8 = vadd.f32 %v454_v17, %v382_v4  ;;  %v422_v16 = vpop.f32.mrf.mxu0 }
 0x189   :  { %464 = vst [vmem:[%s975_s5 + $0x20] sm:$0xff] %v426_v19  ;;  %v423_v18 = vadd.f32 %v422_v16, %v377_v12  ;;  %v451_v26 = vpop.f32.mrf.mxu1 }
 0x18a   :  { %465 = vst [vmem:[%s975_s5 + $0x28] sm:$0xff] %v455_v8  ;;  %v452_v28 = vadd.f32 %v451_v26, %v377_v12 }
 0x18b   :  { %462 = vst [vmem:[%s975_s5 + $0x10] sm:$0xff] %v423_v18 }
 0x18c   :  { %463 = vst [vmem:[%s975_s5 + $0x18] sm:$0xff] %v452_v28 }
 0x18e   :  { %v428_v30 = vpop.f32.mrf.mxu2 }
 0x18f   :  { %v429_v32 = vadd.f32 %v428_v30, %v387_v29  ;;  %v457_v33 = vpop.f32.mrf.mxu3 }
 0x190   :  { %v458_v20 = vadd.f32 %v457_v33, %v387_v29 }
 0x191   :  { %466 = vst [vmem:[%s975_s5 + $0x30] sm:$0xff] %v429_v32 }
 0x192   :  { %467 = vst [vmem:[%s975_s5 + $0x38] sm:$0xff] %v458_v20 }

// kernel: exit_module_forward.4
= control target key start
LH: loop header
LB: loop body
LE: loop exit
PB: predicated region body
PF: predicated region fallthrough
CT: control target
= control target key end

     0   :  { %v485_v2 = vmov 0   ;;  %s486_s24 = smov 17   ;;  %s487_s29 = smov 16   ;;  %v489_v11 = vmov 1   ;;  %v490_v12 = vmov 3   ;;  %v491_v13 = vmov 4   ;;  %s914_s0 = inlined_call_operand.vmem [shape: f32[16,256], index: 0, kind: input, shape index: {}]   ;;  %s915_s2 = inlined_call_operand.vmem [shape: f32[16,9], index: 2, kind: input, shape index: {}]   ;;  %s916_s1 = inlined_call_operand.vmem [shape: s32[2,256], index: 1, kind: input, shape index: {}]   ;;  %s917_s4 = inlined_call_operand.vmem [shape: f32[16,1], index: 4, kind: input, shape index: {}]   ;;  %s918_s3 = inlined_call_operand.vmem [shape: f32[16,16], index: 3, kind: input, shape index: {}]   ;;  %s919_s5 = inlined_call_operand.vmem [shape: f32[16,256], index: 5, kind: output, shape index: {}]  }
   0x1   :  { %v21_v0 = vld [vmem:[%s914_s0 + $0x8] sm:$0xff]  ;;  %v20_v1 = vld [vmem:[%s914_s0] sm:$0xff]  ;;  %471 = vset.pattern.permute.xlu1 %v485_v2  ;;  %470 = vset.pattern.permute.xlu2 %v485_v2  ;;  %v23_v6 = vld [vmem:[%s914_s0 + $0x18] sm:$0xff]  ;;  %v493_v14 = vmov 2   ;;  %s494_s7 = smov 127   ;;  %s495_s8 = smov 113   ;;  %v45_v22 = vlaneseq }
   0x2   :  { %v540_v3 = vmax.f32 %v21_v0, 0.0  ;;  %v542_v4 = vmax.f32 %v20_v1, 0.0  ;;  %v547_v5 = vld [vmem:[%s915_s2] sm:$0xff]  ;;  %v22_v7 = vld [vmem:[%s914_s0 + $0x10] sm:$0xff]  ;;  %v558_v8 = vmax.f32 %v23_v6, 0.0  ;;  %v568_v10 = vld [vmem:[%s915_s2 + $0x8] sm:$0xff]  ;;  %476 = vset.pattern.permute.xlu0 %v491_v13 }
   0x3   :  { %64 = vperm.xlu2 %470, %v547_v5   ;;  %v560_v9 = vmax.f32 %v22_v7, 0.0  ;;  %s488_s0 = smov 15   ;;  %s492_s2 = smov 1   ;;  %v496_v15 = vmov 5   ;;  %v498_v20 = vmov 6   ;;  %v499_v21 = vmov 8  }
   0x4   :  { %41 = vrot.lane.b32.xlu1 %v540_v3, %s486_s24  ;;  %37 = vrot.lane.b32.xlu0 %v542_v4, %s486_s24  ;;  %s497_s9 = smov 112   ;;  %v606_v17 = vld [vmem:[%s916_s1] ss:$2 sm:$0x3]  ;;  %v623_v25 = vand.u32 127, %v45_v22  ;;  %v501_v38 = vmov 7  }
   0x5   :  { %v611_v18 = vld [vmem:[%s916_s1 + $0x1] ss:$2 sm:$0x3]  ;;  %vm33_vm0 = vcmp.ge.s32.totalorder %v606_v17, 1  ;;  %s500_s1 = smov 111  }
   0x6   :  { %vm34_vm1 = vcmp.ge.s32.totalorder %v611_v18, 1  ;;  %vm47_vm3 = vcmp.lt.s32.totalorder %v623_v25, 17  ;;  %vm88_vm6 = vcmp.lt.s32.totalorder %v623_v25, 16  ;;  %v93_v45 = vsel %vm33_vm0, 1, %v485_v2 }
   0x7   :  { %vm52_vm2 = vmand %vm33_vm0, %vm34_vm1  ;;  %v94_v54 = vperm.slane %v93_v45, 0  ;;  %v95_v55 = vperm.slane %v93_v45, 1  ;;  %vm36_vm9 = vcmp.lt.s32.totalorder %v611_v18, 15  ;;  %vm126_vm11 = vcmp.lt.s32.totalorder %v623_v25, 15 }
   0x8   :  { %v53_v23 = vsel %vm52_vm2, 1, %v485_v2  ;;  %vm131_vm10 = vmand %vm33_vm0, %vm36_vm9  ;;  %vm165_vm14 = vcmp.lt.s32.totalorder %v623_v25, 1  ;;  %vm35_vm2 = vcmp.lt.s32.totalorder %v606_v17, 15 }
   0x9   :  { %v54_v26 = vperm.slane %v53_v23, 0  ;;  %v55_v27 = vperm.slane %v53_v23, 1  ;;  %vm667_vm7 = vcmp.eq.s32.totalorder %v94_v54, 1  ;;  %vm671_vm8 = vcmp.eq.s32.totalorder %v95_v55, 1 }
   0xb   :  { %82 = vrot.lane.b32.xlu2 %v560_v9, %s487_s29  ;;  %vm629_vm4 = vcmp.eq.s32.totalorder %v54_v26, 1  ;;  %vm633_vm5 = vcmp.eq.s32.totalorder %v55_v27, 1 }
   0xc   :  { %43 = vrot.lane.b32.xlu1 %v558_v8, %s486_s24  ;;  %39 = vrot.lane.b32.xlu0 %v560_v9, %s486_s24 }
   0xd   :  { %475 = vset.pattern.permute.xlu2 %v490_v12 }
  0x13   :  { %80 = vrot.lane.b32.xlu2 %v542_v4, %s487_s29 }
  0x14   :  { %69 = vperm.xlu1 %471, %v568_v10   ;;  %86 = vrot.lane.b32.xlu0 %v558_v8, %s487_s29 }
  0x1b   :  { %120 = vrot.lane.b32.xlu2 %v560_v9, %s488_s0 }
  0x1c   :  { %472 = vset.pattern.permute.xlu1 %v489_v11  ;;  %84 = vrot.lane.b32.xlu0 %v540_v3, %s487_s29  ;;  %v132_v11 = vsel %vm131_vm10, 1, %v485_v2 }
  0x1d   :  { %107 = vperm.xlu1 %472, %v568_v10   ;;  %v133_v22 = vperm.slane %v132_v11, 0  ;;  %v134_v23 = vperm.slane %v132_v11, 1 }
  0x1f   :  { %vm699_vm12 = vcmp.eq.s32.totalorder %v133_v22, 1  ;;  %vm703_vm13 = vcmp.eq.s32.totalorder %v134_v23, 1 }
  0x23   :  { %118 = vrot.lane.b32.xlu2 %v542_v4, %s488_s0 }
  0x24   :  { %124 = vrot.lane.b32.xlu0 %v558_v8, %s488_s0 }
  0x25   :  { %103 = vperm.xlu1 %472, %v547_v5  }
  0x2b   :  { %159 = vrot.lane.b32.xlu2 %v560_v9, %s492_s2 }
  0x2c   :  { %122 = vrot.lane.b32.xlu0 %v540_v3, %s488_s0 }
  0x2d   :  { %473 = vset.pattern.permute.xlu1 %v493_v14 }
  0x2e   :  { %146 = vperm.xlu1 %473, %v568_v10  }
  0x33   :  { %157 = vrot.lane.b32.xlu2 %v542_v4, %s492_s2 }
  0x34   :  { %163 = vrot.lane.b32.xlu0 %v558_v8, %s492_s2 }
  0x36   :  { %142 = vperm.xlu1 %473, %v547_v5  }
  0x3b   :  { %180 = vperm.xlu2 %475, %v547_v5  }
  0x3c   :  { %161 = vrot.lane.b32.xlu0 %v540_v3, %s492_s2 }
  0x3e   :  { %474 = vset.pattern.permute.xlu1 %v490_v12 }
  0x3f   :  { %184 = vperm.xlu1 %474, %v568_v10  }
  0x43   :  { %217 = vrot.lane.b32.xlu2 %v558_v8, %s494_s7 }
  0x44   :  { %200 = vperm.xlu0 %476, %v568_v10   ;;  %482 = vset.pattern.permute.xlu2 %v499_v21 }
  0x47   :  { %213 = vrot.lane.b32.xlu1 %v560_v9, %s494_s7 }
  0x48   :  { %477 = vset.pattern.permute.xlu1 %v491_v13 }
  0x4b   :  { %211 = vrot.lane.b32.xlu2 %v542_v4, %s494_s7 }
  0x4c   :  { %215 = vrot.lane.b32.xlu0 %v540_v3, %s494_s7 }
  0x4d   :  { %483 = vset.pattern.permute.xlu0 %v485_v2 }
  0x4f   :  { %196 = vperm.xlu1 %477, %v547_v5  }
  0x53   :  { %251 = vrot.lane.b32.xlu2 %v560_v9, %s495_s8 }
  0x54   :  { %255 = vrot.lane.b32.xlu0 %v558_v8, %s495_s8 }
  0x57   :  { %478 = vset.pattern.permute.xlu1 %v496_v15 }
  0x58   :  { %238 = vperm.xlu1 %478, %v568_v10  }
  0x5b   :  { %249 = vrot.lane.b32.xlu2 %v542_v4, %s495_s8 }
  0x5c   :  { %253 = vrot.lane.b32.xlu0 %v540_v3, %s495_s8 }
  0x5d   :  { %v65_v16 = vpop.permute.xlu2 %64 }
  0x60   :  { %234 = vperm.xlu1 %478, %v547_v5  }
  0x63   :  { %290 = vrot.lane.b32.xlu2 %v560_v9, %s497_s9 }
  0x64   :  { %294 = vrot.lane.b32.xlu0 %v558_v8, %s497_s9 }
  0x65   :  { %v83_v19 = vpop.permute.xlu2 %82 }
  0x68   :  { %479 = vset.pattern.permute.xlu1 %v498_v20 }
  0x69   :  { %277 = vperm.xlu1 %479, %v568_v10  }
  0x6b   :  { %288 = vrot.lane.b32.xlu2 %v542_v4, %s497_s9 }
  0x6c   :  { %292 = vrot.lane.b32.xlu0 %v540_v3, %s497_s9 }
  0x6d   :  { %v81_v24 = vpop.permute.xlu2 %80 }
  0x71   :  { %273 = vperm.xlu1 %479, %v547_v5  }
  0x73   :  { %328 = vrot.lane.b32.xlu2 %v560_v9, %s500_s1 }
  0x74   :  { %332 = vrot.lane.b32.xlu0 %v558_v8, %s500_s1 }
  0x75   :  { %v121_v39 = vpop.permute.xlu2 %120 }
  0x76   :  { %v42_v30 = vpop.permute.xlu1 %41  ;;  %v38_v31 = vpop.permute.xlu0 %37 }
  0x77   :  { %v48_v32 = vsel %vm47_vm3, %v38_v31, %v42_v30  ;;  %v50_v33 = vsel %vm47_vm3, %v42_v30, %v38_v31 }
  0x78   :  { %v58_v34 = vsel %vm629_vm4, %v50_v33, 0.0  ;;  %v59_v35 = vsel %vm633_vm5, %v48_v32, 0.0 }
  0x79   :  { %v72_v36 = vmul.f32 %v65_v16, %v58_v34  ;;  %v73_v37 = vmul.f32 %v65_v16, %v59_v35  ;;  %480 = vset.pattern.permute.xlu1 %v501_v38 }
  0x7a   :  { %315 = vperm.xlu1 %480, %v568_v10  }
  0x7b   :  { %326 = vrot.lane.b32.xlu2 %v542_v4, %s500_s1 }
  0x7c   :  { %330 = vrot.lane.b32.xlu0 %v540_v3, %s500_s1 }
  0x7d   :  { %v119_v44 = vpop.permute.xlu2 %118 }
  0x7e   :  { %v44_v40 = vpop.permute.xlu1 %43  ;;  %v40_v41 = vpop.permute.xlu0 %39 }
  0x7f   :  { %v49_v42 = vsel %vm47_vm3, %v40_v41, %v44_v40  ;;  %v51_v43 = vsel %vm47_vm3, %v44_v40, %v40_v41  ;;  %v170_v41 = vsel %vm34_vm1, 1, %v485_v2  ;;  %vm262_vm3 = vmand %vm35_vm2, %vm34_vm1  ;;  %vm219_vm1 = vcmp.lt.s32.totalorder %v623_v25, 127 }
  0x80   :  { %v60_v47 = vsel %vm629_vm4, %v51_v43, 0.0  ;;  %v61_v48 = vsel %vm633_vm5, %v49_v42, 0.0 }
  0x82   :  { %311 = vperm.xlu1 %480, %v547_v5  }
  0x83   :  { %350 = vperm.xlu2 %482, %v547_v5  }
  0x85   :  { %v160_v58 = vpop.permute.xlu2 %159 }
  0x86   :  { %v70_v46 = vpop.permute.xlu1 %69  ;;  %v87_v49 = vpop.permute.xlu0 %86 }
  0x87   :  { %v74_v50 = vmul.f32 %v70_v46, %v60_v47  ;;  %v75_v51 = vmul.f32 %v70_v46, %v61_v48  ;;  %v90_v52 = vsel %vm88_vm6, %v83_v19, %v87_v49  ;;  %v92_v53 = vsel %vm88_vm6, %v87_v49, %v83_v19 }
  0x88   :  { %v100_v63 = vsel %vm667_vm7, %v92_v53, 0.0  ;;  %v101_v0 = vsel %vm671_vm8, %v90_v52, 0.0  ;;  %v171_v47 = vperm.slane %v170_v41, 0  ;;  %v172_v48 = vperm.slane %v170_v41, 1 }
  0x8a   :  { %481 = vset.pattern.permute.xlu1 %v499_v21  ;;  %vm173_vm15 = vcmp.eq.s32.totalorder %v171_v47, 1  ;;  %vm174_vm0 = vcmp.eq.s32.totalorder %v172_v48, 1 }
  0x8b   :  { %354 = vperm.xlu1 %481, %v568_v10  }
  0x8d   :  { %v158_v19 = vpop.permute.xlu2 %157 }
  0x8e   :  { %v85_v59 = vpop.permute.xlu0 %84 }
  0x8f   :  { %v89_v60 = vsel %vm88_vm6, %v81_v24, %v85_v59  ;;  %v91_v61 = vsel %vm88_vm6, %v85_v59, %v81_v24  ;;  %v108_v62 = vpop.permute.xlu1 %107  ;;  %vm257_vm6 = vcmp.lt.s32.totalorder %v623_v25, 113 }
  0x90   :  { %v112_v1 = vmul.f32 %v108_v62, %v100_v63  ;;  %v113_v5 = vmul.f32 %v108_v62, %v101_v0  ;;  %v98_v15 = vsel %vm667_vm7, %v91_v61, 0.0  ;;  %v99_v16 = vsel %vm671_vm8, %v89_v60, 0.0  ;;  %vm339_vm7 = vmand %vm35_vm2, %vm36_vm9 }
  0x92   :  { %v116_v6 = vadd.f32 %v112_v1, %v74_v50  ;;  %v117_v7 = vadd.f32 %v113_v5, %v75_v51 }
  0x93   :  { %484 = vset.pattern.permute.xlu1 %v485_v2 }
  0x96   :  { %v125_v10 = vpop.permute.xlu0 %124 }
  0x97   :  { %v128_v12 = vsel %vm126_vm11, %v121_v39, %v125_v10  ;;  %v130_v13 = vsel %vm126_vm11, %v125_v10, %v121_v39  ;;  %v104_v14 = vpop.permute.xlu1 %103 }
  0x98   :  { %v110_v20 = vmul.f32 %v104_v14, %v98_v15  ;;  %v111_v21 = vmul.f32 %v104_v14, %v99_v16  ;;  %v139_v33 = vsel %vm699_vm12, %v130_v13, 0.0  ;;  %v140_v34 = vsel %vm703_vm13, %v128_v12, 0.0 }
  0x9a   :  { %v114_v24 = vadd.f32 %v110_v20, %v72_v36  ;;  %v115_v26 = vadd.f32 %v111_v21, %v73_v37  ;;  %v181_v37 = vpop.permute.xlu2 %180 }
  0x9e   :  { %v123_v29 = vpop.permute.xlu0 %122 }
  0x9f   :  { %v127_v30 = vsel %vm126_vm11, %v119_v44, %v123_v29  ;;  %v129_v31 = vsel %vm126_vm11, %v123_v29, %v119_v44 }
  0xa0   :  { %v147_v32 = vpop.permute.xlu1 %146  ;;  %v137_v43 = vsel %vm699_vm12, %v129_v31, 0.0  ;;  %v138_v44 = vsel %vm703_vm13, %v127_v30, 0.0  ;;  %v224_v30 = vsel %vm36_vm9, 1, %v485_v2  ;;  %vm296_vm9 = vcmp.lt.s32.totalorder %v623_v25, 112 }
  0xa1   :  { %v151_v35 = vmul.f32 %v147_v32, %v139_v33  ;;  %v152_v36 = vmul.f32 %v147_v32, %v140_v34  ;;  %v263_v32 = vsel %vm262_vm3, 1, %v485_v2  ;;  %v225_v33 = vperm.slane %v224_v30, 0 }
  0xa2   :  { %v218_v51 = vpop.permute.xlu2 %217  ;;  %v226_v34 = vperm.slane %v224_v30, 1  ;;  %vm334_vm13 = vcmp.lt.s32.totalorder %v623_v25, 111 }
  0xa3   :  { %v155_v38 = vadd.f32 %v151_v35, %v116_v6  ;;  %v156_v39 = vadd.f32 %v152_v36, %v117_v7  ;;  %v368_v36 = vld [vmem:[%s917_s4 + $0x8] sm:$0xff]  ;;  %vm763_vm4 = vcmp.eq.s32.totalorder %v225_v33, 1 }
  0xa4   :  { %376 = vperm.xlu1 %484, %v368_v36   ;;  %vm774_vm5 = vcmp.eq.s32.totalorder %v226_v34, 1 }
  0xa6   :  { %v164_v40 = vpop.permute.xlu0 %163 }
  0xa7   :  { %v167_v52 = vsel %vm165_vm14, %v160_v58, %v164_v40  ;;  %v169_v53 = vsel %vm165_vm14, %v164_v40, %v160_v58 }
  0xa8   :  { %v143_v42 = vpop.permute.xlu1 %142  ;;  %v177_v63 = vsel %vm173_vm15, %v169_v53, 0.0  ;;  %v178_v0 = vsel %vm174_vm0, %v167_v52, 0.0 }
  0xa9   :  { %v149_v45 = vmul.f32 %v143_v42, %v137_v43  ;;  %v150_v46 = vmul.f32 %v143_v42, %v138_v44  ;;  %v301_v43 = vsel %vm35_vm2, 1, %v485_v2 }
  0xaa   :  { %v212_v11 = vpop.permute.xlu2 %211  ;;  %v302_v52 = vperm.slane %v301_v43, 0  ;;  %v303_v17 = vperm.slane %v301_v43, 1 }
  0xab   :  { %v153_v49 = vadd.f32 %v149_v45, %v114_v24  ;;  %v154_v50 = vadd.f32 %v150_v46, %v115_v26 }
  0xac   :  { %vm813_vm11 = vcmp.eq.s32.totalorder %v302_v52, 1  ;;  %vm817_vm12 = vcmp.eq.s32.totalorder %v303_v17, 1 }
  0xae   :  { %v162_v54 = vpop.permute.xlu0 %161 }
  0xaf   :  { %v166_v55 = vsel %vm165_vm14, %v158_v19, %v162_v54  ;;  %v168_v56 = vsel %vm165_vm14, %v162_v54, %v158_v19 }
  0xb0   :  { %v175_v57 = vsel %vm173_vm15, %v168_v56, 0.0  ;;  %v176_v59 = vsel %vm174_vm0, %v166_v55, 0.0  ;;  %v340_v55 = vsel %vm339_vm7, 1, %v485_v2  ;;  %vm379_vm0 = vcmask 130048  }
  0xb1   :  { %v187_v60 = vmul.f32 %v181_v37, %v175_v57  ;;  %v188_v61 = vmul.f32 %v181_v37, %v176_v59  ;;  %v185_v62 = vpop.permute.xlu1 %184  ;;  %v367_v37 = vld [vmem:[%s917_s4] sm:$0xff] }
  0xb2   :  { %v189_v1 = vmul.f32 %v185_v62, %v177_v63  ;;  %v190_v5 = vmul.f32 %v185_v62, %v178_v0  ;;  %v252_v15 = vpop.permute.xlu2 %251  ;;  %371 = vperm.xlu0 %483, %v367_v37  }
  0xb3   :  { %v723_v6 = vadd.f32 %v187_v60, %v153_v49  ;;  %v725_v7 = vadd.f32 %v188_v61, %v154_v50 }
  0xb4   :  { %v193_v10 = vadd.f32 %v189_v1, %v155_v38  ;;  %v194_v58 = vadd.f32 %v190_v5, %v156_v39  ;;  %v264_v38 = vperm.slane %v263_v32, 0  ;;  %v265_v39 = vperm.slane %v263_v32, 1 }
  0xb5   :  { %v341_v1 = vperm.slane %v340_v55, 0  ;;  %v342_v5 = vperm.slane %v340_v55, 1 }
  0xb6   :  { %v201_v12 = vpop.permute.xlu0 %200  ;;  %vm789_vm8 = vcmp.eq.s32.totalorder %v264_v38, 1  ;;  %vm793_vm10 = vcmp.eq.s32.totalorder %v265_v39, 1 }
  0xb7   :  { %v205_v40 = vmul.f32 %v201_v12, %v560_v9  ;;  %v206_v41 = vmul.f32 %v201_v12, %v558_v8  ;;  %vm848_vm14 = vcmp.eq.s32.totalorder %v341_v1, 1  ;;  %vm856_vm15 = vcmp.eq.s32.totalorder %v342_v5, 1 }
  0xb9   :  { %v214_v13 = vpop.permute.xlu1 %213  ;;  %v210_v18 = vadd.f32 %v206_v41, %v194_v58 }
  0xba   :  { %v727_v20 = vpop.permute.xlu2 %249  ;;  %v221_v44 = vsel %vm219_vm1, %v214_v13, %v218_v51  ;;  %v223_v45 = vsel %vm219_vm1, %v218_v51, %v214_v13  ;;  %v209_v51 = vadd.f32 %v205_v40, %v193_v10 }
  0xbb   :  { %v231_v53 = vsel %vm763_vm4, %v221_v44, 0.0  ;;  %v232_v54 = vsel %vm774_vm5, %v223_v45, 0.0 }
  0xbe   :  { %v216_v14 = vpop.permute.xlu0 %215 }
  0xbf   :  { %v220_v9 = vsel %vm219_vm1, %v212_v11, %v216_v14  ;;  %v222_v47 = vsel %vm219_vm1, %v216_v14, %v212_v11 }
  0xc0   :  { %v229_v59 = vsel %vm763_vm4, %v220_v9, 0.0  ;;  %v230_v60 = vsel %vm774_vm5, %v222_v47, 0.0 }
  0xc1   :  { %v197_v16 = vpop.permute.xlu1 %196 }
  0xc2   :  { %v731_v24 = vpop.permute.xlu2 %290  ;;  %v203_v56 = vmul.f32 %v197_v16, %v542_v4  ;;  %v204_v57 = vmul.f32 %v197_v16, %v540_v3  ;;  %v366_v3 = vld [vmem:[%s918_s3 + $0x8] sm:$0xff] }
  0xc4   :  { %v207_v13 = vadd.f32 %v203_v56, %v723_v6  ;;  %v208_v14 = vadd.f32 %v204_v57, %v725_v7 }
  0xc6   :  { %v256_v19 = vpop.permute.xlu0 %255 }
  0xc7   :  { %v259_v63 = vsel %vm257_vm6, %v252_v15, %v256_v19  ;;  %v261_v0 = vsel %vm257_vm6, %v256_v19, %v252_v15 }
  0xc8   :  { %v270_v15 = vsel %vm789_vm8, %v259_v63, 0.0  ;;  %v271_v16 = vsel %vm793_vm10, %v261_v0, 0.0 }
  0xca   :  { %v239_v21 = vpop.permute.xlu1 %238  ;;  %v737_v28 = vpop.permute.xlu2 %288 }
  0xcb   :  { %v243_v61 = vmul.f32 %v239_v21, %v231_v53  ;;  %v244_v62 = vmul.f32 %v239_v21, %v232_v54 }
  0xcd   :  { %v247_v19 = vadd.f32 %v243_v61, %v209_v51  ;;  %v248_v21 = vadd.f32 %v244_v62, %v210_v18 }
  0xce   :  { %v729_v22 = vpop.permute.xlu0 %253 }
  0xcf   :  { %v258_v11 = vsel %vm257_vm6, %v727_v20, %v729_v22  ;;  %v260_v12 = vsel %vm257_vm6, %v729_v22, %v727_v20 }
  0xd0   :  { %v268_v7 = vsel %vm789_vm8, %v258_v11, 0.0  ;;  %v269_v22 = vsel %vm793_vm10, %v260_v12, 0.0 }
  0xd2   :  { %v235_v23 = vpop.permute.xlu1 %234  ;;  %v752_v35 = vpop.permute.xlu2 %328 }
  0xd3   :  { %v241_v10 = vmul.f32 %v235_v23, %v229_v59  ;;  %v242_v58 = vmul.f32 %v235_v23, %v230_v60 }
  0xd5   :  { %v245_v33 = vadd.f32 %v241_v10, %v207_v13  ;;  %v246_v34 = vadd.f32 %v242_v58, %v208_v14 }
  0xd6   :  { %v733_v26 = vpop.permute.xlu0 %294 }
  0xd7   :  { %v298_v23 = vsel %vm296_vm9, %v731_v24, %v733_v26  ;;  %v300_v6 = vsel %vm296_vm9, %v733_v26, %v731_v24 }
  0xd8   :  { %v308_v39 = vsel %vm813_vm11, %v298_v23, 0.0  ;;  %v309_v42 = vsel %vm817_vm12, %v300_v6, 0.0 }
  0xda   :  { %v327_v4 = vpop.permute.xlu2 %326 }
  0xdb   :  { %v735_v27 = vpop.permute.xlu1 %277 }
  0xdc   :  { %v282_v26 = vmul.f32 %v735_v27, %v270_v15  ;;  %v283_v37 = vmul.f32 %v735_v27, %v271_v16 }
  0xde   :  { %v740_v29 = vpop.permute.xlu0 %292  ;;  %v286_v47 = vadd.f32 %v282_v26, %v247_v19  ;;  %v287_v48 = vadd.f32 %v283_v37, %v248_v21 }
  0xdf   :  { %v297_v36 = vsel %vm296_vm9, %v737_v28, %v740_v29  ;;  %v299_v38 = vsel %vm296_vm9, %v740_v29, %v737_v28 }
  0xe0   :  { %v306_v45 = vsel %vm813_vm11, %v297_v36, 0.0  ;;  %v307_v46 = vsel %vm817_vm12, %v299_v38, 0.0 }
  0xe3   :  { %v749_v31 = vpop.permute.xlu1 %273 }
  0xe4   :  { %v280_v40 = vmul.f32 %v749_v31, %v268_v7  ;;  %v281_v41 = vmul.f32 %v749_v31, %v269_v22 }
  0xe6   :  { %v779_v8 = vpop.permute.xlu0 %332  ;;  %v284_v18 = vadd.f32 %v280_v40, %v245_v33  ;;  %v285_v52 = vadd.f32 %v281_v41, %v246_v34 }
  0xe7   :  { %v336_v29 = vsel %vm334_vm13, %v752_v35, %v779_v8  ;;  %v338_v31 = vsel %vm334_vm13, %v779_v8, %v752_v35 }
  0xe8   :  { %v347_v25 = vsel %vm848_vm14, %v336_v29, 0.0  ;;  %v348_v35 = vsel %vm856_vm15, %v338_v31, 0.0 }
  0xec   :  { %v316_v50 = vpop.permute.xlu1 %315 }
  0xed   :  { %v320_v44 = vmul.f32 %v316_v50, %v308_v39  ;;  %v321_v27 = vmul.f32 %v316_v50, %v309_v42  ;;  %v351_v50 = vpop.permute.xlu2 %350 }
  0xee   :  { %v331_v30 = vpop.permute.xlu0 %330 }
  0xef   :  { %v335_v43 = vsel %vm334_vm13, %v327_v4, %v331_v30  ;;  %v337_v28 = vsel %vm334_vm13, %v331_v30, %v327_v4  ;;  %v324_v8 = vadd.f32 %v320_v44, %v286_v47  ;;  %v325_v54 = vadd.f32 %v321_v27, %v287_v48  ;;  %v365_v4 = vld [vmem:[%s918_s3] sm:$0xff] }
  0xf0   :  { %v345_v51 = vsel %vm848_vm14, %v335_v43, 0.0  ;;  %v346_v17 = vsel %vm856_vm15, %v337_v28, 0.0 }
  0xf1   :  { %v357_v55 = vmul.f32 %v351_v50, %v345_v51  ;;  %v358_v60 = vmul.f32 %v351_v50, %v346_v17 }
  0xf4   :  { %v312_v20 = vpop.permute.xlu1 %311 }
  0xf5   :  { %v318_v9 = vmul.f32 %v312_v20, %v306_v45  ;;  %v319_v49 = vmul.f32 %v312_v20, %v307_v46 }
  0xf7   :  { %v322_v59 = vadd.f32 %v318_v9, %v284_v18  ;;  %v323_v61 = vadd.f32 %v319_v49, %v285_v52 }
  0xf9   :  { %v361_v0 = vadd.f32 %v357_v55, %v322_v59  ;;  %v362_v2 = vadd.f32 %v358_v60, %v323_v61 }
  0xfd   :  { %v355_v53 = vpop.permute.xlu1 %354 }
  0xfe   :  { %v359_v56 = vmul.f32 %v355_v53, %v347_v25  ;;  %v360_v57 = vmul.f32 %v355_v53, %v348_v35 }
 0x100   :  { %v363_v62 = vadd.f32 %v359_v56, %v324_v8  ;;  %v364_v63 = vadd.f32 %v360_v57, %v325_v54 }
 0x102   :  { %400 = vmatpush.msra.mxu0 %v363_v62  ;;  %449 = vmatpush.msra.mxu2 %v363_v62 }
 0x103   :  { %423 = vmatpush.msra.mxu1 %v364_v63  ;;  %451 = vmatpush.msra.mxu3 %v364_v63 }
 0x104   :  { %401 = vmatpush.msra.mxu0 %v361_v0  ;;  %450 = vmatpush.msra.mxu2 %v361_v0 }
 0x105   :  { %424 = vmatpush.msra.mxu1 %v362_v2  ;;  %452 = vmatpush.msra.mxu3 %v362_v2 }
 0x106   :  { %446 = vmatmul.msk.f32.vlgmr.msra.gmra.mxu2 %vm379_vm0, %v366_v3  ;;  %448 = vmatmul.msk.f32.vlgmr.msra.gmra.mxu3 %vm379_vm0, %v366_v3 }
 0x107   :  { %445 = vmatmul.msk.f32.vlgmr.msra.gmra.mxu0 %vm379_vm0, %v365_v4  ;;  %447 = vmatmul.msk.f32.vlgmr.msra.gmra.mxu1 %vm379_vm0, %v365_v4 }
 0x116   :  { %v377_v12 = vpop.permute.xlu1 %376 }
 0x124   :  { %v372_v1 = vpop.permute.xlu0 %371 }
 0x184   :  { %v426_v5 = vpop.f32.mrf.mxu1  ;;  %v403_v10 = vpop.f32.mrf.mxu0 }
 0x185   :  { %v427_v58 = vadd.f32 %v426_v5, %v372_v1  ;;  %v404_v11 = vadd.f32 %v403_v10, %v372_v1 }
 0x187   :  { %v433_v13 = vmax.f32 %v427_v58, 0.0  ;;  %v432_v14 = vmax.f32 %v404_v11, 0.0 }
 0x189   :  { %v429_v15 = vpop.f32.mrf.mxu3  ;;  %437 = vst [vmem:[%s919_s5 + $0x8] sm:$0xff] %v433_v13  ;;  %v406_v16 = vpop.f32.mrf.mxu2 }
 0x18a   :  { %v430_v19 = vadd.f32 %v429_v15, %v377_v12  ;;  %436 = vst [vmem:[%s919_s5] sm:$0xff] %v432_v14  ;;  %v407_v21 = vadd.f32 %v406_v16, %v377_v12 }
 0x18c   :  { %v435_v23 = vmax.f32 %v430_v19, 0.0  ;;  %v434_v20 = vmax.f32 %v407_v21, 0.0 }
 0x18e   :  { %439 = vst [vmem:[%s919_s5 + $0x18] sm:$0xff] %v435_v23 }
 0x18f   :  { %438 = vst [vmem:[%s919_s5 + $0x10] sm:$0xff] %v434_v20 }

// kernel: exit_module_forward.6
= control target key start
LH: loop header
LB: loop body
LE: loop exit
PB: predicated region body
PF: predicated region fallthrough
CT: control target
= control target key end

     0   :  { %v555_v0 = vmov 0   ;;  %s556_s24 = smov 8   ;;  %v558_v9 = vmov 1   ;;  %v560_v10 = vmov 2   ;;  %s561_s10 = smov 1   ;;  %v562_v11 = vmov 3   ;;  %s949_s2 = inlined_call_operand.vmem [shape: f32[32,9], index: 2, kind: input, shape index: {}]   ;;  %s950_s0 = inlined_call_operand.vmem [shape: f32[32,128], index: 0, kind: input, shape index: {}]   ;;  %s951_s1 = inlined_call_operand.vmem [shape: s32[2,128], index: 1, kind: input, shape index: {}]   ;;  %s952_s4 = inlined_call_operand.vmem [shape: f32[48,1], index: 4, kind: input, shape index: {}]   ;;  %s953_s3 = inlined_call_operand.vmem [shape: f32[48,32], index: 3, kind: input, shape index: {}]   ;;  %s954_s5 = inlined_call_operand.vmem [shape: f32[48,128], index: 5, kind: output, shape index: {}]  }
   0x1   :  { %525 = vset.pattern.permute.xlu2 %v555_v0  ;;  %v606_v1 = vld [vmem:[%s949_s2] sm:$0xff]  ;;  %v611_v2 = vld [vmem:[%s950_s0 + $0x10] sm:$0xff]  ;;  %527 = vset.pattern.permute.xlu1 %v555_v0  ;;  %v626_v4 = vld [vmem:[%s949_s2 + $0x8] sm:$0xff]  ;;  %v563_v12 = vmov 4   ;;  %v564_v13 = vmov 5   ;;  %s565_s11 = smov 127  }
   0x2   :  { %v616_v3 = vld [vmem:[%s950_s0] sm:$0xff]  ;;  %52 = vperm.xlu2 %525, %v606_v1   ;;  %38 = vrot.lane.b32.xlu1 %v611_v2, %s556_s24  ;;  %v631_v5 = vld [vmem:[%s950_s0 + $0x18] sm:$0xff]  ;;  %v636_v6 = vld [vmem:[%s950_s0 + $0x8] sm:$0xff]  ;;  %s557_s0 = smov 7   ;;  %v566_v18 = vmov 6   ;;  %s568_s16 = smov 122  }
   0x3   :  { %34 = vrot.lane.b32.xlu0 %v616_v3, %s556_s24  ;;  %v644_v7 = vld [vmem:[%s949_s2 + $0x18] sm:$0xff]  ;;  %v649_v8 = vld [vmem:[%s949_s2 + $0x10] sm:$0xff]  ;;  %s559_s2 = smov 6   ;;  %v687_v16 = vld [vmem:[%s951_s1] sm:$0x1]  ;;  %v569_v30 = vmov 7  }
   0x4   :  { %526 = vset.pattern.permute.xlu0 %v555_v0  ;;  %v692_v17 = vld [vmem:[%s951_s1 + $0x1] sm:$0x1]  ;;  %vm30_vm0 = vcmp.ge.s32.totalorder %v687_v16, 1  ;;  %s567_s1 = smov 120   ;;  %s570_s17 = smov 121   ;;  %vm32_vm10 = vcmp.lt.s32.totalorder %v687_v16, 6 }
   0x5   :  { %vm31_vm1 = vcmp.ge.s32.totalorder %v692_v17, 1  ;;  %v86_v34 = vsel %vm30_vm0, 1, %v555_v0  ;;  %vm33_vm5 = vcmp.lt.s32.totalorder %v692_v17, 6 }
   0x6   :  { %vm42_vm2 = vmand %vm30_vm0, %vm31_vm1  ;;  %v87_v41 = vperm.slane %v86_v34, 0  ;;  %v228_v43 = vsel %vm33_vm5, 1, %v555_v0 }
   0x7   :  { %v43_v20 = vsel %vm42_vm2, 1, %v555_v0  ;;  %vm125_vm6 = vmand %vm30_vm0, %vm33_vm5  ;;  %vm420_vm0 = vcmask 261120  }
   0x8   :  { %v44_v21 = vperm.slane %v43_v20, 0  ;;  %vm740_vm4 = vcmp.eq.s32.totalorder %v87_v41, 1  ;;  %v126_v59 = vsel %vm125_vm6, 1, %v555_v0  ;;  %vm267_vm11 = vmand %vm32_vm10, %vm31_vm1 }
   0x9   :  { %v127_v61 = vperm.slane %v126_v59, 0  ;;  %vm346_vm12 = vmand %vm32_vm10, %vm33_vm5 }
   0xa   :  { %57 = vperm.xlu2 %525, %v626_v4   ;;  %40 = vrot.lane.b32.xlu1 %v631_v5, %s556_s24  ;;  %vm711_vm3 = vcmp.eq.s32.totalorder %v44_v21, 1  ;;  %v347_v16 = vsel %vm346_vm12, 1, %v555_v0 }
   0xb   :  { %36 = vrot.lane.b32.xlu0 %v636_v6, %s556_s24  ;;  %vm769_vm7 = vcmp.eq.s32.totalorder %v127_v61, 1 }
  0x12   :  { %67 = vperm.xlu1 %527, %v644_v7   ;;  %78 = vrot.lane.b32.xlu2 %v616_v3, %s557_s0 }
  0x13   :  { %62 = vperm.xlu0 %526, %v649_v8   ;;  %529 = vset.pattern.permute.xlu2 %v558_v9 }
  0x1a   :  { %80 = vrot.lane.b32.xlu1 %v636_v6, %s557_s0  ;;  %82 = vrot.lane.b32.xlu2 %v611_v2, %s557_s0 }
  0x1b   :  { %84 = vrot.lane.b32.xlu0 %v631_v5, %s557_s0  ;;  %528 = vset.pattern.permute.xlu1 %v558_v9 }
  0x1c   :  { %530 = vset.pattern.permute.xlu0 %v558_v9 }
  0x22   :  { %94 = vperm.xlu1 %528, %v606_v1   ;;  %98 = vperm.xlu2 %529, %v626_v4  }
  0x23   :  { %102 = vperm.xlu0 %530, %v649_v8  }
  0x2a   :  { %106 = vperm.xlu1 %528, %v644_v7   ;;  %117 = vrot.lane.b32.xlu2 %v616_v3, %s559_s2 }
  0x2b   :  { %123 = vrot.lane.b32.xlu0 %v631_v5, %s559_s2  ;;  %532 = vset.pattern.permute.xlu2 %v560_v10 }
  0x2c   :  { %533 = vset.pattern.permute.xlu0 %v560_v10 }
  0x32   :  { %119 = vrot.lane.b32.xlu1 %v636_v6, %s559_s2  ;;  %121 = vrot.lane.b32.xlu2 %v611_v2, %s559_s2 }
  0x33   :  { %142 = vperm.xlu0 %533, %v649_v8   ;;  %531 = vset.pattern.permute.xlu1 %v560_v10 }
  0x3a   :  { %134 = vperm.xlu1 %531, %v606_v1   ;;  %138 = vperm.xlu2 %532, %v626_v4  }
  0x3b   :  { %163 = vrot.lane.b32.xlu0 %v631_v5, %s561_s10 }
  0x3c   :  { %536 = vset.pattern.permute.xlu0 %v562_v11 }
  0x42   :  { %146 = vperm.xlu1 %531, %v644_v7   ;;  %157 = vrot.lane.b32.xlu2 %v616_v3, %s561_s10 }
  0x43   :  { %181 = vperm.xlu0 %536, %v649_v8   ;;  %535 = vset.pattern.permute.xlu2 %v562_v11 }
  0x4a   :  { %159 = vrot.lane.b32.xlu1 %v636_v6, %s561_s10  ;;  %161 = vrot.lane.b32.xlu2 %v611_v2, %s561_s10 }
  0x4b   :  { %539 = vset.pattern.permute.xlu0 %v563_v12  ;;  %534 = vset.pattern.permute.xlu1 %v562_v11 }
  0x4c   :  { %205 = vperm.xlu0 %539, %v649_v8  }
  0x52   :  { %173 = vperm.xlu1 %534, %v606_v1   ;;  %177 = vperm.xlu2 %535, %v626_v4  }
  0x54   :  { %541 = vset.pattern.permute.xlu0 %v564_v13 }
  0x55   :  { %244 = vperm.xlu0 %541, %v649_v8  }
  0x5a   :  { %185 = vperm.xlu1 %534, %v644_v7   ;;  %537 = vset.pattern.permute.xlu2 %v563_v12 }
  0x5b   :  { %197 = vperm.xlu2 %537, %v606_v1  }
  0x5c   :  { %v53_v14 = vpop.permute.xlu2 %52 }
  0x5d   :  { %240 = vperm.xlu0 %541, %v626_v4  }
  0x62   :  { %538 = vset.pattern.permute.xlu1 %v563_v12 }
  0x63   :  { %209 = vperm.xlu1 %538, %v644_v7   ;;  %226 = vrot.lane.b32.xlu2 %v631_v5, %s565_s11 }
  0x64   :  { %v58_v15 = vpop.permute.xlu2 %57 }
  0x65   :  { %220 = vrot.lane.b32.xlu0 %v616_v3, %s565_s11 }
  0x66   :  { %547 = vset.pattern.permute.xlu0 %v566_v18 }
  0x6b   :  { %540 = vset.pattern.permute.xlu1 %v564_v13  ;;  %224 = vrot.lane.b32.xlu2 %v611_v2, %s565_s11 }
  0x6c   :  { %248 = vperm.xlu1 %540, %v644_v7   ;;  %v79_v19 = vpop.permute.xlu2 %78 }
  0x6d   :  { %344 = vrot.lane.b32.xlu0 %v631_v5, %s567_s1  ;;  %v89_v51 = vsel %vm740_vm4, %v79_v19, 0.0 }
  0x73   :  { %201 = vperm.xlu2 %537, %v626_v4  }
  0x74   :  { %v39_v22 = vpop.permute.xlu1 %38  ;;  %265 = vrot.lane.b32.xlu1 %v631_v5, %s568_s16  ;;  %v83_v23 = vpop.permute.xlu2 %82 }
  0x75   :  { %v35_v25 = vpop.permute.xlu0 %34  ;;  %542 = vset.pattern.permute.xlu1 %v566_v18  ;;  %276 = vperm.xlu0 %547, %v606_v1   ;;  %v48_v38 = vsel %vm711_vm3, %v39_v22, 0.0  ;;  %v91_v50 = vsel %vm740_vm4, %v83_v23, 0.0 }
  0x76   :  { %v46_v26 = vsel %vm711_vm3, %v35_v25, 0.0  ;;  %v165_v25 = vsel %vm31_vm1, 1, %v555_v0 }
  0x77   :  { %v70_v27 = vmul.f32 %v53_v14, %v46_v26  ;;  %v571_v14 = vmov 8  }
  0x7b   :  { %222 = vrot.lane.b32.xlu2 %v636_v6, %s565_s11 }
  0x7c   :  { %v41_v28 = vpop.permute.xlu1 %40  ;;  %288 = vperm.xlu1 %542, %v644_v7   ;;  %v99_v29 = vpop.permute.xlu2 %98  ;;  %543 = vset.pattern.permute.xlu2 %v569_v30 }
  0x7d   :  { %v37_v31 = vpop.permute.xlu0 %36  ;;  %548 = vset.pattern.permute.xlu0 %v569_v30  ;;  %v49_v35 = vsel %vm711_vm3, %v41_v28, 0.0 }
  0x7e   :  { %v47_v32 = vsel %vm711_vm3, %v37_v31, 0.0  ;;  %323 = vperm.xlu0 %548, %v649_v8  }
  0x7f   :  { %v71_v33 = vmul.f32 %v58_v15, %v47_v32 }
  0x83   :  { %305 = vrot.lane.b32.xlu2 %v631_v5, %s570_s17 }
  0x84   :  { %v68_v36 = vpop.permute.xlu1 %67  ;;  %263 = vrot.lane.b32.xlu1 %v611_v2, %s568_s16  ;;  %v735_v37 = vpop.permute.xlu2 %117 }
  0x85   :  { %v73_v39 = vmul.f32 %v68_v36, %v49_v35  ;;  %v63_v40 = vpop.permute.xlu0 %62  ;;  %v129_v26 = vsel %vm769_vm7, %v735_v37, 0.0 }
  0x86   :  { %v72_v42 = vmul.f32 %v63_v40, %v48_v38  ;;  %315 = vperm.xlu0 %548, %v606_v1  }
  0x8b   :  { %327 = vperm.xlu2 %543, %v644_v7  }
  0x8c   :  { %284 = vperm.xlu1 %542, %v649_v8   ;;  %v81_v44 = vpop.permute.xlu1 %80  ;;  %v122_v45 = vpop.permute.xlu2 %121 }
  0x8d   :  { %v90_v46 = vsel %vm740_vm4, %v81_v44, 0.0  ;;  %v85_v47 = vpop.permute.xlu0 %84 }
  0x8e   :  { %v110_v48 = vmul.f32 %v99_v29, %v90_v46  ;;  %553 = vset.pattern.permute.xlu0 %v555_v0  ;;  %v92_v60 = vsel %vm740_vm4, %v85_v47, 0.0  ;;  %v229_v47 = vperm.slane %v228_v43, 0 }
  0x90   :  { %v114_v49 = vadd.f32 %v110_v48, %v71_v33  ;;  %vm811_vm9 = vcmp.eq.s32.totalorder %v229_v47, 1 }
  0x93   :  { %303 = vrot.lane.b32.xlu2 %v611_v2, %s570_s17 }
  0x94   :  { %261 = vrot.lane.b32.xlu1 %v636_v6, %s568_s16  ;;  %v95_v52 = vpop.permute.xlu1 %94  ;;  %v139_v53 = vpop.permute.xlu2 %138  ;;  %545 = vset.pattern.permute.xlu2 %v566_v18 }
  0x95   :  { %v109_v54 = vmul.f32 %v95_v52, %v89_v51  ;;  %v103_v55 = vpop.permute.xlu0 %102  ;;  %544 = vset.pattern.permute.xlu1 %v564_v13  ;;  %v131_v13 = vsel %vm769_vm7, %v122_v45, 0.0 }
  0x96   :  { %v111_v56 = vmul.f32 %v103_v55, %v91_v50 }
  0x97   :  { %v113_v57 = vadd.f32 %v109_v54, %v70_v27  ;;  %v166_v27 = vperm.slane %v165_v25, 0 }
  0x98   :  { %v115_v58 = vadd.f32 %v111_v56, %v72_v42 }
  0x99   :  { %vm791_vm8 = vcmp.eq.s32.totalorder %v166_v27, 1 }
  0x9b   :  { %280 = vperm.xlu2 %545, %v626_v4  }
  0x9c   :  { %236 = vperm.xlu1 %544, %v606_v1   ;;  %v107_v62 = vpop.permute.xlu1 %106  ;;  %v158_v63 = vpop.permute.xlu2 %157 }
  0x9d   :  { %v112_v9 = vmul.f32 %v107_v62, %v92_v60  ;;  %v124_v10 = vpop.permute.xlu0 %123  ;;  %v168_v50 = vsel %vm791_vm8, %v158_v63, 0.0 }
  0x9e   :  { %v132_v34 = vsel %vm769_vm7, %v124_v10, 0.0 }
  0x9f   :  { %v116_v11 = vadd.f32 %v112_v9, %v73_v39 }
  0xa3   :  { %259 = vrot.lane.b32.xlu2 %v616_v3, %s568_s16 }
  0xa4   :  { %546 = vset.pattern.permute.xlu1 %v571_v14  ;;  %v120_v15 = vpop.permute.xlu1 %119  ;;  %v162_v18 = vpop.permute.xlu2 %161  ;;  %550 = vset.pattern.permute.xlu2 %v571_v14 }
  0xa5   :  { %v130_v19 = vsel %vm769_vm7, %v120_v15, 0.0  ;;  %v143_v20 = vpop.permute.xlu0 %142  ;;  %367 = vperm.xlu1 %546, %v644_v7   ;;  %v170_v35 = vsel %vm791_vm8, %v162_v18, 0.0 }
  0xa6   :  { %v150_v21 = vmul.f32 %v139_v53, %v130_v19  ;;  %v151_v22 = vmul.f32 %v143_v20, %v131_v13 }
  0xa8   :  { %v154_v23 = vadd.f32 %v150_v21, %v114_v49  ;;  %v155_v24 = vadd.f32 %v151_v22, %v115_v58 }
  0xab   :  { %342 = vrot.lane.b32.xlu2 %v611_v2, %s567_s1 }
  0xac   :  { %v135_v28 = vpop.permute.xlu1 %134  ;;  %v178_v29 = vpop.permute.xlu2 %177 }
  0xad   :  { %v149_v31 = vmul.f32 %v135_v28, %v129_v26  ;;  %v164_v7 = vpop.permute.xlu0 %163  ;;  %301 = vrot.lane.b32.xlu1 %v636_v6, %s570_s17 }
  0xae   :  { %549 = vset.pattern.permute.xlu1 %v569_v30  ;;  %v171_v12 = vsel %vm791_vm8, %v164_v7, 0.0 }
  0xaf   :  { %v153_v32 = vadd.f32 %v149_v31, %v113_v57 }
  0xb3   :  { %363 = vperm.xlu2 %550, %v649_v8  }
  0xb4   :  { %v147_v36 = vpop.permute.xlu1 %146 }
  0xb5   :  { %v152_v37 = vmul.f32 %v147_v36, %v132_v34  ;;  %v182_v38 = vpop.permute.xlu0 %181  ;;  %319 = vperm.xlu1 %549, %v626_v4   ;;  %v198_v39 = vpop.permute.xlu2 %197  ;;  %v268_v34 = vsel %vm267_vm11, 1, %v555_v0  ;;  %v307_v36 = vsel %vm32_vm10, 1, %v555_v0 }
  0xb6   :  { %v190_v30 = vmul.f32 %v182_v38, %v170_v35  ;;  %v212_v53 = vmul.f32 %v198_v39, %v616_v3  ;;  %v308_v39 = vperm.slane %v307_v36, 0 }
  0xb7   :  { %v156_v40 = vadd.f32 %v152_v37, %v116_v11  ;;  %v269_v37 = vperm.slane %v268_v34, 0  ;;  %v389_v34 = vld [vmem:[%s952_s4 + $0x28] sm:$0xff] }
  0xb8   :  { %v194_v41 = vadd.f32 %v190_v30, %v155_v24  ;;  %vm856_vm14 = vcmp.eq.s32.totalorder %v308_v39, 1  ;;  %v378_v39 = vld [vmem:[%s953_s3] sm:$0xff] }
  0xb9   :  { %vm852_vm13 = vcmp.eq.s32.totalorder %v269_v37, 1 }
  0xbb   :  { %340 = vrot.lane.b32.xlu2 %v636_v6, %s567_s1 }
  0xbc   :  { %v160_v42 = vpop.permute.xlu1 %159  ;;  %552 = vset.pattern.permute.xlu2 %v555_v0 }
  0xbd   :  { %v169_v8 = vsel %vm791_vm8, %v160_v42, 0.0  ;;  %299 = vrot.lane.b32.xlu1 %v616_v3, %s570_s17  ;;  %v227_v44 = vpop.permute.xlu2 %226  ;;  %v348_v42 = vperm.slane %v347_v16, 0  ;;  %v379_v16 = vld [vmem:[%s953_s3 + $0x8] sm:$0xff] }
  0xbe   :  { %v189_v45 = vmul.f32 %v178_v29, %v169_v8  ;;  %v206_v46 = vpop.permute.xlu0 %205  ;;  %551 = vset.pattern.permute.xlu1 %v571_v14 }
  0xbf   :  { %v214_v51 = vmul.f32 %v206_v46, %v611_v2  ;;  %vm866_vm15 = vcmp.eq.s32.totalorder %v348_v42, 1  ;;  %v383_v42 = vld [vmem:[%s953_s3 + $0x28] sm:$0xff] }
  0xc0   :  { %v193_v48 = vadd.f32 %v189_v45, %v154_v23 }
  0xc1   :  { %v218_v59 = vadd.f32 %v214_v51, %v194_v41  ;;  %v380_v41 = vld [vmem:[%s953_s3 + $0x10] sm:$0xff] }
  0xc3   :  { %338 = vrot.lane.b32.xlu2 %v616_v3, %s567_s1 }
  0xc4   :  { %v174_v52 = vpop.permute.xlu1 %173 }
  0xc5   :  { %v188_v54 = vmul.f32 %v174_v52, %v168_v50  ;;  %359 = vperm.xlu1 %551, %v626_v4   ;;  %v225_v55 = vpop.permute.xlu2 %224 }
  0xc6   :  { %v233_v56 = vsel %vm811_vm9, %v225_v55, 0.0 }
  0xc7   :  { %v192_v57 = vadd.f32 %v188_v54, %v153_v32  ;;  %v245_v58 = vpop.permute.xlu0 %244 }
  0xc8   :  { %v253_v60 = vmul.f32 %v245_v58, %v233_v56 }
  0xc9   :  { %v824_v61 = vadd.f32 %v212_v53, %v192_v57 }
  0xca   :  { %v257_v62 = vadd.f32 %v253_v60, %v218_v59 }
  0xcc   :  { %v186_v63 = vpop.permute.xlu1 %185 }
  0xcd   :  { %355 = vperm.xlu1 %551, %v606_v1   ;;  %v202_v2 = vpop.permute.xlu2 %201  ;;  %v191_v15 = vmul.f32 %v186_v63, %v171_v12  ;;  %v384_v12 = vld [vmem:[%s952_s4] sm:$0xff] }
  0xce   :  { %v213_v3 = vmul.f32 %v202_v2, %v636_v6  ;;  %v234_v6 = vsel %vm811_vm9, %v227_v44, 0.0  ;;  %392 = vperm.xlu2 %552, %v384_v12  }
  0xcf   :  { %v241_v10 = vpop.permute.xlu0 %240  ;;  %v195_v19 = vadd.f32 %v191_v15, %v156_v40  ;;  %v382_v40 = vld [vmem:[%s953_s3 + $0x20] sm:$0xff] }
  0xd0   :  { %v217_v9 = vadd.f32 %v213_v3, %v193_v48 }
  0xd5   :  { %v210_v4 = vpop.permute.xlu1 %209  ;;  %v223_v11 = vpop.permute.xlu2 %222  ;;  %554 = vset.pattern.permute.xlu1 %v555_v0 }
  0xd6   :  { %v232_v13 = vsel %vm811_vm9, %v223_v11, 0.0  ;;  %v215_v1 = vmul.f32 %v210_v4, %v631_v5  ;;  %v386_v11 = vld [vmem:[%s952_s4 + $0x10] sm:$0xff] }
  0xd7   :  { %v252_v14 = vmul.f32 %v241_v10, %v232_v13  ;;  %v838_v29 = vpop.permute.xlu0 %220  ;;  %402 = vperm.xlu1 %554, %v386_v11  }
  0xd8   :  { %v219_v22 = vadd.f32 %v215_v1, %v195_v19  ;;  %v231_v1 = vsel %vm811_vm9, %v838_v29, 0.0 }
  0xd9   :  { %v833_v18 = vadd.f32 %v252_v14, %v217_v9  ;;  %v385_v14 = vld [vmem:[%s952_s4 + $0x8] sm:$0xff] }
  0xda   :  { %397 = vperm.xlu0 %553, %v385_v14  }
  0xdd   :  { %v306_v20 = vpop.permute.xlu2 %305 }
  0xde   :  { %v249_v21 = vpop.permute.xlu1 %248  ;;  %v313_v44 = vsel %vm856_vm14, %v306_v20, 0.0 }
  0xdf   :  { %v254_v23 = vmul.f32 %v249_v21, %v234_v6  ;;  %v345_v5 = vpop.permute.xlu0 %344  ;;  %v388_v21 = vld [vmem:[%s952_s4 + $0x20] sm:$0xff] }
  0xe0   :  { %v353_v52 = vsel %vm866_vm15, %v345_v5, 0.0  ;;  %412 = vperm.xlu1 %554, %v388_v21  }
  0xe1   :  { %v258_v24 = vadd.f32 %v254_v23, %v219_v22  ;;  %v387_v22 = vld [vmem:[%s952_s4 + $0x18] sm:$0xff] }
  0xe2   :  { %407 = vperm.xlu2 %552, %v387_v22  }
  0xe5   :  { %v328_v25 = vpop.permute.xlu2 %327 }
  0xe6   :  { %v266_v26 = vpop.permute.xlu1 %265  ;;  %v333_v50 = vmul.f32 %v328_v25, %v313_v44 }
  0xe7   :  { %v849_v38 = vpop.permute.xlu0 %276  ;;  %v274_v17 = vsel %vm852_vm13, %v266_v26, 0.0 }
  0xea   :  { %417 = vperm.xlu2 %552, %v389_v34  }
  0xed   :  { %v304_v27 = vpop.permute.xlu2 %303 }
  0xee   :  { %v289_v28 = vpop.permute.xlu1 %288  ;;  %v312_v47 = vsel %vm856_vm14, %v304_v27, 0.0 }
  0xef   :  { %v294_v8 = vmul.f32 %v289_v28, %v274_v17 }
  0xf0   :  { %v324_v48 = vpop.permute.xlu0 %323 }
  0xf1   :  { %v298_v51 = vadd.f32 %v294_v8, %v258_v24  ;;  %v332_v56 = vmul.f32 %v324_v48, %v312_v47 }
  0xf3   :  { %v337_v59 = vadd.f32 %v333_v50, %v298_v51 }
  0xf5   :  { %v281_v7 = vpop.permute.xlu2 %280 }
  0xf6   :  { %v264_v31 = vpop.permute.xlu1 %263 }
  0xf7   :  { %v273_v0 = vsel %vm852_vm13, %v264_v31, 0.0 }
  0xf8   :  { %v316_v29 = vpop.permute.xlu0 %315 }
  0xfd   :  { %v841_v33 = vpop.permute.xlu2 %259 }
  0xfe   :  { %v285_v32 = vpop.permute.xlu1 %284  ;;  %v271_v49 = vsel %vm852_vm13, %v841_v33, 0.0 }
  0xff   :  { %v293_v46 = vmul.f32 %v285_v32, %v273_v0  ;;  %v291_v31 = vmul.f32 %v849_v38, %v271_v49 }
 0x101   :  { %v297_v55 = vadd.f32 %v293_v46, %v257_v62 }
 0x103   :  { %v336_v63 = vadd.f32 %v332_v56, %v297_v55 }
 0x105   :  { %v343_v30 = vpop.permute.xlu2 %342 }
 0x106   :  { %v262_v35 = vpop.permute.xlu1 %261  ;;  %v352_v53 = vsel %vm866_vm15, %v343_v30, 0.0  ;;  %v381_v30 = vld [vmem:[%s953_s3 + $0x18] sm:$0xff] }
 0x107   :  { %v272_v62 = vsel %vm852_vm13, %v262_v35, 0.0 }
 0x108   :  { %v292_v15 = vmul.f32 %v281_v7, %v272_v62 }
 0x10a   :  { %v296_v23 = vadd.f32 %v292_v15, %v833_v18 }
 0x10d   :  { %v364_v54 = vpop.permute.xlu2 %363 }
 0x10e   :  { %v237_v43 = vpop.permute.xlu1 %236  ;;  %v372_v58 = vmul.f32 %v364_v54, %v352_v53 }
 0x10f   :  { %v251_v24 = vmul.f32 %v237_v43, %v231_v1 }
 0x110   :  { %v376_v3 = vadd.f32 %v372_v58, %v336_v63 }
 0x111   :  { %v255_v7 = vadd.f32 %v251_v24, %v824_v61 }
 0x113   :  { %v295_v35 = vadd.f32 %v291_v31, %v255_v7 }
 0x115   :  { %v341_v13 = vpop.permute.xlu2 %340 }
 0x116   :  { %v351_v20 = vsel %vm866_vm15, %v341_v13, 0.0 }
 0x117   :  { %v368_v57 = vpop.permute.xlu1 %367 }
 0x118   :  { %v373_v60 = vmul.f32 %v368_v57, %v353_v52 }
 0x11a   :  { %v377_v2 = vadd.f32 %v373_v60, %v337_v59 }
 0x11c   :  { %451 = vmatpush.msra.mxu0 %v377_v2  ;;  %496 = vmatpush.msra.mxu1 %v377_v2 }
 0x11d   :  { %497 = vmatpush.msra.mxu2 %v377_v2  ;;  %498 = vmatpush.msra.mxu3 %v377_v2  ;;  %v339_v18 = vpop.permute.xlu2 %338 }
 0x11e   :  { %452 = vmatpush.msra.mxu0 %v376_v3  ;;  %499 = vmatpush.msra.mxu1 %v376_v3  ;;  %v350_v33 = vsel %vm866_vm15, %v339_v18, 0.0 }
 0x11f   :  { %500 = vmatpush.msra.mxu2 %v376_v3  ;;  %501 = vmatpush.msra.mxu3 %v376_v3  ;;  %v302_v9 = vpop.permute.xlu1 %301 }
 0x120   :  { %v311_v6 = vsel %vm856_vm14, %v302_v9, 0.0 }
 0x127   :  { %v320_v10 = vpop.permute.xlu1 %319 }
 0x128   :  { %v331_v19 = vmul.f32 %v320_v10, %v311_v6  ;;  %v393_v43 = vpop.permute.xlu2 %392 }
 0x12a   :  { %v335_v26 = vadd.f32 %v331_v19, %v296_v23 }
 0x12f   :  { %v300_v4 = vpop.permute.xlu1 %299 }
 0x130   :  { %v310_v28 = vsel %vm856_vm14, %v300_v4, 0.0 }
 0x131   :  { %v330_v5 = vmul.f32 %v316_v29, %v310_v28 }
 0x133   :  { %v334_v37 = vadd.f32 %v330_v5, %v295_v35 }
 0x137   :  { %v360_v25 = vpop.permute.xlu1 %359 }
 0x138   :  { %v371_v27 = vmul.f32 %v360_v25, %v351_v20 }
 0x13a   :  { %v375_v32 = vadd.f32 %v371_v27, %v335_v26 }
 0x13c   :  { %453 = vmatpush.msra.mxu0 %v375_v32  ;;  %502 = vmatpush.msra.mxu1 %v375_v32  ;;  %v408_v50 = vpop.permute.xlu2 %407 }
 0x13d   :  { %503 = vmatpush.msra.mxu2 %v375_v32  ;;  %504 = vmatpush.msra.mxu3 %v375_v32 }
 0x13f   :  { %v356_v36 = vpop.permute.xlu1 %355 }
 0x140   :  { %v370_v38 = vmul.f32 %v356_v36, %v350_v33 }
 0x142   :  { %v374_v61 = vadd.f32 %v370_v38, %v334_v37 }
 0x144   :  { %454 = vmatpush.msra.mxu0 %v374_v61  ;;  %505 = vmatpush.msra.mxu1 %v374_v61  ;;  %v418_v63 = vpop.permute.xlu2 %417 }
 0x145   :  { %506 = vmatpush.msra.mxu2 %v374_v61  ;;  %507 = vmatpush.msra.mxu3 %v374_v61 }
 0x146   :  { %490 = vmatmul.msk.f32.vlgmr.msra.gmra.mxu0 %vm420_vm0, %v378_v39  ;;  %491 = vmatmul.msk.f32.vlgmr.msra.gmra.mxu1 %vm420_vm0, %v379_v16 }
 0x147   :  { %493 = vmatmul.msk.f32.vlgmr.msra.gmra.mxu2 %vm420_vm0, %v381_v30  ;;  %494 = vmatmul.msk.f32.vlgmr.msra.gmra.mxu3 %vm420_vm0, %v382_v40 }
 0x149   :  { %v403_v17 = vpop.permute.xlu1 %402 }
 0x14c   :  { %v398_v8 = vpop.permute.xlu0 %397 }
 0x14e   :  { %492 = vmatmul.msk.f32.gmra.mxu1 %vm420_vm0, %v380_v41 }
 0x14f   :  { %495 = vmatmul.msk.f32.gmra.mxu3 %vm420_vm0, %v383_v42 }
 0x152   :  { %v413_v51 = vpop.permute.xlu1 %412 }
 0x1c3   :  { %v456_v44 = vpop.f32.mrf.mxu0  ;;  %v459_v0 = vpop.f32.mrf.mxu1 }
 0x1c4   :  { %v457_v45 = vadd.f32 %v456_v44, %v393_v43  ;;  %v460_v46 = vadd.f32 %v459_v0, %v398_v8 }
 0x1c6   :  { %v474_v47 = vmax.f32 %v457_v45, 0.0  ;;  %v475_v48 = vmax.f32 %v460_v46, 0.0 }
 0x1c8   :  { %480 = vst [vmem:[%s954_s5] sm:$0xff] %v474_v47 }
 0x1c9   :  { %481 = vst [vmem:[%s954_s5 + $0x8] sm:$0xff] %v475_v48 }
 0x1ca   :  { %v465_v52 = vpop.f32.mrf.mxu2  ;;  %v468_v53 = vpop.f32.mrf.mxu3 }
 0x1cb   :  { %v466_v54 = vadd.f32 %v465_v52, %v408_v50  ;;  %v469_v55 = vadd.f32 %v468_v53, %v413_v51  ;;  %v462_v56 = vpop.f32.mrf.mxu1 }
 0x1cc   :  { %v463_v57 = vadd.f32 %v462_v56, %v403_v17 }
 0x1cd   :  { %v477_v58 = vmax.f32 %v466_v54, 0.0  ;;  %v478_v59 = vmax.f32 %v469_v55, 0.0 }
 0x1ce   :  { %v476_v60 = vmax.f32 %v463_v57, 0.0 }
 0x1cf   :  { %483 = vst [vmem:[%s954_s5 + $0x18] sm:$0xff] %v477_v58 }
 0x1d0   :  { %484 = vst [vmem:[%s954_s5 + $0x20] sm:$0xff] %v478_v59 }
 0x1d1   :  { %482 = vst [vmem:[%s954_s5 + $0x10] sm:$0xff] %v476_v60 }
 0x1d2   :  { %v471_v2 = vpop.f32.mrf.mxu3 }
 0x1d3   :  { %v472_v3 = vadd.f32 %v471_v2, %v418_v63 }
 0x1d5   :  { %v479_v9 = vmax.f32 %v472_v3, 0.0 }
 0x1d7   :  { %485 = vst [vmem:[%s954_s5 + $0x28] sm:$0xff] %v479_v9 }

// kernel: exit_module_forward.7
= control target key start
LH: loop header
LB: loop body
LE: loop exit
PB: predicated region body
PF: predicated region fallthrough
CT: control target
= control target key end

     0   :  { %v757_v3 = vmov 0   ;;  %s758_s24 = smov 8   ;;  %s759_s17 = smov 7   ;;  %v760_v13 = vmov 1   ;;  %v762_v14 = vmov 2   ;;  %v764_v15 = vmov 3   ;;  %s1328_s0 = inlined_call_operand.vmem [shape: f32[48,128], index: 0, kind: input, shape index: {}]   ;;  %s1329_s2 = inlined_call_operand.vmem [shape: f32[48,9], index: 2, kind: input, shape index: {}]   ;;  %s1330_s1 = inlined_call_operand.vmem [shape: s32[2,128], index: 1, kind: input, shape index: {}]   ;;  %s1331_s4 = inlined_call_operand.vmem [shape: f32[64,1], index: 4, kind: input, shape index: {}]   ;;  %s1332_s3 = inlined_call_operand.vmem [shape: f32[64,48], index: 3, kind: input, shape index: {}]   ;;  %s1333_s5 = inlined_call_operand.vmem [shape: f32[64,128], index: 5, kind: output, shape index: {}]  }
   0x1   :  { %v807_v0 = vld [vmem:[%s1328_s0 + $0x20] sm:$0xff]  ;;  %v812_v1 = vld [vmem:[%s1328_s0 + $0x10] sm:$0xff]  ;;  %727 = vset.pattern.permute.xlu2 %v757_v3  ;;  %726 = vset.pattern.permute.xlu1 %v757_v3  ;;  %v828_v4 = vld [vmem:[%s1328_s0 + $0x28] sm:$0xff]  ;;  %s763_s18 = smov 1   ;;  %v765_v25 = vmov 4   ;;  %v767_v40 = vmov 5  }
   0x2   :  { %v817_v2 = vld [vmem:[%s1328_s0] sm:$0xff]  ;;  %46 = vrot.lane.b32.xlu2 %v807_v0, %s758_s24  ;;  %42 = vrot.lane.b32.xlu1 %v812_v1, %s758_s24  ;;  %v833_v5 = vld [vmem:[%s1328_s0 + $0x18] sm:$0xff]  ;;  %s768_s23 = smov 122   ;;  %v769_v63 = vmov 6   ;;  %s772_s25 = smov 120  }
   0x3   :  { %38 = vrot.lane.b32.xlu0 %v817_v2, %s758_s24  ;;  %v838_v6 = vld [vmem:[%s1328_s0 + $0x8] sm:$0xff]  ;;  %v846_v7 = vld [vmem:[%s1329_s2 + $0x10] sm:$0xff]  ;;  %v856_v9 = vld [vmem:[%s1329_s2] sm:$0xff] }
   0x4   :  { %725 = vset.pattern.permute.xlu0 %v757_v3  ;;  %v851_v8 = vld [vmem:[%s1329_s2 + $0x8] sm:$0xff]  ;;  %v864_v10 = vld [vmem:[%s1329_s2 + $0x20] sm:$0xff]  ;;  %v869_v11 = vld [vmem:[%s1329_s2 + $0x18] sm:$0xff] }
   0x5   :  { %v874_v12 = vld [vmem:[%s1329_s2 + $0x28] sm:$0xff]  ;;  %s761_s2 = smov 6   ;;  %v906_v17 = vld [vmem:[%s1330_s1] sm:$0x1]  ;;  %v911_v18 = vld [vmem:[%s1330_s1 + $0x1] sm:$0x1] }
   0x6   :  { %vm34_vm0 = vcmp.ge.s32.totalorder %v906_v17, 1  ;;  %vm35_vm1 = vcmp.ge.s32.totalorder %v911_v18, 1  ;;  %s766_s1 = smov 127   ;;  %vm37_vm5 = vcmp.lt.s32.totalorder %v911_v18, 6  ;;  %vm36_vm10 = vcmp.lt.s32.totalorder %v906_v17, 6 }
   0x7   :  { %vm50_vm2 = vmand %vm34_vm0, %vm35_vm1  ;;  %v114_v26 = vsel %vm34_vm0, 1, %v757_v3  ;;  %v229_v35 = vsel %vm35_vm1, 1, %v757_v3 }
   0x8   :  { %v51_v20 = vsel %vm50_vm2, 1, %v757_v3  ;;  %v115_v34 = vperm.slane %v114_v26, 0  ;;  %vm171_vm6 = vmand %vm34_vm0, %vm37_vm5  ;;  %vm596_vm0 = vcmask 392192  }
   0x9   :  { %v52_v22 = vperm.slane %v51_v20, 0  ;;  %v172_v57 = vsel %vm171_vm6, 1, %v757_v3  ;;  %vm379_vm11 = vmand %vm36_vm10, %vm35_vm1 }
   0xa   :  { %48 = vrot.lane.b32.xlu2 %v828_v4, %s758_s24  ;;  %44 = vrot.lane.b32.xlu1 %v833_v5, %s758_s24  ;;  %vm946_vm4 = vcmp.eq.s32.totalorder %v115_v34, 1  ;;  %vm494_vm13 = vmand %vm36_vm10, %vm37_vm5 }
   0xb   :  { %40 = vrot.lane.b32.xlu0 %v838_v6, %s758_s24  ;;  %vm926_vm3 = vcmp.eq.s32.totalorder %v52_v22, 1  ;;  %s770_s24 = smov 121  }
  0x12   :  { %72 = vperm.xlu2 %727, %v846_v7   ;;  %67 = vperm.xlu1 %726, %v851_v8  }
  0x13   :  { %62 = vperm.xlu0 %725, %v856_v9  }
  0x1a   :  { %82 = vperm.xlu2 %727, %v864_v10   ;;  %77 = vperm.xlu1 %726, %v869_v11  }
  0x1b   :  { %87 = vperm.xlu0 %725, %v874_v12  }
  0x22   :  { %104 = vrot.lane.b32.xlu2 %v838_v6, %s759_s17  ;;  %102 = vrot.lane.b32.xlu1 %v817_v2, %s759_s17 }
  0x23   :  { %106 = vrot.lane.b32.xlu0 %v812_v1, %s759_s17  ;;  %729 = vset.pattern.permute.xlu2 %v760_v13 }
  0x24   :  { %728 = vset.pattern.permute.xlu1 %v760_v13  ;;  %730 = vset.pattern.permute.xlu0 %v760_v13 }
  0x2a   :  { %110 = vrot.lane.b32.xlu2 %v807_v0, %s759_s17  ;;  %108 = vrot.lane.b32.xlu1 %v833_v5, %s759_s17 }
  0x2b   :  { %112 = vrot.lane.b32.xlu0 %v828_v4, %s759_s17 }
  0x32   :  { %128 = vperm.xlu2 %729, %v851_v8   ;;  %124 = vperm.xlu1 %728, %v856_v9  }
  0x33   :  { %132 = vperm.xlu0 %730, %v846_v7  }
  0x3a   :  { %140 = vperm.xlu2 %729, %v864_v10   ;;  %136 = vperm.xlu1 %728, %v869_v11  }
  0x3b   :  { %161 = vrot.lane.b32.xlu0 %v838_v6, %s761_s2 }
  0x3c   :  { %732 = vset.pattern.permute.xlu0 %v762_v14 }
  0x42   :  { %159 = vrot.lane.b32.xlu2 %v817_v2, %s761_s2  ;;  %144 = vperm.xlu1 %728, %v874_v12  }
  0x43   :  { %167 = vrot.lane.b32.xlu0 %v807_v0, %s761_s2  ;;  %731 = vset.pattern.permute.xlu2 %v762_v14 }
  0x4a   :  { %165 = vrot.lane.b32.xlu2 %v833_v5, %s761_s2  ;;  %163 = vrot.lane.b32.xlu1 %v812_v1, %s761_s2 }
  0x4b   :  { %186 = vperm.xlu0 %732, %v851_v8   ;;  %733 = vset.pattern.permute.xlu1 %v762_v14  ;;  %v173_v14 = vperm.slane %v172_v57, 0 }
  0x4d   :  { %vm990_vm7 = vcmp.eq.s32.totalorder %v173_v14, 1 }
  0x52   :  { %182 = vperm.xlu2 %731, %v856_v9   ;;  %169 = vrot.lane.b32.xlu1 %v828_v4, %s761_s2 }
  0x53   :  { %217 = vrot.lane.b32.xlu0 %v817_v2, %s763_s18 }
  0x54   :  { %734 = vset.pattern.permute.xlu0 %v764_v15 }
  0x5a   :  { %194 = vperm.xlu2 %731, %v869_v11   ;;  %190 = vperm.xlu1 %733, %v846_v7  }
  0x5b   :  { %223 = vrot.lane.b32.xlu0 %v833_v5, %s763_s18 }
  0x5c   :  { %v47_v16 = vpop.permute.xlu2 %46 }
  0x5d   :  { %v58_v24 = vsel %vm926_vm3, %v47_v16, 0.0 }
  0x62   :  { %202 = vperm.xlu2 %731, %v874_v12   ;;  %198 = vperm.xlu1 %733, %v864_v10  }
  0x63   :  { %239 = vperm.xlu0 %734, %v856_v9  }
  0x64   :  { %v49_v19 = vpop.permute.xlu2 %48 }
  0x65   :  { %v59_v50 = vsel %vm926_vm3, %v49_v19, 0.0 }
  0x6a   :  { %221 = vrot.lane.b32.xlu2 %v812_v1, %s763_s18  ;;  %219 = vrot.lane.b32.xlu1 %v838_v6, %s763_s18 }
  0x6b   :  { %259 = vperm.xlu0 %734, %v874_v12   ;;  %736 = vset.pattern.permute.xlu2 %v764_v15 }
  0x6c   :  { %v73_v21 = vpop.permute.xlu2 %72  ;;  %735 = vset.pattern.permute.xlu1 %v764_v15 }
  0x72   :  { %227 = vrot.lane.b32.xlu2 %v828_v4, %s763_s18  ;;  %225 = vrot.lane.b32.xlu1 %v807_v0, %s763_s18 }
  0x73   :  { %739 = vset.pattern.permute.xlu0 %v765_v25 }
  0x74   :  { %283 = vperm.xlu0 %739, %v846_v7   ;;  %v83_v27 = vpop.permute.xlu2 %82  ;;  %v43_v28 = vpop.permute.xlu1 %42 }
  0x75   :  { %v94_v29 = vmul.f32 %v83_v27, %v58_v24  ;;  %v56_v30 = vsel %vm926_vm3, %v43_v28, 0.0  ;;  %v39_v31 = vpop.permute.xlu0 %38 }
  0x76   :  { %v940_v32 = vmul.f32 %v73_v21, %v56_v30  ;;  %v54_v33 = vsel %vm926_vm3, %v39_v31, 0.0 }
  0x7a   :  { %247 = vperm.xlu2 %736, %v846_v7   ;;  %243 = vperm.xlu1 %735, %v851_v8  }
  0x7c   :  { %312 = vrot.lane.b32.xlu0 %v838_v6, %s766_s1  ;;  %v45_v36 = vpop.permute.xlu1 %44  ;;  %v105_v37 = vpop.permute.xlu2 %104 }
  0x7d   :  { %v118_v38 = vsel %vm946_vm4, %v105_v37, 0.0  ;;  %v41_v39 = vpop.permute.xlu0 %40  ;;  %741 = vset.pattern.permute.xlu0 %v767_v40  ;;  %v57_v47 = vsel %vm926_vm3, %v45_v36, 0.0 }
  0x7e   :  { %v55_v41 = vsel %vm926_vm3, %v41_v39, 0.0 }
  0x82   :  { %255 = vperm.xlu2 %736, %v864_v10   ;;  %251 = vperm.xlu1 %735, %v869_v11  }
  0x84   :  { %318 = vrot.lane.b32.xlu0 %v807_v0, %s766_s1  ;;  %v68_v42 = vpop.permute.xlu1 %67  ;;  %v111_v43 = vpop.permute.xlu2 %110 }
  0x85   :  { %v91_v44 = vmul.f32 %v68_v42, %v55_v41  ;;  %v63_v45 = vpop.permute.xlu0 %62  ;;  %v121_v56 = vsel %vm946_vm4, %v111_v43, 0.0 }
  0x86   :  { %v90_v46 = vmul.f32 %v63_v45, %v54_v33 }
  0x8a   :  { %738 = vset.pattern.permute.xlu2 %v765_v25  ;;  %737 = vset.pattern.permute.xlu1 %v765_v25 }
  0x8b   :  { %279 = vperm.xlu2 %738, %v851_v8   ;;  %275 = vperm.xlu1 %737, %v856_v9  }
  0x8c   :  { %336 = vperm.xlu0 %741, %v851_v8   ;;  %v78_v48 = vpop.permute.xlu1 %77  ;;  %v129_v49 = vpop.permute.xlu2 %128 }
  0x8d   :  { %v93_v51 = vmul.f32 %v78_v48, %v57_v47  ;;  %v148_v52 = vmul.f32 %v129_v49, %v118_v38  ;;  %v88_v53 = vpop.permute.xlu0 %87 }
  0x8e   :  { %v968_v54 = vmul.f32 %v88_v53, %v59_v50 }
  0x8f   :  { %v970_v55 = vadd.f32 %v148_v52, %v91_v44 }
  0x93   :  { %291 = vperm.xlu2 %738, %v864_v10   ;;  %287 = vperm.xlu1 %737, %v869_v11  }
  0x94   :  { %367 = vrot.lane.b32.xlu0 %v817_v2, %s768_s23  ;;  %v141_v58 = vpop.permute.xlu2 %140  ;;  %v103_v59 = vpop.permute.xlu1 %102 }
  0x95   :  { %v151_v60 = vmul.f32 %v141_v58, %v121_v56  ;;  %v117_v61 = vsel %vm946_vm4, %v103_v59, 0.0  ;;  %v107_v62 = vpop.permute.xlu0 %106  ;;  %745 = vset.pattern.permute.xlu0 %v769_v63  ;;  %v230_v56 = vperm.slane %v229_v35, 0 }
  0x96   :  { %v119_v13 = vsel %vm946_vm4, %v107_v62, 0.0  ;;  %v771_v62 = vmov 7  }
  0x97   :  { %v988_v15 = vadd.f32 %v151_v60, %v94_v29  ;;  %vm1038_vm8 = vcmp.eq.s32.totalorder %v230_v56, 1 }
  0x9b   :  { %310 = vrot.lane.b32.xlu2 %v817_v2, %s766_s1  ;;  %295 = vperm.xlu1 %737, %v874_v12  }
  0x9c   :  { %377 = vrot.lane.b32.xlu0 %v828_v4, %s768_s23  ;;  %v160_v19 = vpop.permute.xlu2 %159  ;;  %v109_v20 = vpop.permute.xlu1 %108  ;;  %740 = vset.pattern.permute.xlu2 %v767_v40 }
  0x9d   :  { %v175_v21 = vsel %vm990_vm7, %v160_v19, 0.0  ;;  %v113_v22 = vpop.permute.xlu0 %112  ;;  %v120_v30 = vsel %vm946_vm4, %v109_v20, 0.0 }
  0xa3   :  { %316 = vrot.lane.b32.xlu2 %v833_v5, %s766_s1  ;;  %314 = vrot.lane.b32.xlu1 %v812_v1, %s766_s1 }
  0xa4   :  { %435 = vrot.lane.b32.xlu0 %v828_v4, %s770_s24  ;;  %v166_v23 = vpop.permute.xlu2 %165  ;;  %v125_v24 = vpop.permute.xlu1 %124  ;;  %742 = vset.pattern.permute.xlu1 %v767_v40  ;;  %v122_v40 = vsel %vm946_vm4, %v113_v22, 0.0 }
  0xa5   :  { %v147_v25 = vmul.f32 %v125_v24, %v117_v61  ;;  %v133_v26 = vpop.permute.xlu0 %132  ;;  %v178_v41 = vsel %vm990_vm7, %v166_v23, 0.0 }
  0xa6   :  { %v149_v27 = vmul.f32 %v133_v26, %v119_v13 }
  0xa7   :  { %v153_v28 = vadd.f32 %v147_v25, %v90_v46 }
  0xa8   :  { %v155_v29 = vadd.f32 %v149_v27, %v940_v32 }
  0xab   :  { %332 = vperm.xlu2 %740, %v856_v9   ;;  %320 = vrot.lane.b32.xlu1 %v828_v4, %s766_s1 }
  0xac   :  { %373 = vrot.lane.b32.xlu0 %v833_v5, %s768_s23  ;;  %v183_v31 = vpop.permute.xlu2 %182  ;;  %v137_v33 = vpop.permute.xlu1 %136 }
  0xad   :  { %v205_v34 = vmul.f32 %v183_v31, %v175_v21  ;;  %v150_v36 = vmul.f32 %v137_v33, %v120_v30  ;;  %v162_v37 = vpop.permute.xlu0 %161 }
  0xae   :  { %v176_v38 = vsel %vm990_vm7, %v162_v37, 0.0 }
  0xaf   :  { %v211_v32 = vadd.f32 %v205_v34, %v153_v28  ;;  %v156_v39 = vadd.f32 %v150_v36, %v93_v51 }
  0xb3   :  { %344 = vperm.xlu2 %740, %v869_v11   ;;  %340 = vperm.xlu1 %742, %v846_v7  }
  0xb4   :  { %402 = vperm.xlu0 %745, %v869_v11   ;;  %v195_v42 = vpop.permute.xlu2 %194  ;;  %v145_v43 = vpop.permute.xlu1 %144 }
  0xb5   :  { %v208_v44 = vmul.f32 %v195_v42, %v178_v41  ;;  %v152_v45 = vmul.f32 %v145_v43, %v122_v40  ;;  %v168_v46 = vpop.permute.xlu0 %167 }
  0xb6   :  { %v179_v25 = vsel %vm990_vm7, %v168_v46, 0.0 }
  0xb7   :  { %v1024_v47 = vadd.f32 %v208_v44, %v156_v39  ;;  %v158_v48 = vadd.f32 %v152_v45, %v968_v54  ;;  %v773_v39 = vmov 8   ;;  %v322_v45 = vsel %vm37_vm5, 1, %v757_v3 }
  0xbb   :  { %352 = vperm.xlu2 %740, %v874_v12   ;;  %348 = vperm.xlu1 %742, %v864_v10  }
  0xbc   :  { %398 = vperm.xlu0 %745, %v846_v7   ;;  %v203_v49 = vpop.permute.xlu2 %202  ;;  %v164_v50 = vpop.permute.xlu1 %163 }
  0xbd   :  { %v177_v51 = vsel %vm990_vm7, %v164_v50, 0.0  ;;  %v187_v52 = vpop.permute.xlu0 %186 }
  0xbe   :  { %v206_v53 = vmul.f32 %v187_v52, %v176_v38 }
  0xc0   :  { %v1036_v54 = vadd.f32 %v206_v53, %v970_v55 }
  0xc3   :  { %371 = vrot.lane.b32.xlu2 %v812_v1, %s768_s23  ;;  %369 = vrot.lane.b32.xlu1 %v838_v6, %s768_s23 }
  0xc4   :  { %429 = vrot.lane.b32.xlu0 %v812_v1, %s770_s24  ;;  %v222_v58 = vpop.permute.xlu2 %221  ;;  %v170_v59 = vpop.permute.xlu1 %169  ;;  %743 = vset.pattern.permute.xlu1 %v769_v63 }
  0xc5   :  { %v234_v55 = vsel %vm1038_vm8, %v222_v58, 0.0  ;;  %v180_v60 = vsel %vm990_vm7, %v170_v59, 0.0  ;;  %v218_v61 = vpop.permute.xlu0 %217  ;;  %749 = vset.pattern.permute.xlu0 %v771_v62  ;;  %744 = vset.pattern.permute.xlu2 %v771_v62 }
  0xc6   :  { %v210_v13 = vmul.f32 %v203_v49, %v180_v60  ;;  %v232_v14 = vsel %vm1038_vm8, %v218_v61, 0.0 }
  0xc8   :  { %v216_v19 = vadd.f32 %v210_v13, %v158_v48 }
  0xcb   :  { %375 = vrot.lane.b32.xlu2 %v807_v0, %s768_s23  ;;  %410 = vperm.xlu1 %743, %v874_v12  }
  0xcc   :  { %455 = vperm.xlu0 %749, %v846_v7   ;;  %v228_v20 = vpop.permute.xlu2 %227  ;;  %v191_v21 = vpop.permute.xlu1 %190 }
  0xcd   :  { %v207_v22 = vmul.f32 %v191_v21, %v177_v51  ;;  %v224_v23 = vpop.permute.xlu0 %223  ;;  %v237_v16 = vsel %vm1038_vm8, %v228_v20, 0.0 }
  0xcf   :  { %v213_v24 = vadd.f32 %v207_v22, %v155_v29 }
  0xd3   :  { %467 = vperm.xlu2 %744, %v874_v12   ;;  %406 = vperm.xlu1 %743, %v864_v10  }
  0xd4   :  { %v248_v26 = vpop.permute.xlu2 %247  ;;  %v199_v27 = vpop.permute.xlu1 %198  ;;  %451 = vperm.xlu0 %749, %v851_v8  }
  0xd5   :  { %v264_v28 = vmul.f32 %v248_v26, %v234_v55  ;;  %v209_v30 = vmul.f32 %v199_v27, %v179_v25  ;;  %v240_v31 = vpop.permute.xlu0 %239 }
  0xd6   :  { %v262_v33 = vmul.f32 %v240_v31, %v232_v14 }
  0xd7   :  { %v270_v34 = vadd.f32 %v264_v28, %v213_v24  ;;  %v215_v36 = vadd.f32 %v209_v30, %v988_v15 }
  0xd8   :  { %v1067_v37 = vadd.f32 %v262_v33, %v211_v32 }
  0xdb   :  { %492 = vrot.lane.b32.xlu2 %v828_v4, %s772_s25  ;;  %433 = vrot.lane.b32.xlu1 %v807_v0, %s770_s24 }
  0xdc   :  { %v220_v29 = vpop.permute.xlu1 %219  ;;  %v256_v38 = vpop.permute.xlu2 %255  ;;  %747 = vset.pattern.permute.xlu2 %v773_v39  ;;  %746 = vset.pattern.permute.xlu1 %v771_v62 }
  0xdd   :  { %v233_v15 = vsel %vm1038_vm8, %v220_v29, 0.0  ;;  %v260_v32 = vpop.permute.xlu0 %259  ;;  %484 = vrot.lane.b32.xlu0 %v838_v6, %s772_s25 }
  0xde   :  { %v267_v40 = vmul.f32 %v260_v32, %v237_v16  ;;  %755 = vset.pattern.permute.xlu0 %v757_v3 }
  0xe0   :  { %v1082_v41 = vadd.f32 %v267_v40, %v216_v19  ;;  %v235_v19 = vsel %vm1038_vm8, %v224_v23, 0.0 }
  0xe3   :  { %525 = vperm.xlu2 %747, %v874_v12   ;;  %463 = vperm.xlu1 %746, %v864_v10   ;;  %v323_v12 = vperm.slane %v322_v45, 0 }
  0xe4   :  { %v226_v42 = vpop.permute.xlu1 %225 }
  0xe5   :  { %v236_v43 = vsel %vm1038_vm8, %v226_v42, 0.0  ;;  %v280_v44 = vpop.permute.xlu2 %279  ;;  %482 = vrot.lane.b32.xlu0 %v817_v2, %s772_s25  ;;  %vm1100_vm9 = vcmp.eq.s32.totalorder %v323_v12, 1 }
  0xe6   :  { %v266_v46 = vmul.f32 %v256_v38, %v236_v43  ;;  %v284_v48 = vpop.permute.xlu0 %283  ;;  %v299_v53 = vmul.f32 %v280_v44, %v838_v6 }
  0xe7   :  { %v300_v35 = vmul.f32 %v284_v48, %v812_v1 }
  0xe8   :  { %v272_v49 = vadd.f32 %v266_v46, %v215_v36 }
  0xe9   :  { %v1094_v50 = vadd.f32 %v300_v35, %v270_v34 }
  0xeb   :  { %490 = vrot.lane.b32.xlu2 %v807_v0, %s772_s25  ;;  %431 = vrot.lane.b32.xlu1 %v833_v5, %s770_s24 }
  0xec   :  { %v244_v51 = vpop.permute.xlu1 %243 }
  0xed   :  { %v263_v56 = vmul.f32 %v244_v51, %v233_v15  ;;  %v292_v58 = vpop.permute.xlu2 %291 }
  0xee   :  { %v302_v59 = vmul.f32 %v292_v58, %v807_v0  ;;  %v313_v55 = vpop.permute.xlu0 %312  ;;  %v495_v58 = vsel %vm494_vm13, 1, %v757_v3 }
  0xef   :  { %v269_v60 = vadd.f32 %v263_v56, %v1036_v54  ;;  %v326_v61 = vsel %vm1100_vm9, %v313_v55, 0.0 }
  0xf0   :  { %v1109_v13 = vadd.f32 %v302_v59, %v272_v49 }
  0xf1   :  { %v305_v14 = vadd.f32 %v299_v53, %v269_v60 }
  0xf3   :  { %521 = vperm.xlu2 %747, %v864_v10   ;;  %459 = vperm.xlu1 %746, %v869_v11  }
  0xf4   :  { %v252_v20 = vpop.permute.xlu1 %251 }
  0xf5   :  { %v265_v21 = vmul.f32 %v252_v20, %v235_v19  ;;  %v311_v22 = vpop.permute.xlu2 %310  ;;  %v540_v19 = vld [vmem:[%s1332_s3] sm:$0xff]  ;;  %v542_v20 = vld [vmem:[%s1332_s3 + $0x10] sm:$0xff] }
  0xf6   :  { %v325_v0 = vsel %vm1100_vm9, %v311_v22, 0.0  ;;  %v1117_v54 = vpop.permute.xlu0 %318 }
  0xf7   :  { %v271_v24 = vadd.f32 %v265_v21, %v1024_v47 }
  0xfb   :  { %748 = vset.pattern.permute.xlu2 %v769_v63  ;;  %488 = vrot.lane.b32.xlu1 %v833_v5, %s772_s25  ;;  %v380_v63 = vsel %vm379_vm11, 1, %v757_v3 }
  0xfc   :  { %394 = vperm.xlu2 %748, %v851_v8   ;;  %750 = vset.pattern.permute.xlu1 %v773_v39  ;;  %v381_v28 = vperm.slane %v380_v63, 0 }
  0xfd   :  { %v317_v10 = vpop.permute.xlu2 %316  ;;  %v276_v57 = vpop.permute.xlu1 %275 }
  0xfe   :  { %v298_v47 = vmul.f32 %v276_v57, %v817_v2  ;;  %v337_v23 = vpop.permute.xlu0 %336  ;;  %vm1139_vm12 = vcmp.eq.s32.totalorder %v381_v28, 1 }
  0xff   :  { %v356_v25 = vmul.f32 %v337_v23, %v326_v61  ;;  %v496_v61 = vperm.slane %v495_v58, 0  ;;  %v550_v58 = vld [vmem:[%s1331_s4 + $0x10] sm:$0xff] }
 0x100   :  { %v304_v26 = vadd.f32 %v298_v47, %v1067_v37 }
 0x101   :  { %v1133_v27 = vadd.f32 %v356_v25, %v305_v14  ;;  %vm1196_vm15 = vcmp.eq.s32.totalorder %v496_v61, 1 }
 0x103   :  { %517 = vperm.xlu1 %750, %v869_v11  }
 0x104   :  { %427 = vrot.lane.b32.xlu2 %v838_v6, %s770_s24  ;;  %v328_v6 = vsel %vm1100_vm9, %v317_v10, 0.0 }
 0x105   :  { %v333_v30 = vpop.permute.xlu2 %332  ;;  %v288_v31 = vpop.permute.xlu1 %287 }
 0x106   :  { %v355_v33 = vmul.f32 %v333_v30, %v325_v0  ;;  %v301_v34 = vmul.f32 %v288_v31, %v833_v5  ;;  %v1143_v16 = vpop.permute.xlu0 %367 }
 0x107   :  { %v383_v37 = vsel %vm1139_vm12, %v1143_v16, 0.0 }
 0x108   :  { %v1148_v29 = vadd.f32 %v355_v33, %v304_v26  ;;  %v307_v11 = vadd.f32 %v301_v34, %v271_v24 }
 0x10b   :  { %486 = vrot.lane.b32.xlu1 %v812_v1, %s772_s25 }
 0x10c   :  { %390 = vperm.xlu2 %748, %v856_v9  }
 0x10d   :  { %v345_v5 = vpop.permute.xlu2 %344  ;;  %v296_v38 = vpop.permute.xlu1 %295 }
 0x10e   :  { %v358_v15 = vmul.f32 %v345_v5, %v328_v6  ;;  %v378_v32 = vpop.permute.xlu0 %377  ;;  %v303_v14 = vmul.f32 %v296_v38, %v828_v4 }
 0x110   :  { %v1155_v40 = vadd.f32 %v358_v15, %v307_v11  ;;  %v309_v22 = vadd.f32 %v303_v14, %v1082_v41  ;;  %v329_v41 = vsel %vm1100_vm9, %v1117_v54, 0.0 }
 0x113   :  { %513 = vperm.xlu1 %750, %v846_v7  }
 0x114   :  { %425 = vrot.lane.b32.xlu2 %v817_v2, %s770_s24 }
 0x115   :  { %v315_v42 = vpop.permute.xlu1 %314  ;;  %v353_v43 = vpop.permute.xlu2 %352  ;;  %752 = vset.pattern.permute.xlu2 %v773_v39 }
 0x116   :  { %v327_v1 = vsel %vm1100_vm9, %v315_v42, 0.0  ;;  %v436_v44 = vpop.permute.xlu0 %435 }
 0x11b   :  { %751 = vset.pattern.permute.xlu1 %v771_v62 }
 0x11c   :  { %509 = vperm.xlu2 %752, %v851_v8   ;;  %447 = vperm.xlu1 %751, %v856_v9  }
 0x11d   :  { %v321_v45 = vpop.permute.xlu1 %320  ;;  %v372_v46 = vpop.permute.xlu2 %371 }
 0x11e   :  { %v1166_v7 = vpop.permute.xlu0 %373  ;;  %v385_v2 = vsel %vm1139_vm12, %v372_v46, 0.0  ;;  %v330_v18 = vsel %vm1100_vm9, %v321_v45, 0.0 }
 0x11f   :  { %v360_v17 = vmul.f32 %v353_v43, %v330_v18 }
 0x121   :  { %v366_v10 = vadd.f32 %v360_v17, %v309_v22 }
 0x124   :  { %753 = vset.pattern.permute.xlu1 %v773_v39  ;;  %754 = vset.pattern.permute.xlu2 %v757_v3 }
 0x125   :  { %505 = vperm.xlu1 %753, %v856_v9   ;;  %v341_v48 = vpop.permute.xlu1 %340  ;;  %v376_v35 = vpop.permute.xlu2 %375  ;;  %v437_v9 = vsel %vm36_vm10, 1, %v757_v3 }
 0x126   :  { %v357_v62 = vmul.f32 %v341_v48, %v327_v1  ;;  %v1173_v49 = vpop.permute.xlu0 %402  ;;  %v438_v55 = vperm.slane %v437_v9, 0  ;;  %v387_v34 = vsel %vm1139_vm12, %v376_v35, 0.0 }
 0x128   :  { %v363_v8 = vadd.f32 %v357_v62, %v1094_v50  ;;  %vm1192_vm14 = vcmp.eq.s32.totalorder %v438_v55, 1 }
 0x129   :  { %v445_v21 = vsel %vm1192_vm14, %v436_v44, 0.0 }
 0x12d   :  { %v349_v12 = vpop.permute.xlu1 %348  ;;  %v468_v51 = vpop.permute.xlu2 %467  ;;  %756 = vset.pattern.permute.xlu1 %v757_v3  ;;  %v388_v3 = vsel %vm1139_vm12, %v378_v32, 0.0 }
 0x12e   :  { %v399_v53 = vpop.permute.xlu0 %398  ;;  %v475_v57 = vmul.f32 %v468_v51, %v445_v21  ;;  %v359_v11 = vmul.f32 %v349_v12, %v329_v41  ;;  %568 = vperm.xlu1 %756, %v550_v58   ;;  %v551_v41 = vld [vmem:[%s1331_s4 + $0x18] sm:$0xff] }
 0x12f   :  { %v415_v56 = vmul.f32 %v399_v53, %v385_v2 }
 0x130   :  { %v365_v38 = vadd.f32 %v359_v11, %v1109_v13 }
 0x131   :  { %v1181_v39 = vadd.f32 %v415_v56, %v363_v8 }
 0x135   :  { %v370_v50 = vpop.permute.xlu1 %369  ;;  %v493_v59 = vpop.permute.xlu2 %492 }
 0x136   :  { %v384_v60 = vsel %vm1139_vm12, %v370_v50, 0.0  ;;  %v503_v4 = vsel %vm1196_vm15, %v493_v59, 0.0  ;;  %v430_v35 = vpop.permute.xlu0 %429 }
 0x137   :  { %v442_v61 = vsel %vm1192_vm14, %v430_v35, 0.0 }
 0x13d   :  { %v411_v0 = vpop.permute.xlu1 %410  ;;  %v526_v24 = vpop.permute.xlu2 %525 }
 0x13e   :  { %v418_v47 = vmul.f32 %v411_v0, %v388_v3  ;;  %v533_v25 = vmul.f32 %v526_v24, %v503_v4  ;;  %v456_v56 = vpop.permute.xlu0 %455 }
 0x13f   :  { %v472_v17 = vmul.f32 %v456_v56, %v442_v61 }
 0x140   :  { %v424_v23 = vadd.f32 %v418_v47, %v366_v10  ;;  %v555_v47 = vld [vmem:[%s1331_s4 + $0x38] sm:$0xff] }
 0x141   :  { %v478_v24 = vadd.f32 %v472_v17, %v1181_v39 }
 0x142   :  { %v481_v63 = vadd.f32 %v475_v57, %v424_v23  ;;  %v549_v23 = vld [vmem:[%s1331_s4 + $0x8] sm:$0xff] }
 0x143   :  { %563 = vperm.xlu0 %755, %v549_v23  }
 0x144   :  { %v539_v26 = vadd.f32 %v533_v25, %v481_v63  ;;  %v548_v25 = vld [vmem:[%s1331_s4] sm:$0xff] }
 0x145   :  { %v407_v28 = vpop.permute.xlu1 %406  ;;  %v491_v30 = vpop.permute.xlu2 %490  ;;  %558 = vperm.xlu2 %754, %v548_v25  }
 0x146   :  { %631 = vmatpush.msra.mxu0 %v539_v26  ;;  %690 = vmatpush.msra.mxu1 %v539_v26  ;;  %v417_v6 = vmul.f32 %v407_v28, %v387_v34  ;;  %v502_v5 = vsel %vm1196_vm15, %v491_v30, 0.0  ;;  %v452_v59 = vpop.permute.xlu0 %451  ;;  %v554_v28 = vld [vmem:[%s1331_s4 + $0x30] sm:$0xff] }
 0x147   :  { %691 = vmatpush.msra.mxu2 %v539_v26  ;;  %692 = vmatpush.msra.mxu3 %v539_v26 }
 0x148   :  { %v423_v42 = vadd.f32 %v417_v6, %v365_v38  ;;  %v553_v6 = vld [vmem:[%s1331_s4 + $0x28] sm:$0xff] }
 0x14b   :  { %588 = vperm.xlu0 %755, %v554_v28  }
 0x14d   :  { %v434_v31 = vpop.permute.xlu1 %433  ;;  %v522_v33 = vpop.permute.xlu2 %521  ;;  %573 = vperm.xlu2 %754, %v551_v41  }
 0x14e   :  { %v444_v15 = vsel %vm1192_vm14, %v434_v31, 0.0  ;;  %v532_v43 = vmul.f32 %v522_v33, %v502_v5 }
 0x14f   :  { %v485_v18 = vpop.permute.xlu0 %484 }
 0x150   :  { %v499_v3 = vsel %vm1196_vm15, %v485_v18, 0.0 }
 0x155   :  { %v464_v32 = vpop.permute.xlu1 %463  ;;  %583 = vperm.xlu2 %754, %v553_v6  }
 0x156   :  { %v474_v52 = vmul.f32 %v464_v32, %v444_v15  ;;  %v395_v54 = vpop.permute.xlu2 %394 }
 0x157   :  { %v414_v1 = vmul.f32 %v395_v54, %v384_v60  ;;  %v483_v33 = vpop.permute.xlu0 %482  ;;  %v543_v54 = vld [vmem:[%s1332_s3 + $0x18] sm:$0xff] }
 0x158   :  { %v480_v44 = vadd.f32 %v474_v52, %v423_v42  ;;  %v498_v11 = vsel %vm1196_vm15, %v483_v33, 0.0  ;;  %v544_v42 = vld [vmem:[%s1332_s3 + $0x20] sm:$0xff]  ;;  %v541_v52 = vld [vmem:[%s1332_s3 + $0x8] sm:$0xff] }
 0x159   :  { %v420_v45 = vadd.f32 %v414_v1, %v1133_v27  ;;  %v386_v27 = vsel %vm1139_vm12, %v1166_v7, 0.0  ;;  %v545_v1 = vld [vmem:[%s1332_s3 + $0x28] sm:$0xff] }
 0x15a   :  { %v538_v46 = vadd.f32 %v532_v43, %v480_v44  ;;  %v416_v53 = vmul.f32 %v1173_v49, %v386_v27  ;;  %v546_v43 = vld [vmem:[%s1332_s3 + $0x30] sm:$0xff]  ;;  %v547_v44 = vld [vmem:[%s1332_s3 + $0x38] sm:$0xff] }
 0x15c   :  { %632 = vmatpush.msra.mxu0 %v538_v46  ;;  %693 = vmatpush.msra.mxu1 %v538_v46 }
 0x15d   :  { %694 = vmatpush.msra.mxu2 %v538_v46  ;;  %695 = vmatpush.msra.mxu3 %v538_v46  ;;  %v432_v2 = vpop.permute.xlu1 %431 }
 0x15e   :  { %v428_v48 = vpop.permute.xlu2 %427  ;;  %v443_v9 = vsel %vm1192_vm14, %v432_v2, 0.0 }
 0x15f   :  { %v441_v14 = vsel %vm1192_vm14, %v428_v48, 0.0 }
 0x160   :  { %v471_v22 = vmul.f32 %v452_v59, %v441_v14 }
 0x162   :  { %v477_v63 = vadd.f32 %v471_v22, %v420_v45 }
 0x165   :  { %v460_v13 = vpop.permute.xlu1 %459 }
 0x166   :  { %v391_v62 = vpop.permute.xlu2 %390  ;;  %v473_v16 = vmul.f32 %v460_v13, %v443_v9 }
 0x167   :  { %v413_v8 = vmul.f32 %v391_v62, %v383_v37  ;;  %v422_v37 = vadd.f32 %v416_v53, %v1155_v40  ;;  %v552_v40 = vld [vmem:[%s1331_s4 + $0x20] sm:$0xff] }
 0x168   :  { %578 = vperm.xlu1 %756, %v552_v40  }
 0x169   :  { %v1223_v12 = vadd.f32 %v413_v8, %v1148_v29  ;;  %v479_v7 = vadd.f32 %v473_v16, %v422_v37 }
 0x16d   :  { %v489_v51 = vpop.permute.xlu1 %488 }
 0x16e   :  { %v501_v29 = vsel %vm1196_vm15, %v489_v51, 0.0  ;;  %v426_v55 = vpop.permute.xlu2 %425 }
 0x16f   :  { %v440_v31 = vsel %vm1192_vm14, %v426_v55, 0.0 }
 0x170   :  { %593 = vperm.xlu1 %756, %v555_v47  }
 0x175   :  { %v518_v36 = vpop.permute.xlu1 %517 }
 0x176   :  { %v531_v50 = vmul.f32 %v518_v36, %v501_v29  ;;  %v510_v21 = vpop.permute.xlu2 %509 }
 0x177   :  { %v529_v10 = vmul.f32 %v510_v21, %v499_v3 }
 0x178   :  { %v537_v49 = vadd.f32 %v531_v50, %v479_v7 }
 0x179   :  { %v535_v39 = vadd.f32 %v529_v10, %v477_v63 }
 0x17a   :  { %633 = vmatpush.msra.mxu0 %v537_v49  ;;  %696 = vmatpush.msra.mxu1 %v537_v49 }
 0x17b   :  { %697 = vmatpush.msra.mxu2 %v537_v49  ;;  %698 = vmatpush.msra.mxu3 %v537_v49 }
 0x17d   :  { %v487_v60 = vpop.permute.xlu1 %486 }
 0x17e   :  { %v500_v4 = vsel %vm1196_vm15, %v487_v60, 0.0 }
 0x185   :  { %v514_v0 = vpop.permute.xlu1 %513 }
 0x186   :  { %v530_v57 = vmul.f32 %v514_v0, %v500_v4 }
 0x188   :  { %v536_v26 = vadd.f32 %v530_v57, %v478_v24 }
 0x18a   :  { %634 = vmatpush.msra.mxu0 %v536_v26  ;;  %699 = vmatpush.msra.mxu1 %v536_v26 }
 0x18b   :  { %700 = vmatpush.msra.mxu2 %v536_v26  ;;  %701 = vmatpush.msra.mxu3 %v536_v26 }
 0x18c   :  { %635 = vmatpush.msra.mxu0 %v535_v39  ;;  %702 = vmatpush.msra.mxu1 %v535_v39 }
 0x18d   :  { %703 = vmatpush.msra.mxu2 %v535_v39  ;;  %704 = vmatpush.msra.mxu3 %v535_v39 }
 0x18e   :  { %v448_v30 = vpop.permute.xlu1 %447 }
 0x18f   :  { %v470_v34 = vmul.f32 %v448_v30, %v440_v31 }
 0x191   :  { %v476_v38 = vadd.f32 %v470_v34, %v1223_v12 }
 0x197   :  { %v506_v5 = vpop.permute.xlu1 %505 }
 0x198   :  { %v528_v15 = vmul.f32 %v506_v5, %v498_v11 }
 0x19a   :  { %v534_v32 = vadd.f32 %v528_v15, %v476_v38 }
 0x19c   :  { %636 = vmatpush.msra.mxu0 %v534_v32  ;;  %705 = vmatpush.msra.mxu1 %v534_v32 }
 0x19d   :  { %706 = vmatpush.msra.mxu2 %v534_v32  ;;  %707 = vmatpush.msra.mxu3 %v534_v32 }
 0x19e   :  { %682 = vmatmul.msk.f32.vlgmr.msra.gmra.mxu0 %vm596_vm0, %v540_v19  ;;  %684 = vmatmul.msk.f32.vlgmr.msra.gmra.mxu1 %vm596_vm0, %v542_v20 }
 0x19f   :  { %686 = vmatmul.msk.f32.vlgmr.msra.gmra.mxu2 %vm596_vm0, %v544_v42  ;;  %688 = vmatmul.msk.f32.vlgmr.msra.gmra.mxu3 %vm596_vm0, %v546_v43  ;;  %v559_v45 = vpop.permute.xlu2 %558 }
 0x1a0   :  { %v569_v46 = vpop.permute.xlu1 %568 }
 0x1a6   :  { %683 = vmatmul.msk.f32.gmra.mxu0 %vm596_vm0, %v541_v52  ;;  %685 = vmatmul.msk.f32.gmra.mxu1 %vm596_vm0, %v543_v54 }
 0x1a7   :  { %687 = vmatmul.msk.f32.gmra.mxu2 %vm596_vm0, %v545_v1  ;;  %689 = vmatmul.msk.f32.gmra.mxu3 %vm596_vm0, %v547_v44  ;;  %v574_v27 = vpop.permute.xlu2 %573 }
 0x1af   :  { %v584_v60 = vpop.permute.xlu2 %583 }
 0x1b5   :  { %v564_v2 = vpop.permute.xlu0 %563 }
 0x1bd   :  { %v589_v53 = vpop.permute.xlu0 %588 }
 0x1da   :  { %v579_v51 = vpop.permute.xlu1 %578 }
 0x1e2   :  { %v594_v61 = vpop.permute.xlu1 %593 }
 0x21b   :  { %v638_v48 = vpop.f32.mrf.mxu0  ;;  %v644_v13 = vpop.f32.mrf.mxu1 }
 0x21c   :  { %v639_v35 = vadd.f32 %v638_v48, %v559_v45  ;;  %v645_v62 = vadd.f32 %v644_v13, %v569_v46 }
 0x21e   :  { %v662_v8 = vmax.f32 %v639_v35, 0.0  ;;  %v664_v12 = vmax.f32 %v645_v62, 0.0 }
 0x220   :  { %670 = vst [vmem:[%s1333_s5] sm:$0xff] %v662_v8 }
 0x221   :  { %672 = vst [vmem:[%s1333_s5 + $0x10] sm:$0xff] %v664_v12 }
 0x222   :  { %v650_v56 = vpop.f32.mrf.mxu2  ;;  %v656_v9 = vpop.f32.mrf.mxu3 }
 0x223   :  { %v651_v58 = vadd.f32 %v650_v56, %v579_v51  ;;  %v657_v16 = vadd.f32 %v656_v9, %v589_v53  ;;  %v641_v37 = vpop.f32.mrf.mxu0  ;;  %v647_v29 = vpop.f32.mrf.mxu1 }
 0x224   :  { %v642_v36 = vadd.f32 %v641_v37, %v564_v2  ;;  %v648_v7 = vadd.f32 %v647_v29, %v574_v27 }
 0x225   :  { %v666_v50 = vmax.f32 %v651_v58, 0.0  ;;  %v668_v59 = vmax.f32 %v657_v16, 0.0 }
 0x226   :  { %v663_v49 = vmax.f32 %v642_v36, 0.0  ;;  %v665_v55 = vmax.f32 %v648_v7, 0.0 }
 0x227   :  { %674 = vst [vmem:[%s1333_s5 + $0x20] sm:$0xff] %v666_v50 }
 0x228   :  { %676 = vst [vmem:[%s1333_s5 + $0x30] sm:$0xff] %v668_v59 }
 0x229   :  { %671 = vst [vmem:[%s1333_s5 + $0x8] sm:$0xff] %v663_v49 }
 0x22a   :  { %673 = vst [vmem:[%s1333_s5 + $0x18] sm:$0xff] %v665_v55  ;;  %v653_v40 = vpop.f32.mrf.mxu2  ;;  %v659_v18 = vpop.f32.mrf.mxu3 }
 0x22b   :  { %v654_v14 = vadd.f32 %v653_v40, %v584_v60  ;;  %v660_v17 = vadd.f32 %v659_v18, %v594_v61 }
 0x22d   :  { %v667_v3 = vmax.f32 %v654_v14, 0.0  ;;  %v669_v21 = vmax.f32 %v660_v17, 0.0 }
 0x22f   :  { %675 = vst [vmem:[%s1333_s5 + $0x28] sm:$0xff] %v667_v3 }
 0x230   :  { %677 = vst [vmem:[%s1333_s5 + $0x38] sm:$0xff] %v669_v21 }

</bundles_post_ra>
